<compile_context>
chip_gen: v5e
topology: v5e:2x2
jax: 0.10.0
libtpu: 0.0.40
codegen_flags: <defaults>
</compile_context>

<pallas_src>
import jax
import jax.numpy as jnp
from jax import lax
from jax.experimental import pallas as pl
from jax.experimental.pallas import tpu as pltpu

T = 100
STATE_DIM = 6
ACTION_DIM = 2
EXT = STATE_DIM + ACTION_DIM  # 8 : extended vector [ state@A (6) | action (2) ]


def _rollout_kernel(params_ref, err_ref):
    """Full T-step rollout + final error, all in VMEM, no MXU, no grid."""
    # ---- one-time prologue (hoisted out of the loop): unpack packed slab ----
    w1t = params_ref[0:EXT, :]                       # (8,8) = [A | Wc]^T
    w2 = params_ref[EXT:2 * EXT, :]                  # (8,8) = [[I6,0],[B,0]]
    b_full = params_ref[2 * EXT:3 * EXT, :]          # (8,8) rows 6,7 = bc0,bc1
    w_err = params_ref[3 * EXT:3 * EXT + 1, :]       # (1,8) error weights (padded)
    s_row = params_ref[3 * EXT + 1:3 * EXT + 2, :]   # (1,8) initial state (padded)

    row_ids = lax.broadcasted_iota(jnp.int32, (EXT, EXT), 0)
    act_mask = row_ids >= STATE_DIM                  # rows 6,7 -> controller lanes

    # ---- fully unrolled rollout: per step
    #   col[j]  = sum_i s_i * W1[i,j]      (lanes->sublanes, XLU lane-reduce)
    #   ext     = where(act, tanh(col+bc), col)          (EUP + VPU select)
    #   s'[j]   = sum_i ext_i * W2[i,j]    (sublanes->lanes, XLU sublane-reduce)
    # Only ~6 single-vreg vector ops per step; no MXU round-trips, no transposes.
    for _ in range(T):
        prod1 = s_row * w1t                                   # (1,8)*(8,8) -> (8,8)
        col = jnp.sum(prod1, axis=1, keepdims=True)           # (8,1)
        pre = col + b_full                                    # (8,8)
        ext = jnp.where(act_mask, jnp.tanh(pre), pre)         # (8,8)
        s_row = jnp.sum(ext * w2, axis=0, keepdims=True)      # (1,8), lanes 6,7 = 0

    # error(state) = s0^2 + s1^2 + s2^2 + 3*s3^2 + s4^2 + s5^2
    err_ref[...] = jnp.sum(w_err * s_row * s_row, keepdims=True)


def _pack_params(state0, wc, bc, dyn_a, dyn_b, w_err):
    """Pack all parameters into a single (32, 8) f32 slab (one DMA)."""
    f32 = jnp.float32

    # W1 = [A | Wc] padded to 8x8 (rows 6,7 zero); kernel uses its transpose.
    w1 = jnp.zeros((EXT, EXT), f32)
    w1 = w1.at[:STATE_DIM, :STATE_DIM].set(dyn_a.astype(f32))
    w1 = w1.at[:STATE_DIM, STATE_DIM:].set(wc.astype(f32))

    # W2 = [[I6, 0], [B, 0]]  ->  ext @ W2 = state@A + action@B (lanes 6,7 = 0).
    w2 = jnp.zeros((EXT, EXT), f32)
    w2 = w2.at[:STATE_DIM, :STATE_DIM].set(jnp.eye(STATE_DIM, dtype=f32))
    w2 = w2.at[STATE_DIM:, :STATE_DIM].set(dyn_b.astype(f32))

    # Bias as a full (8,8) tile: rows 6,7 replicate bc0, bc1 across lanes.
    b_full = jnp.zeros((EXT, EXT), f32)
    b_full = b_full.at[STATE_DIM:, :].set(
        jnp.broadcast_to(bc.astype(f32).reshape(ACTION_DIM, 1), (ACTION_DIM, EXT)))

    # Misc block: row 0 = error weights (padded), row 1 = initial state (padded).
    misc = jnp.zeros((EXT, EXT), f32)
    misc = misc.at[0, :STATE_DIM].set(w_err.astype(f32).reshape(-1))
    misc = misc.at[1, :STATE_DIM].set(state0.astype(f32).reshape(-1))

    return jnp.concatenate([w1.T, w2, b_full, misc], axis=0)  # (32, 8)


@jax.jit
def simulation_forward(state0, wc, bc, dyn_a, dyn_b, w_err):
    """Wrapper: pack everything into one tiny VMEM-resident slab, no grid."""
    params = _pack_params(state0, wc, bc, dyn_a, dyn_b, w_err)
    return pl.pallas_call(
        _rollout_kernel,
        out_shape=jax.ShapeDtypeStruct((1, 1), jnp.float32),
        in_specs=[pl.BlockSpec(memory_space=pltpu.MemorySpace.VMEM)],
        out_specs=pl.BlockSpec(memory_space=pltpu.MemorySpace.VMEM),
    )(params)


def _reference_forward(state0, wc, bc, dyn_a, dyn_b, w_err):
    """Pure-JAX reference mirroring the PyTorch loop semantics."""
    s = state0
    for _ in range(T):
        action = jnp.tanh(s @ wc + bc)
        s = s @ dyn_a + action @ dyn_b
    return jnp.sum(w_err * s * s, keepdims=True)


if __name__ == "__main__":
    key = jax.random.PRNGKey(0)
    k_wc, k_bc, k_a, k_b = jax.random.split(key, 4)

    # Simulation.initialize_state(): since T=100 > 0.1 -> [0,0,1,0,0,0]
    state0 = jnp.array([[0.0, 0.0, 1.0, 0.0, 0.0, 0.0]], dtype=jnp.float32)

    # Deterministic synthetic parameters for controller / dynamics.
    wc = 0.1 * jax.random.normal(k_wc, (STATE_DIM, ACTION_DIM), dtype=jnp.float32)
    bc = 0.1 * jax.random.normal(k_bc, (1, ACTION_DIM), dtype=jnp.float32)
    # Keep dynamics stable: near-identity A with a small random perturbation.
    dyn_a = (jnp.eye(STATE_DIM, dtype=jnp.float32) * 0.95
             + 0.02 * jax.random.normal(k_a, (STATE_DIM, STATE_DIM), dtype=jnp.float32))
    dyn_b = 0.1 * jax.random.normal(k_b, (ACTION_DIM, STATE_DIM), dtype=jnp.float32)

    # error(state) weights: [1, 1, 1, 3, 1, 1]
    w_err = jnp.array([[1.0, 1.0, 1.0, 3.0, 1.0, 1.0]], dtype=jnp.float32)

    # TODO(synk): the PyTorch module also appends per-step action/state
    # trajectories to Python lists (a side effect, not part of the returned
    # value); only the returned error is computed here.

    err = simulation_forward(state0, wc, bc, dyn_a, dyn_b, w_err)
    err = jax.block_until_ready(err)

    ref = _reference_forward(state0, wc, bc, dyn_a, dyn_b, w_err)
    assert err.shape == (1, 1)
    assert jnp.allclose(err, ref, rtol=1e-3, atol=1e-5), (err, ref)

    print("KERNEL_OK")
</pallas_src>

<mosaic_0001>
module attributes {stable_mosaic.version = 11 : i64} {
  func.func @_rollout_kernel(%arg0: memref<32x8xf32, #tpu.memory_space<vmem>>, %arg1: memref<1x1xf32, #tpu.memory_space<vmem>>) attributes {dimension_semantics = [], scalar_prefetch = 0 : i64, scratch_operands = 0 : i64, tpu.core_type = #tpu.core_type<tc>} {
    %c0 = arith.constant 0 : index
    %c0_0 = arith.constant 0 : index
    %0 = vector.load %arg0[%c0, %c0_0] : memref<32x8xf32, #tpu.memory_space<vmem>>, vector<8x8xf32>
    %c8 = arith.constant 8 : index
    %c0_1 = arith.constant 0 : index
    %1 = vector.load %arg0[%c8, %c0_1] : memref<32x8xf32, #tpu.memory_space<vmem>>, vector<8x8xf32>
    %c16 = arith.constant 16 : index
    %c0_2 = arith.constant 0 : index
    %2 = vector.load %arg0[%c16, %c0_2] : memref<32x8xf32, #tpu.memory_space<vmem>>, vector<8x8xf32>
    %c24 = arith.constant 24 : index
    %c0_3 = arith.constant 0 : index
    %3 = vector.load %arg0[%c24, %c0_3] : memref<32x8xf32, #tpu.memory_space<vmem>>, vector<1x8xf32>
    %c25 = arith.constant 25 : index
    %c0_4 = arith.constant 0 : index
    %4 = vector.load %arg0[%c25, %c0_4] : memref<32x8xf32, #tpu.memory_space<vmem>>, vector<1x8xf32>
    %5 = tpu.iota {dimensions = array<i32: 0>} : vector<8x8xi32>
    %c6_i32 = arith.constant 6 : i32
    %6 = vector.broadcast %c6_i32 : i32 to vector<8x8xi32>
    %7 = arith.cmpi sge, %5, %6 : vector<8x8xi32>
    %8 = vector.broadcast %4 : vector<1x8xf32> to vector<8x8xf32>
    %9 = arith.mulf %8, %0 : vector<8x8xf32>
    %cst = arith.constant dense<0.000000e+00> : vector<8xf32>
    %10 = vector.multi_reduction <add>, %9, %cst [1] : vector<8x8xf32> to vector<8xf32>
    %11 = vector.shape_cast %10 : vector<8xf32> to vector<8x1xf32>
    %12 = vector.broadcast %11 : vector<8x1xf32> to vector<8x8xf32>
    %13 = arith.addf %12, %2 : vector<8x8xf32>
    %14 = math.tanh %13 : vector<8x8xf32>
    %15 = arith.select %7, %14, %13 : vector<8x8xi1>, vector<8x8xf32>
    %16 = arith.mulf %15, %1 : vector<8x8xf32>
    %cst_5 = arith.constant dense<0.000000e+00> : vector<8xf32>
    %17 = vector.multi_reduction <add>, %16, %cst_5 [0] : vector<8x8xf32> to vector<8xf32>
    %18 = vector.shape_cast %17 : vector<8xf32> to vector<1x8xf32>
    %19 = vector.broadcast %18 : vector<1x8xf32> to vector<8x8xf32>
    %20 = arith.mulf %19, %0 : vector<8x8xf32>
    %cst_6 = arith.constant dense<0.000000e+00> : vector<8xf32>
    %21 = vector.multi_reduction <add>, %20, %cst_6 [1] : vector<8x8xf32> to vector<8xf32>
    %22 = vector.shape_cast %21 : vector<8xf32> to vector<8x1xf32>
    %23 = vector.broadcast %22 : vector<8x1xf32> to vector<8x8xf32>
    %24 = arith.addf %23, %2 : vector<8x8xf32>
    %25 = math.tanh %24 : vector<8x8xf32>
    %26 = arith.select %7, %25, %24 : vector<8x8xi1>, vector<8x8xf32>
    %27 = arith.mulf %26, %1 : vector<8x8xf32>
    %cst_7 = arith.constant dense<0.000000e+00> : vector<8xf32>
    %28 = vector.multi_reduction <add>, %27, %cst_7 [0] : vector<8x8xf32> to vector<8xf32>
    %29 = vector.shape_cast %28 : vector<8xf32> to vector<1x8xf32>
    %30 = vector.broadcast %29 : vector<1x8xf32> to vector<8x8xf32>
    %31 = arith.mulf %30, %0 : vector<8x8xf32>
    %cst_8 = arith.constant dense<0.000000e+00> : vector<8xf32>
    %32 = vector.multi_reduction <add>, %31, %cst_8 [1] : vector<8x8xf32> to vector<8xf32>
    %33 = vector.shape_cast %32 : vector<8xf32> to vector<8x1xf32>
    %34 = vector.broadcast %33 : vector<8x1xf32> to vector<8x8xf32>
    %35 = arith.addf %34, %2 : vector<8x8xf32>
    %36 = math.tanh %35 : vector<8x8xf32>
    %37 = arith.select %7, %36, %35 : vector<8x8xi1>, vector<8x8xf32>
    %38 = arith.mulf %37, %1 : vector<8x8xf32>
    %cst_9 = arith.constant dense<0.000000e+00> : vector<8xf32>
    %39 = vector.multi_reduction <add>, %38, %cst_9 [0] : vector<8x8xf32> to vector<8xf32>
    %40 = vector.shape_cast %39 : vector<8xf32> to vector<1x8xf32>
    %41 = vector.broadcast %40 : vector<1x8xf32> to vector<8x8xf32>
    %42 = arith.mulf %41, %0 : vector<8x8xf32>
    %cst_10 = arith.constant dense<0.000000e+00> : vector<8xf32>
    %43 = vector.multi_reduction <add>, %42, %cst_10 [1] : vector<8x8xf32> to vector<8xf32>
    %44 = vector.shape_cast %43 : vector<8xf32> to vector<8x1xf32>
    %45 = vector.broadcast %44 : vector<8x1xf32> to vector<8x8xf32>
    %46 = arith.addf %45, %2 : vector<8x8xf32>
    %47 = math.tanh %46 : vector<8x8xf32>
    %48 = arith.select %7, %47, %46 : vector<8x8xi1>, vector<8x8xf32>
    %49 = arith.mulf %48, %1 : vector<8x8xf32>
    %cst_11 = arith.constant dense<0.000000e+00> : vector<8xf32>
    %50 = vector.multi_reduction <add>, %49, %cst_11 [0] : vector<8x8xf32> to vector<8xf32>
    %51 = vector.shape_cast %50 : vector<8xf32> to vector<1x8xf32>
    %52 = vector.broadcast %51 : vector<1x8xf32> to vector<8x8xf32>
    %53 = arith.mulf %52, %0 : vector<8x8xf32>
    %cst_12 = arith.constant dense<0.000000e+00> : vector<8xf32>
    %54 = vector.multi_reduction <add>, %53, %cst_12 [1] : vector<8x8xf32> to vector<8xf32>
    %55 = vector.shape_cast %54 : vector<8xf32> to vector<8x1xf32>
    %56 = vector.broadcast %55 : vector<8x1xf32> to vector<8x8xf32>
    %57 = arith.addf %56, %2 : vector<8x8xf32>
    %58 = math.tanh %57 : vector<8x8xf32>
    %59 = arith.select %7, %58, %57 : vector<8x8xi1>, vector<8x8xf32>
    %60 = arith.mulf %59, %1 : vector<8x8xf32>
    %cst_13 = arith.constant dense<0.000000e+00> : vector<8xf32>
    %61 = vector.multi_reduction <add>, %60, %cst_13 [0] : vector<8x8xf32> to vector<8xf32>
    %62 = vector.shape_cast %61 : vector<8xf32> to vector<1x8xf32>
    %63 = vector.broadcast %62 : vector<1x8xf32> to vector<8x8xf32>
    %64 = arith.mulf %63, %0 : vector<8x8xf32>
    %cst_14 = arith.constant dense<0.000000e+00> : vector<8xf32>
    %65 = vector.multi_reduction <add>, %64, %cst_14 [1] : vector<8x8xf32> to vector<8xf32>
    %66 = vector.shape_cast %65 : vector<8xf32> to vector<8x1xf32>
    %67 = vector.broadcast %66 : vector<8x1xf32> to vector<8x8xf32>
    %68 = arith.addf %67, %2 : vector<8x8xf32>
    %69 = math.tanh %68 : vector<8x8xf32>
    %70 = arith.select %7, %69, %68 : vector<8x8xi1>, vector<8x8xf32>
    %71 = arith.mulf %70, %1 : vector<8x8xf32>
    %cst_15 = arith.constant dense<0.000000e+00> : vector<8xf32>
    %72 = vector.multi_reduction <add>, %71, %cst_15 [0] : vector<8x8xf32> to vector<8xf32>
    %73 = vector.shape_cast %72 : vector<8xf32> to vector<1x8xf32>
    %74 = vector.broadcast %73 : vector<1x8xf32> to vector<8x8xf32>
    %75 = arith.mulf %74, %0 : vector<8x8xf32>
    %cst_16 = arith.constant dense<0.000000e+00> : vector<8xf32>
    %76 = vector.multi_reduction <add>, %75, %cst_16 [1] : vector<8x8xf32> to vector<8xf32>
    %77 = vector.shape_cast %76 : vector<8xf32> to vector<8x1xf32>
    %78 = vector.broadcast %77 : vector<8x1xf32> to vector<8x8xf32>
    %79 = arith.addf %78, %2 : vector<8x8xf32>
    %80 = math.tanh %79 : vector<8x8xf32>
    %81 = arith.select %7, %80, %79 : vector<8x8xi1>, vector<8x8xf32>
    %82 = arith.mulf %81, %1 : vector<8x8xf32>
    %cst_17 = arith.constant dense<0.000000e+00> : vector<8xf32>
    %83 = vector.multi_reduction <add>, %82, %cst_17 [0] : vector<8x8xf32> to vector<8xf32>
    %84 = vector.shape_cast %83 : vector<8xf32> to vector<1x8xf32>
    %85 = vector.broadcast %84 : vector<1x8xf32> to vector<8x8xf32>
    %86 = arith.mulf %85, %0 : vector<8x8xf32>
    %cst_18 = arith.constant dense<0.000000e+00> : vector<8xf32>
    %87 = vector.multi_reduction <add>, %86, %cst_18 [1] : vector<8x8xf32> to vector<8xf32>
    %88 = vector.shape_cast %87 : vector<8xf32> to vector<8x1xf32>
    %89 = vector.broadcast %88 : vector<8x1xf32> to vector<8x8xf32>
    %90 = arith.addf %89, %2 : vector<8x8xf32>
    %91 = math.tanh %90 : vector<8x8xf32>
    %92 = arith.select %7, %91, %90 : vector<8x8xi1>, vector<8x8xf32>
    %93 = arith.mulf %92, %1 : vector<8x8xf32>
    %cst_19 = arith.constant dense<0.000000e+00> : vector<8xf32>
    %94 = vector.multi_reduction <add>, %93, %cst_19 [0] : vector<8x8xf32> to vector<8xf32>
    %95 = vector.shape_cast %94 : vector<8xf32> to vector<1x8xf32>
    %96 = vector.broadcast %95 : vector<1x8xf32> to vector<8x8xf32>
    %97 = arith.mulf %96, %0 : vector<8x8xf32>
    %cst_20 = arith.constant dense<0.000000e+00> : vector<8xf32>
    %98 = vector.multi_reduction <add>, %97, %cst_20 [1] : vector<8x8xf32> to vector<8xf32>
    %99 = vector.shape_cast %98 : vector<8xf32> to vector<8x1xf32>
    %100 = vector.broadcast %99 : vector<8x1xf32> to vector<8x8xf32>
    %101 = arith.addf %100, %2 : vector<8x8xf32>
    %102 = math.tanh %101 : vector<8x8xf32>
    %103 = arith.select %7, %102, %101 : vector<8x8xi1>, vector<8x8xf32>
    %104 = arith.mulf %103, %1 : vector<8x8xf32>
    %cst_21 = arith.constant dense<0.000000e+00> : vector<8xf32>
    %105 = vector.multi_reduction <add>, %104, %cst_21 [0] : vector<8x8xf32> to vector<8xf32>
    %106 = vector.shape_cast %105 : vector<8xf32> to vector<1x8xf32>
    %107 = vector.broadcast %106 : vector<1x8xf32> to vector<8x8xf32>
    %108 = arith.mulf %107, %0 : vector<8x8xf32>
    %cst_22 = arith.constant dense<0.000000e+00> : vector<8xf32>
    %109 = vector.multi_reduction <add>, %108, %cst_22 [1] : vector<8x8xf32> to vector<8xf32>
    %110 = vector.shape_cast %109 : vector<8xf32> to vector<8x1xf32>
    %111 = vector.broadcast %110 : vector<8x1xf32> to vector<8x8xf32>
    %112 = arith.addf %111, %2 : vector<8x8xf32>
    %113 = math.tanh %112 : vector<8x8xf32>
    %114 = arith.select %7, %113, %112 : vector<8x8xi1>, vector<8x8xf32>
    %115 = arith.mulf %114, %1 : vector<8x8xf32>
    %cst_23 = arith.constant dense<0.000000e+00> : vector<8xf32>
    %116 = vector.multi_reduction <add>, %115, %cst_23 [0] : vector<8x8xf32> to vector<8xf32>
    %117 = vector.shape_cast %116 : vector<8xf32> to vector<1x8xf32>
    %118 = vector.broadcast %117 : vector<1x8xf32> to vector<8x8xf32>
    %119 = arith.mulf %118, %0 : vector<8x8xf32>
    %cst_24 = arith.constant dense<0.000000e+00> : vector<8xf32>
    %120 = vector.multi_reduction <add>, %119, %cst_24 [1] : vector<8x8xf32> to vector<8xf32>
    %121 = vector.shape_cast %120 : vector<8xf32> to vector<8x1xf32>
    %122 = vector.broadcast %121 : vector<8x1xf32> to vector<8x8xf32>
    %123 = arith.addf %122, %2 : vector<8x8xf32>
    %124 = math.tanh %123 : vector<8x8xf32>
    %125 = arith.select %7, %124, %123 : vector<8x8xi1>, vector<8x8xf32>
    %126 = arith.mulf %125, %1 : vector<8x8xf32>
    %cst_25 = arith.constant dense<0.000000e+00> : vector<8xf32>
    %127 = vector.multi_reduction <add>, %126, %cst_25 [0] : vector<8x8xf32> to vector<8xf32>
    %128 = vector.shape_cast %127 : vector<8xf32> to vector<1x8xf32>
    %129 = vector.broadcast %128 : vector<1x8xf32> to vector<8x8xf32>
    %130 = arith.mulf %129, %0 : vector<8x8xf32>
    %cst_26 = arith.constant dense<0.000000e+00> : vector<8xf32>
    %131 = vector.multi_reduction <add>, %130, %cst_26 [1] : vector<8x8xf32> to vector<8xf32>
    %132 = vector.shape_cast %131 : vector<8xf32> to vector<8x1xf32>
    %133 = vector.broadcast %132 : vector<8x1xf32> to vector<8x8xf32>
    %134 = arith.addf %133, %2 : vector<8x8xf32>
    %135 = math.tanh %134 : vector<8x8xf32>
    %136 = arith.select %7, %135, %134 : vector<8x8xi1>, vector<8x8xf32>
    %137 = arith.mulf %136, %1 : vector<8x8xf32>
    %cst_27 = arith.constant dense<0.000000e+00> : vector<8xf32>
    %138 = vector.multi_reduction <add>, %137, %cst_27 [0] : vector<8x8xf32> to vector<8xf32>
    %139 = vector.shape_cast %138 : vector<8xf32> to vector<1x8xf32>
    %140 = vector.broadcast %139 : vector<1x8xf32> to vector<8x8xf32>
    %141 = arith.mulf %140, %0 : vector<8x8xf32>
    %cst_28 = arith.constant dense<0.000000e+00> : vector<8xf32>
    %142 = vector.multi_reduction <add>, %141, %cst_28 [1] : vector<8x8xf32> to vector<8xf32>
    %143 = vector.shape_cast %142 : vector<8xf32> to vector<8x1xf32>
    %144 = vector.broadcast %143 : vector<8x1xf32> to vector<8x8xf32>
    %145 = arith.addf %144, %2 : vector<8x8xf32>
    %146 = math.tanh %145 : vector<8x8xf32>
    %147 = arith.select %7, %146, %145 : vector<8x8xi1>, vector<8x8xf32>
    %148 = arith.mulf %147, %1 : vector<8x8xf32>
    %cst_29 = arith.constant dense<0.000000e+00> : vector<8xf32>
    %149 = vector.multi_reduction <add>, %148, %cst_29 [0] : vector<8x8xf32> to vector<8xf32>
    %150 = vector.shape_cast %149 : vector<8xf32> to vector<1x8xf32>
    %151 = vector.broadcast %150 : vector<1x8xf32> to vector<8x8xf32>
    %152 = arith.mulf %151, %0 : vector<8x8xf32>
    %cst_30 = arith.constant dense<0.000000e+00> : vector<8xf32>
    %153 = vector.multi_reduction <add>, %152, %cst_30 [1] : vector<8x8xf32> to vector<8xf32>
    %154 = vector.shape_cast %153 : vector<8xf32> to vector<8x1xf32>
    %155 = vector.broadcast %154 : vector<8x1xf32> to vector<8x8xf32>
    %156 = arith.addf %155, %2 : vector<8x8xf32>
    %157 = math.tanh %156 : vector<8x8xf32>
    %158 = arith.select %7, %157, %156 : vector<8x8xi1>, vector<8x8xf32>
    %159 = arith.mulf %158, %1 : vector<8x8xf32>
    %cst_31 = arith.constant dense<0.000000e+00> : vector<8xf32>
    %160 = vector.multi_reduction <add>, %159, %cst_31 [0] : vector<8x8xf32> to vector<8xf32>
    %161 = vector.shape_cast %160 : vector<8xf32> to vector<1x8xf32>
    %162 = vector.broadcast %161 : vector<1x8xf32> to vector<8x8xf32>
    %163 = arith.mulf %162, %0 : vector<8x8xf32>
    %cst_32 = arith.constant dense<0.000000e+00> : vector<8xf32>
    %164 = vector.multi_reduction <add>, %163, %cst_32 [1] : vector<8x8xf32> to vector<8xf32>
    %165 = vector.shape_cast %164 : vector<8xf32> to vector<8x1xf32>
    %166 = vector.broadcast %165 : vector<8x1xf32> to vector<8x8xf32>
    %167 = arith.addf %166, %2 : vector<8x8xf32>
    %168 = math.tanh %167 : vector<8x8xf32>
    %169 = arith.select %7, %168, %167 : vector<8x8xi1>, vector<8x8xf32>
    %170 = arith.mulf %169, %1 : vector<8x8xf32>
    %cst_33 = arith.constant dense<0.000000e+00> : vector<8xf32>
    %171 = vector.multi_reduction <add>, %170, %cst_33 [0] : vector<8x8xf32> to vector<8xf32>
    %172 = vector.shape_cast %171 : vector<8xf32> to vector<1x8xf32>
    %173 = vector.broadcast %172 : vector<1x8xf32> to vector<8x8xf32>
    %174 = arith.mulf %173, %0 : vector<8x8xf32>
    %cst_34 = arith.constant dense<0.000000e+00> : vector<8xf32>
    %175 = vector.multi_reduction <add>, %174, %cst_34 [1] : vector<8x8xf32> to vector<8xf32>
    %176 = vector.shape_cast %175 : vector<8xf32> to vector<8x1xf32>
    %177 = vector.broadcast %176 : vector<8x1xf32> to vector<8x8xf32>
    %178 = arith.addf %177, %2 : vector<8x8xf32>
    %179 = math.tanh %178 : vector<8x8xf32>
    %180 = arith.select %7, %179, %178 : vector<8x8xi1>, vector<8x8xf32>
    %181 = arith.mulf %180, %1 : vector<8x8xf32>
    %cst_35 = arith.constant dense<0.000000e+00> : vector<8xf32>
    %182 = vector.multi_reduction <add>, %181, %cst_35 [0] : vector<8x8xf32> to vector<8xf32>
    %183 = vector.shape_cast %182 : vector<8xf32> to vector<1x8xf32>
    %184 = vector.broadcast %183 : vector<1x8xf32> to vector<8x8xf32>
    %185 = arith.mulf %184, %0 : vector<8x8xf32>
    %cst_36 = arith.constant dense<0.000000e+00> : vector<8xf32>
    %186 = vector.multi_reduction <add>, %185, %cst_36 [1] : vector<8x8xf32> to vector<8xf32>
    %187 = vector.shape_cast %186 : vector<8xf32> to vector<8x1xf32>
    %188 = vector.broadcast %187 : vector<8x1xf32> to vector<8x8xf32>
    %189 = arith.addf %188, %2 : vector<8x8xf32>
    %190 = math.tanh %189 : vector<8x8xf32>
    %191 = arith.select %7, %190, %189 : vector<8x8xi1>, vector<8x8xf32>
    %192 = arith.mulf %191, %1 : vector<8x8xf32>
    %cst_37 = arith.constant dense<0.000000e+00> : vector<8xf32>
    %193 = vector.multi_reduction <add>, %192, %cst_37 [0] : vector<8x8xf32> to vector<8xf32>
    %194 = vector.shape_cast %193 : vector<8xf32> to vector<1x8xf32>
    %195 = vector.broadcast %194 : vector<1x8xf32> to vector<8x8xf32>
    %196 = arith.mulf %195, %0 : vector<8x8xf32>
    %cst_38 = arith.constant dense<0.000000e+00> : vector<8xf32>
    %197 = vector.multi_reduction <add>, %196, %cst_38 [1] : vector<8x8xf32> to vector<8xf32>
    %198 = vector.shape_cast %197 : vector<8xf32> to vector<8x1xf32>
    %199 = vector.broadcast %198 : vector<8x1xf32> to vector<8x8xf32>
    %200 = arith.addf %199, %2 : vector<8x8xf32>
    %201 = math.tanh %200 : vector<8x8xf32>
    %202 = arith.select %7, %201, %200 : vector<8x8xi1>, vector<8x8xf32>
    %203 = arith.mulf %202, %1 : vector<8x8xf32>
    %cst_39 = arith.constant dense<0.000000e+00> : vector<8xf32>
    %204 = vector.multi_reduction <add>, %203, %cst_39 [0] : vector<8x8xf32> to vector<8xf32>
    %205 = vector.shape_cast %204 : vector<8xf32> to vector<1x8xf32>
    %206 = vector.broadcast %205 : vector<1x8xf32> to vector<8x8xf32>
    %207 = arith.mulf %206, %0 : vector<8x8xf32>
    %cst_40 = arith.constant dense<0.000000e+00> : vector<8xf32>
    %208 = vector.multi_reduction <add>, %207, %cst_40 [1] : vector<8x8xf32> to vector<8xf32>
    %209 = vector.shape_cast %208 : vector<8xf32> to vector<8x1xf32>
    %210 = vector.broadcast %209 : vector<8x1xf32> to vector<8x8xf32>
    %211 = arith.addf %210, %2 : vector<8x8xf32>
    %212 = math.tanh %211 : vector<8x8xf32>
    %213 = arith.select %7, %212, %211 : vector<8x8xi1>, vector<8x8xf32>
    %214 = arith.mulf %213, %1 : vector<8x8xf32>
    %cst_41 = arith.constant dense<0.000000e+00> : vector<8xf32>
    %215 = vector.multi_reduction <add>, %214, %cst_41 [0] : vector<8x8xf32> to vector<8xf32>
    %216 = vector.shape_cast %215 : vector<8xf32> to vector<1x8xf32>
    %217 = vector.broadcast %216 : vector<1x8xf32> to vector<8x8xf32>
    %218 = arith.mulf %217, %0 : vector<8x8xf32>
    %cst_42 = arith.constant dense<0.000000e+00> : vector<8xf32>
    %219 = vector.multi_reduction <add>, %218, %cst_42 [1] : vector<8x8xf32> to vector<8xf32>
    %220 = vector.shape_cast %219 : vector<8xf32> to vector<8x1xf32>
    %221 = vector.broadcast %220 : vector<8x1xf32> to vector<8x8xf32>
    %222 = arith.addf %221, %2 : vector<8x8xf32>
    %223 = math.tanh %222 : vector<8x8xf32>
    %224 = arith.select %7, %223, %222 : vector<8x8xi1>, vector<8x8xf32>
    %225 = arith.mulf %224, %1 : vector<8x8xf32>
    %cst_43 = arith.constant dense<0.000000e+00> : vector<8xf32>
    %226 = vector.multi_reduction <add>, %225, %cst_43 [0] : vector<8x8xf32> to vector<8xf32>
    %227 = vector.shape_cast %226 : vector<8xf32> to vector<1x8xf32>
    %228 = vector.broadcast %227 : vector<1x8xf32> to vector<8x8xf32>
    %229 = arith.mulf %228, %0 : vector<8x8xf32>
    %cst_44 = arith.constant dense<0.000000e+00> : vector<8xf32>
    %230 = vector.multi_reduction <add>, %229, %cst_44 [1] : vector<8x8xf32> to vector<8xf32>
    %231 = vector.shape_cast %230 : vector<8xf32> to vector<8x1xf32>
    %232 = vector.broadcast %231 : vector<8x1xf32> to vector<8x8xf32>
    %233 = arith.addf %232, %2 : vector<8x8xf32>
    %234 = math.tanh %233 : vector<8x8xf32>
    %235 = arith.select %7, %234, %233 : vector<8x8xi1>, vector<8x8xf32>
    %236 = arith.mulf %235, %1 : vector<8x8xf32>
    %cst_45 = arith.constant dense<0.000000e+00> : vector<8xf32>
    %237 = vector.multi_reduction <add>, %236, %cst_45 [0] : vector<8x8xf32> to vector<8xf32>
    %238 = vector.shape_cast %237 : vector<8xf32> to vector<1x8xf32>
    %239 = vector.broadcast %238 : vector<1x8xf32> to vector<8x8xf32>
    %240 = arith.mulf %239, %0 : vector<8x8xf32>
    %cst_46 = arith.constant dense<0.000000e+00> : vector<8xf32>
    %241 = vector.multi_reduction <add>, %240, %cst_46 [1] : vector<8x8xf32> to vector<8xf32>
    %242 = vector.shape_cast %241 : vector<8xf32> to vector<8x1xf32>
    %243 = vector.broadcast %242 : vector<8x1xf32> to vector<8x8xf32>
    %244 = arith.addf %243, %2 : vector<8x8xf32>
    %245 = math.tanh %244 : vector<8x8xf32>
    %246 = arith.select %7, %245, %244 : vector<8x8xi1>, vector<8x8xf32>
    %247 = arith.mulf %246, %1 : vector<8x8xf32>
    %cst_47 = arith.constant dense<0.000000e+00> : vector<8xf32>
    %248 = vector.multi_reduction <add>, %247, %cst_47 [0] : vector<8x8xf32> to vector<8xf32>
    %249 = vector.shape_cast %248 : vector<8xf32> to vector<1x8xf32>
    %250 = vector.broadcast %249 : vector<1x8xf32> to vector<8x8xf32>
    %251 = arith.mulf %250, %0 : vector<8x8xf32>
    %cst_48 = arith.constant dense<0.000000e+00> : vector<8xf32>
    %252 = vector.multi_reduction <add>, %251, %cst_48 [1] : vector<8x8xf32> to vector<8xf32>
    %253 = vector.shape_cast %252 : vector<8xf32> to vector<8x1xf32>
    %254 = vector.broadcast %253 : vector<8x1xf32> to vector<8x8xf32>
    %255 = arith.addf %254, %2 : vector<8x8xf32>
    %256 = math.tanh %255 : vector<8x8xf32>
    %257 = arith.select %7, %256, %255 : vector<8x8xi1>, vector<8x8xf32>
    %258 = arith.mulf %257, %1 : vector<8x8xf32>
    %cst_49 = arith.constant dense<0.000000e+00> : vector<8xf32>
    %259 = vector.multi_reduction <add>, %258, %cst_49 [0] : vector<8x8xf32> to vector<8xf32>
    %260 = vector.shape_cast %259 : vector<8xf32> to vector<1x8xf32>
    %261 = vector.broadcast %260 : vector<1x8xf32> to vector<8x8xf32>
    %262 = arith.mulf %261, %0 : vector<8x8xf32>
    %cst_50 = arith.constant dense<0.000000e+00> : vector<8xf32>
    %263 = vector.multi_reduction <add>, %262, %cst_50 [1] : vector<8x8xf32> to vector<8xf32>
    %264 = vector.shape_cast %263 : vector<8xf32> to vector<8x1xf32>
    %265 = vector.broadcast %264 : vector<8x1xf32> to vector<8x8xf32>
    %266 = arith.addf %265, %2 : vector<8x8xf32>
    %267 = math.tanh %266 : vector<8x8xf32>
    %268 = arith.select %7, %267, %266 : vector<8x8xi1>, vector<8x8xf32>
    %269 = arith.mulf %268, %1 : vector<8x8xf32>
    %cst_51 = arith.constant dense<0.000000e+00> : vector<8xf32>
    %270 = vector.multi_reduction <add>, %269, %cst_51 [0] : vector<8x8xf32> to vector<8xf32>
    %271 = vector.shape_cast %270 : vector<8xf32> to vector<1x8xf32>
    %272 = vector.broadcast %271 : vector<1x8xf32> to vector<8x8xf32>
    %273 = arith.mulf %272, %0 : vector<8x8xf32>
    %cst_52 = arith.constant dense<0.000000e+00> : vector<8xf32>
    %274 = vector.multi_reduction <add>, %273, %cst_52 [1] : vector<8x8xf32> to vector<8xf32>
    %275 = vector.shape_cast %274 : vector<8xf32> to vector<8x1xf32>
    %276 = vector.broadcast %275 : vector<8x1xf32> to vector<8x8xf32>
    %277 = arith.addf %276, %2 : vector<8x8xf32>
    %278 = math.tanh %277 : vector<8x8xf32>
    %279 = arith.select %7, %278, %277 : vector<8x8xi1>, vector<8x8xf32>
    %280 = arith.mulf %279, %1 : vector<8x8xf32>
    %cst_53 = arith.constant dense<0.000000e+00> : vector<8xf32>
    %281 = vector.multi_reduction <add>, %280, %cst_53 [0] : vector<8x8xf32> to vector<8xf32>
    %282 = vector.shape_cast %281 : vector<8xf32> to vector<1x8xf32>
    %283 = vector.broadcast %282 : vector<1x8xf32> to vector<8x8xf32>
    %284 = arith.mulf %283, %0 : vector<8x8xf32>
    %cst_54 = arith.constant dense<0.000000e+00> : vector<8xf32>
    %285 = vector.multi_reduction <add>, %284, %cst_54 [1] : vector<8x8xf32> to vector<8xf32>
    %286 = vector.shape_cast %285 : vector<8xf32> to vector<8x1xf32>
    %287 = vector.broadcast %286 : vector<8x1xf32> to vector<8x8xf32>
    %288 = arith.addf %287, %2 : vector<8x8xf32>
    %289 = math.tanh %288 : vector<8x8xf32>
    %290 = arith.select %7, %289, %288 : vector<8x8xi1>, vector<8x8xf32>
    %291 = arith.mulf %290, %1 : vector<8x8xf32>
    %cst_55 = arith.constant dense<0.000000e+00> : vector<8xf32>
    %292 = vector.multi_reduction <add>, %291, %cst_55 [0] : vector<8x8xf32> to vector<8xf32>
    %293 = vector.shape_cast %292 : vector<8xf32> to vector<1x8xf32>
    %294 = vector.broadcast %293 : vector<1x8xf32> to vector<8x8xf32>
    %295 = arith.mulf %294, %0 : vector<8x8xf32>
    %cst_56 = arith.constant dense<0.000000e+00> : vector<8xf32>
    %296 = vector.multi_reduction <add>, %295, %cst_56 [1] : vector<8x8xf32> to vector<8xf32>
    %297 = vector.shape_cast %296 : vector<8xf32> to vector<8x1xf32>
    %298 = vector.broadcast %297 : vector<8x1xf32> to vector<8x8xf32>
    %299 = arith.addf %298, %2 : vector<8x8xf32>
    %300 = math.tanh %299 : vector<8x8xf32>
    %301 = arith.select %7, %300, %299 : vector<8x8xi1>, vector<8x8xf32>
    %302 = arith.mulf %301, %1 : vector<8x8xf32>
    %cst_57 = arith.constant dense<0.000000e+00> : vector<8xf32>
    %303 = vector.multi_reduction <add>, %302, %cst_57 [0] : vector<8x8xf32> to vector<8xf32>
    %304 = vector.shape_cast %303 : vector<8xf32> to vector<1x8xf32>
    %305 = vector.broadcast %304 : vector<1x8xf32> to vector<8x8xf32>
    %306 = arith.mulf %305, %0 : vector<8x8xf32>
    %cst_58 = arith.constant dense<0.000000e+00> : vector<8xf32>
    %307 = vector.multi_reduction <add>, %306, %cst_58 [1] : vector<8x8xf32> to vector<8xf32>
    %308 = vector.shape_cast %307 : vector<8xf32> to vector<8x1xf32>
    %309 = vector.broadcast %308 : vector<8x1xf32> to vector<8x8xf32>
    %310 = arith.addf %309, %2 : vector<8x8xf32>
    %311 = math.tanh %310 : vector<8x8xf32>
    %312 = arith.select %7, %311, %310 : vector<8x8xi1>, vector<8x8xf32>
    %313 = arith.mulf %312, %1 : vector<8x8xf32>
    %cst_59 = arith.constant dense<0.000000e+00> : vector<8xf32>
    %314 = vector.multi_reduction <add>, %313, %cst_59 [0] : vector<8x8xf32> to vector<8xf32>
    %315 = vector.shape_cast %314 : vector<8xf32> to vector<1x8xf32>
    %316 = vector.broadcast %315 : vector<1x8xf32> to vector<8x8xf32>
    %317 = arith.mulf %316, %0 : vector<8x8xf32>
    %cst_60 = arith.constant dense<0.000000e+00> : vector<8xf32>
    %318 = vector.multi_reduction <add>, %317, %cst_60 [1] : vector<8x8xf32> to vector<8xf32>
    %319 = vector.shape_cast %318 : vector<8xf32> to vector<8x1xf32>
    %320 = vector.broadcast %319 : vector<8x1xf32> to vector<8x8xf32>
    %321 = arith.addf %320, %2 : vector<8x8xf32>
    %322 = math.tanh %321 : vector<8x8xf32>
    %323 = arith.select %7, %322, %321 : vector<8x8xi1>, vector<8x8xf32>
    %324 = arith.mulf %323, %1 : vector<8x8xf32>
    %cst_61 = arith.constant dense<0.000000e+00> : vector<8xf32>
    %325 = vector.multi_reduction <add>, %324, %cst_61 [0] : vector<8x8xf32> to vector<8xf32>
    %326 = vector.shape_cast %325 : vector<8xf32> to vector<1x8xf32>
    %327 = vector.broadcast %326 : vector<1x8xf32> to vector<8x8xf32>
    %328 = arith.mulf %327, %0 : vector<8x8xf32>
    %cst_62 = arith.constant dense<0.000000e+00> : vector<8xf32>
    %329 = vector.multi_reduction <add>, %328, %cst_62 [1] : vector<8x8xf32> to vector<8xf32>
    %330 = vector.shape_cast %329 : vector<8xf32> to vector<8x1xf32>
    %331 = vector.broadcast %330 : vector<8x1xf32> to vector<8x8xf32>
    %332 = arith.addf %331, %2 : vector<8x8xf32>
    %333 = math.tanh %332 : vector<8x8xf32>
    %334 = arith.select %7, %333, %332 : vector<8x8xi1>, vector<8x8xf32>
    %335 = arith.mulf %334, %1 : vector<8x8xf32>
    %cst_63 = arith.constant dense<0.000000e+00> : vector<8xf32>
    %336 = vector.multi_reduction <add>, %335, %cst_63 [0] : vector<8x8xf32> to vector<8xf32>
    %337 = vector.shape_cast %336 : vector<8xf32> to vector<1x8xf32>
    %338 = vector.broadcast %337 : vector<1x8xf32> to vector<8x8xf32>
    %339 = arith.mulf %338, %0 : vector<8x8xf32>
    %cst_64 = arith.constant dense<0.000000e+00> : vector<8xf32>
    %340 = vector.multi_reduction <add>, %339, %cst_64 [1] : vector<8x8xf32> to vector<8xf32>
    %341 = vector.shape_cast %340 : vector<8xf32> to vector<8x1xf32>
    %342 = vector.broadcast %341 : vector<8x1xf32> to vector<8x8xf32>
    %343 = arith.addf %342, %2 : vector<8x8xf32>
    %344 = math.tanh %343 : vector<8x8xf32>
    %345 = arith.select %7, %344, %343 : vector<8x8xi1>, vector<8x8xf32>
    %346 = arith.mulf %345, %1 : vector<8x8xf32>
    %cst_65 = arith.constant dense<0.000000e+00> : vector<8xf32>
    %347 = vector.multi_reduction <add>, %346, %cst_65 [0] : vector<8x8xf32> to vector<8xf32>
    %348 = vector.shape_cast %347 : vector<8xf32> to vector<1x8xf32>
    %349 = vector.broadcast %348 : vector<1x8xf32> to vector<8x8xf32>
    %350 = arith.mulf %349, %0 : vector<8x8xf32>
    %cst_66 = arith.constant dense<0.000000e+00> : vector<8xf32>
    %351 = vector.multi_reduction <add>, %350, %cst_66 [1] : vector<8x8xf32> to vector<8xf32>
    %352 = vector.shape_cast %351 : vector<8xf32> to vector<8x1xf32>
    %353 = vector.broadcast %352 : vector<8x1xf32> to vector<8x8xf32>
    %354 = arith.addf %353, %2 : vector<8x8xf32>
    %355 = math.tanh %354 : vector<8x8xf32>
    %356 = arith.select %7, %355, %354 : vector<8x8xi1>, vector<8x8xf32>
    %357 = arith.mulf %356, %1 : vector<8x8xf32>
    %cst_67 = arith.constant dense<0.000000e+00> : vector<8xf32>
    %358 = vector.multi_reduction <add>, %357, %cst_67 [0] : vector<8x8xf32> to vector<8xf32>
    %359 = vector.shape_cast %358 : vector<8xf32> to vector<1x8xf32>
    %360 = vector.broadcast %359 : vector<1x8xf32> to vector<8x8xf32>
    %361 = arith.mulf %360, %0 : vector<8x8xf32>
    %cst_68 = arith.constant dense<0.000000e+00> : vector<8xf32>
    %362 = vector.multi_reduction <add>, %361, %cst_68 [1] : vector<8x8xf32> to vector<8xf32>
    %363 = vector.shape_cast %362 : vector<8xf32> to vector<8x1xf32>
    %364 = vector.broadcast %363 : vector<8x1xf32> to vector<8x8xf32>
    %365 = arith.addf %364, %2 : vector<8x8xf32>
    %366 = math.tanh %365 : vector<8x8xf32>
    %367 = arith.select %7, %366, %365 : vector<8x8xi1>, vector<8x8xf32>
    %368 = arith.mulf %367, %1 : vector<8x8xf32>
    %cst_69 = arith.constant dense<0.000000e+00> : vector<8xf32>
    %369 = vector.multi_reduction <add>, %368, %cst_69 [0] : vector<8x8xf32> to vector<8xf32>
    %370 = vector.shape_cast %369 : vector<8xf32> to vector<1x8xf32>
    %371 = vector.broadcast %370 : vector<1x8xf32> to vector<8x8xf32>
    %372 = arith.mulf %371, %0 : vector<8x8xf32>
    %cst_70 = arith.constant dense<0.000000e+00> : vector<8xf32>
    %373 = vector.multi_reduction <add>, %372, %cst_70 [1] : vector<8x8xf32> to vector<8xf32>
    %374 = vector.shape_cast %373 : vector<8xf32> to vector<8x1xf32>
    %375 = vector.broadcast %374 : vector<8x1xf32> to vector<8x8xf32>
    %376 = arith.addf %375, %2 : vector<8x8xf32>
    %377 = math.tanh %376 : vector<8x8xf32>
    %378 = arith.select %7, %377, %376 : vector<8x8xi1>, vector<8x8xf32>
    %379 = arith.mulf %378, %1 : vector<8x8xf32>
    %cst_71 = arith.constant dense<0.000000e+00> : vector<8xf32>
    %380 = vector.multi_reduction <add>, %379, %cst_71 [0] : vector<8x8xf32> to vector<8xf32>
    %381 = vector.shape_cast %380 : vector<8xf32> to vector<1x8xf32>
    %382 = vector.broadcast %381 : vector<1x8xf32> to vector<8x8xf32>
    %383 = arith.mulf %382, %0 : vector<8x8xf32>
    %cst_72 = arith.constant dense<0.000000e+00> : vector<8xf32>
    %384 = vector.multi_reduction <add>, %383, %cst_72 [1] : vector<8x8xf32> to vector<8xf32>
    %385 = vector.shape_cast %384 : vector<8xf32> to vector<8x1xf32>
    %386 = vector.broadcast %385 : vector<8x1xf32> to vector<8x8xf32>
    %387 = arith.addf %386, %2 : vector<8x8xf32>
    %388 = math.tanh %387 : vector<8x8xf32>
    %389 = arith.select %7, %388, %387 : vector<8x8xi1>, vector<8x8xf32>
    %390 = arith.mulf %389, %1 : vector<8x8xf32>
    %cst_73 = arith.constant dense<0.000000e+00> : vector<8xf32>
    %391 = vector.multi_reduction <add>, %390, %cst_73 [0] : vector<8x8xf32> to vector<8xf32>
    %392 = vector.shape_cast %391 : vector<8xf32> to vector<1x8xf32>
    %393 = vector.broadcast %392 : vector<1x8xf32> to vector<8x8xf32>
    %394 = arith.mulf %393, %0 : vector<8x8xf32>
    %cst_74 = arith.constant dense<0.000000e+00> : vector<8xf32>
    %395 = vector.multi_reduction <add>, %394, %cst_74 [1] : vector<8x8xf32> to vector<8xf32>
    %396 = vector.shape_cast %395 : vector<8xf32> to vector<8x1xf32>
    %397 = vector.broadcast %396 : vector<8x1xf32> to vector<8x8xf32>
    %398 = arith.addf %397, %2 : vector<8x8xf32>
    %399 = math.tanh %398 : vector<8x8xf32>
    %400 = arith.select %7, %399, %398 : vector<8x8xi1>, vector<8x8xf32>
    %401 = arith.mulf %400, %1 : vector<8x8xf32>
    %cst_75 = arith.constant dense<0.000000e+00> : vector<8xf32>
    %402 = vector.multi_reduction <add>, %401, %cst_75 [0] : vector<8x8xf32> to vector<8xf32>
    %403 = vector.shape_cast %402 : vector<8xf32> to vector<1x8xf32>
    %404 = vector.broadcast %403 : vector<1x8xf32> to vector<8x8xf32>
    %405 = arith.mulf %404, %0 : vector<8x8xf32>
    %cst_76 = arith.constant dense<0.000000e+00> : vector<8xf32>
    %406 = vector.multi_reduction <add>, %405, %cst_76 [1] : vector<8x8xf32> to vector<8xf32>
    %407 = vector.shape_cast %406 : vector<8xf32> to vector<8x1xf32>
    %408 = vector.broadcast %407 : vector<8x1xf32> to vector<8x8xf32>
    %409 = arith.addf %408, %2 : vector<8x8xf32>
    %410 = math.tanh %409 : vector<8x8xf32>
    %411 = arith.select %7, %410, %409 : vector<8x8xi1>, vector<8x8xf32>
    %412 = arith.mulf %411, %1 : vector<8x8xf32>
    %cst_77 = arith.constant dense<0.000000e+00> : vector<8xf32>
    %413 = vector.multi_reduction <add>, %412, %cst_77 [0] : vector<8x8xf32> to vector<8xf32>
    %414 = vector.shape_cast %413 : vector<8xf32> to vector<1x8xf32>
    %415 = vector.broadcast %414 : vector<1x8xf32> to vector<8x8xf32>
    %416 = arith.mulf %415, %0 : vector<8x8xf32>
    %cst_78 = arith.constant dense<0.000000e+00> : vector<8xf32>
    %417 = vector.multi_reduction <add>, %416, %cst_78 [1] : vector<8x8xf32> to vector<8xf32>
    %418 = vector.shape_cast %417 : vector<8xf32> to vector<8x1xf32>
    %419 = vector.broadcast %418 : vector<8x1xf32> to vector<8x8xf32>
    %420 = arith.addf %419, %2 : vector<8x8xf32>
    %421 = math.tanh %420 : vector<8x8xf32>
    %422 = arith.select %7, %421, %420 : vector<8x8xi1>, vector<8x8xf32>
    %423 = arith.mulf %422, %1 : vector<8x8xf32>
    %cst_79 = arith.constant dense<0.000000e+00> : vector<8xf32>
    %424 = vector.multi_reduction <add>, %423, %cst_79 [0] : vector<8x8xf32> to vector<8xf32>
    %425 = vector.shape_cast %424 : vector<8xf32> to vector<1x8xf32>
    %426 = vector.broadcast %425 : vector<1x8xf32> to vector<8x8xf32>
    %427 = arith.mulf %426, %0 : vector<8x8xf32>
    %cst_80 = arith.constant dense<0.000000e+00> : vector<8xf32>
    %428 = vector.multi_reduction <add>, %427, %cst_80 [1] : vector<8x8xf32> to vector<8xf32>
    %429 = vector.shape_cast %428 : vector<8xf32> to vector<8x1xf32>
    %430 = vector.broadcast %429 : vector<8x1xf32> to vector<8x8xf32>
    %431 = arith.addf %430, %2 : vector<8x8xf32>
    %432 = math.tanh %431 : vector<8x8xf32>
    %433 = arith.select %7, %432, %431 : vector<8x8xi1>, vector<8x8xf32>
    %434 = arith.mulf %433, %1 : vector<8x8xf32>
    %cst_81 = arith.constant dense<0.000000e+00> : vector<8xf32>
    %435 = vector.multi_reduction <add>, %434, %cst_81 [0] : vector<8x8xf32> to vector<8xf32>
    %436 = vector.shape_cast %435 : vector<8xf32> to vector<1x8xf32>
    %437 = vector.broadcast %436 : vector<1x8xf32> to vector<8x8xf32>
    %438 = arith.mulf %437, %0 : vector<8x8xf32>
    %cst_82 = arith.constant dense<0.000000e+00> : vector<8xf32>
    %439 = vector.multi_reduction <add>, %438, %cst_82 [1] : vector<8x8xf32> to vector<8xf32>
    %440 = vector.shape_cast %439 : vector<8xf32> to vector<8x1xf32>
    %441 = vector.broadcast %440 : vector<8x1xf32> to vector<8x8xf32>
    %442 = arith.addf %441, %2 : vector<8x8xf32>
    %443 = math.tanh %442 : vector<8x8xf32>
    %444 = arith.select %7, %443, %442 : vector<8x8xi1>, vector<8x8xf32>
    %445 = arith.mulf %444, %1 : vector<8x8xf32>
    %cst_83 = arith.constant dense<0.000000e+00> : vector<8xf32>
    %446 = vector.multi_reduction <add>, %445, %cst_83 [0] : vector<8x8xf32> to vector<8xf32>
    %447 = vector.shape_cast %446 : vector<8xf32> to vector<1x8xf32>
    %448 = vector.broadcast %447 : vector<1x8xf32> to vector<8x8xf32>
    %449 = arith.mulf %448, %0 : vector<8x8xf32>
    %cst_84 = arith.constant dense<0.000000e+00> : vector<8xf32>
    %450 = vector.multi_reduction <add>, %449, %cst_84 [1] : vector<8x8xf32> to vector<8xf32>
    %451 = vector.shape_cast %450 : vector<8xf32> to vector<8x1xf32>
    %452 = vector.broadcast %451 : vector<8x1xf32> to vector<8x8xf32>
    %453 = arith.addf %452, %2 : vector<8x8xf32>
    %454 = math.tanh %453 : vector<8x8xf32>
    %455 = arith.select %7, %454, %453 : vector<8x8xi1>, vector<8x8xf32>
    %456 = arith.mulf %455, %1 : vector<8x8xf32>
    %cst_85 = arith.constant dense<0.000000e+00> : vector<8xf32>
    %457 = vector.multi_reduction <add>, %456, %cst_85 [0] : vector<8x8xf32> to vector<8xf32>
    %458 = vector.shape_cast %457 : vector<8xf32> to vector<1x8xf32>
    %459 = vector.broadcast %458 : vector<1x8xf32> to vector<8x8xf32>
    %460 = arith.mulf %459, %0 : vector<8x8xf32>
    %cst_86 = arith.constant dense<0.000000e+00> : vector<8xf32>
    %461 = vector.multi_reduction <add>, %460, %cst_86 [1] : vector<8x8xf32> to vector<8xf32>
    %462 = vector.shape_cast %461 : vector<8xf32> to vector<8x1xf32>
    %463 = vector.broadcast %462 : vector<8x1xf32> to vector<8x8xf32>
    %464 = arith.addf %463, %2 : vector<8x8xf32>
    %465 = math.tanh %464 : vector<8x8xf32>
    %466 = arith.select %7, %465, %464 : vector<8x8xi1>, vector<8x8xf32>
    %467 = arith.mulf %466, %1 : vector<8x8xf32>
    %cst_87 = arith.constant dense<0.000000e+00> : vector<8xf32>
    %468 = vector.multi_reduction <add>, %467, %cst_87 [0] : vector<8x8xf32> to vector<8xf32>
    %469 = vector.shape_cast %468 : vector<8xf32> to vector<1x8xf32>
    %470 = vector.broadcast %469 : vector<1x8xf32> to vector<8x8xf32>
    %471 = arith.mulf %470, %0 : vector<8x8xf32>
    %cst_88 = arith.constant dense<0.000000e+00> : vector<8xf32>
    %472 = vector.multi_reduction <add>, %471, %cst_88 [1] : vector<8x8xf32> to vector<8xf32>
    %473 = vector.shape_cast %472 : vector<8xf32> to vector<8x1xf32>
    %474 = vector.broadcast %473 : vector<8x1xf32> to vector<8x8xf32>
    %475 = arith.addf %474, %2 : vector<8x8xf32>
    %476 = math.tanh %475 : vector<8x8xf32>
    %477 = arith.select %7, %476, %475 : vector<8x8xi1>, vector<8x8xf32>
    %478 = arith.mulf %477, %1 : vector<8x8xf32>
    %cst_89 = arith.constant dense<0.000000e+00> : vector<8xf32>
    %479 = vector.multi_reduction <add>, %478, %cst_89 [0] : vector<8x8xf32> to vector<8xf32>
    %480 = vector.shape_cast %479 : vector<8xf32> to vector<1x8xf32>
    %481 = vector.broadcast %480 : vector<1x8xf32> to vector<8x8xf32>
    %482 = arith.mulf %481, %0 : vector<8x8xf32>
    %cst_90 = arith.constant dense<0.000000e+00> : vector<8xf32>
    %483 = vector.multi_reduction <add>, %482, %cst_90 [1] : vector<8x8xf32> to vector<8xf32>
    %484 = vector.shape_cast %483 : vector<8xf32> to vector<8x1xf32>
    %485 = vector.broadcast %484 : vector<8x1xf32> to vector<8x8xf32>
    %486 = arith.addf %485, %2 : vector<8x8xf32>
    %487 = math.tanh %486 : vector<8x8xf32>
    %488 = arith.select %7, %487, %486 : vector<8x8xi1>, vector<8x8xf32>
    %489 = arith.mulf %488, %1 : vector<8x8xf32>
    %cst_91 = arith.constant dense<0.000000e+00> : vector<8xf32>
    %490 = vector.multi_reduction <add>, %489, %cst_91 [0] : vector<8x8xf32> to vector<8xf32>
    %491 = vector.shape_cast %490 : vector<8xf32> to vector<1x8xf32>
    %492 = vector.broadcast %491 : vector<1x8xf32> to vector<8x8xf32>
    %493 = arith.mulf %492, %0 : vector<8x8xf32>
    %cst_92 = arith.constant dense<0.000000e+00> : vector<8xf32>
    %494 = vector.multi_reduction <add>, %493, %cst_92 [1] : vector<8x8xf32> to vector<8xf32>
    %495 = vector.shape_cast %494 : vector<8xf32> to vector<8x1xf32>
    %496 = vector.broadcast %495 : vector<8x1xf32> to vector<8x8xf32>
    %497 = arith.addf %496, %2 : vector<8x8xf32>
    %498 = math.tanh %497 : vector<8x8xf32>
    %499 = arith.select %7, %498, %497 : vector<8x8xi1>, vector<8x8xf32>
    %500 = arith.mulf %499, %1 : vector<8x8xf32>
    %cst_93 = arith.constant dense<0.000000e+00> : vector<8xf32>
    %501 = vector.multi_reduction <add>, %500, %cst_93 [0] : vector<8x8xf32> to vector<8xf32>
    %502 = vector.shape_cast %501 : vector<8xf32> to vector<1x8xf32>
    %503 = vector.broadcast %502 : vector<1x8xf32> to vector<8x8xf32>
    %504 = arith.mulf %503, %0 : vector<8x8xf32>
    %cst_94 = arith.constant dense<0.000000e+00> : vector<8xf32>
    %505 = vector.multi_reduction <add>, %504, %cst_94 [1] : vector<8x8xf32> to vector<8xf32>
    %506 = vector.shape_cast %505 : vector<8xf32> to vector<8x1xf32>
    %507 = vector.broadcast %506 : vector<8x1xf32> to vector<8x8xf32>
    %508 = arith.addf %507, %2 : vector<8x8xf32>
    %509 = math.tanh %508 : vector<8x8xf32>
    %510 = arith.select %7, %509, %508 : vector<8x8xi1>, vector<8x8xf32>
    %511 = arith.mulf %510, %1 : vector<8x8xf32>
    %cst_95 = arith.constant dense<0.000000e+00> : vector<8xf32>
    %512 = vector.multi_reduction <add>, %511, %cst_95 [0] : vector<8x8xf32> to vector<8xf32>
    %513 = vector.shape_cast %512 : vector<8xf32> to vector<1x8xf32>
    %514 = vector.broadcast %513 : vector<1x8xf32> to vector<8x8xf32>
    %515 = arith.mulf %514, %0 : vector<8x8xf32>
    %cst_96 = arith.constant dense<0.000000e+00> : vector<8xf32>
    %516 = vector.multi_reduction <add>, %515, %cst_96 [1] : vector<8x8xf32> to vector<8xf32>
    %517 = vector.shape_cast %516 : vector<8xf32> to vector<8x1xf32>
    %518 = vector.broadcast %517 : vector<8x1xf32> to vector<8x8xf32>
    %519 = arith.addf %518, %2 : vector<8x8xf32>
    %520 = math.tanh %519 : vector<8x8xf32>
    %521 = arith.select %7, %520, %519 : vector<8x8xi1>, vector<8x8xf32>
    %522 = arith.mulf %521, %1 : vector<8x8xf32>
    %cst_97 = arith.constant dense<0.000000e+00> : vector<8xf32>
    %523 = vector.multi_reduction <add>, %522, %cst_97 [0] : vector<8x8xf32> to vector<8xf32>
    %524 = vector.shape_cast %523 : vector<8xf32> to vector<1x8xf32>
    %525 = vector.broadcast %524 : vector<1x8xf32> to vector<8x8xf32>
    %526 = arith.mulf %525, %0 : vector<8x8xf32>
    %cst_98 = arith.constant dense<0.000000e+00> : vector<8xf32>
    %527 = vector.multi_reduction <add>, %526, %cst_98 [1] : vector<8x8xf32> to vector<8xf32>
    %528 = vector.shape_cast %527 : vector<8xf32> to vector<8x1xf32>
    %529 = vector.broadcast %528 : vector<8x1xf32> to vector<8x8xf32>
    %530 = arith.addf %529, %2 : vector<8x8xf32>
    %531 = math.tanh %530 : vector<8x8xf32>
    %532 = arith.select %7, %531, %530 : vector<8x8xi1>, vector<8x8xf32>
    %533 = arith.mulf %532, %1 : vector<8x8xf32>
    %cst_99 = arith.constant dense<0.000000e+00> : vector<8xf32>
    %534 = vector.multi_reduction <add>, %533, %cst_99 [0] : vector<8x8xf32> to vector<8xf32>
    %535 = vector.shape_cast %534 : vector<8xf32> to vector<1x8xf32>
    %536 = vector.broadcast %535 : vector<1x8xf32> to vector<8x8xf32>
    %537 = arith.mulf %536, %0 : vector<8x8xf32>
    %cst_100 = arith.constant dense<0.000000e+00> : vector<8xf32>
    %538 = vector.multi_reduction <add>, %537, %cst_100 [1] : vector<8x8xf32> to vector<8xf32>
    %539 = vector.shape_cast %538 : vector<8xf32> to vector<8x1xf32>
    %540 = vector.broadcast %539 : vector<8x1xf32> to vector<8x8xf32>
    %541 = arith.addf %540, %2 : vector<8x8xf32>
    %542 = math.tanh %541 : vector<8x8xf32>
    %543 = arith.select %7, %542, %541 : vector<8x8xi1>, vector<8x8xf32>
    %544 = arith.mulf %543, %1 : vector<8x8xf32>
    %cst_101 = arith.constant dense<0.000000e+00> : vector<8xf32>
    %545 = vector.multi_reduction <add>, %544, %cst_101 [0] : vector<8x8xf32> to vector<8xf32>
    %546 = vector.shape_cast %545 : vector<8xf32> to vector<1x8xf32>
    %547 = vector.broadcast %546 : vector<1x8xf32> to vector<8x8xf32>
    %548 = arith.mulf %547, %0 : vector<8x8xf32>
    %cst_102 = arith.constant dense<0.000000e+00> : vector<8xf32>
    %549 = vector.multi_reduction <add>, %548, %cst_102 [1] : vector<8x8xf32> to vector<8xf32>
    %550 = vector.shape_cast %549 : vector<8xf32> to vector<8x1xf32>
    %551 = vector.broadcast %550 : vector<8x1xf32> to vector<8x8xf32>
    %552 = arith.addf %551, %2 : vector<8x8xf32>
    %553 = math.tanh %552 : vector<8x8xf32>
    %554 = arith.select %7, %553, %552 : vector<8x8xi1>, vector<8x8xf32>
    %555 = arith.mulf %554, %1 : vector<8x8xf32>
    %cst_103 = arith.constant dense<0.000000e+00> : vector<8xf32>
    %556 = vector.multi_reduction <add>, %555, %cst_103 [0] : vector<8x8xf32> to vector<8xf32>
    %557 = vector.shape_cast %556 : vector<8xf32> to vector<1x8xf32>
    %558 = vector.broadcast %557 : vector<1x8xf32> to vector<8x8xf32>
    %559 = arith.mulf %558, %0 : vector<8x8xf32>
    %cst_104 = arith.constant dense<0.000000e+00> : vector<8xf32>
    %560 = vector.multi_reduction <add>, %559, %cst_104 [1] : vector<8x8xf32> to vector<8xf32>
    %561 = vector.shape_cast %560 : vector<8xf32> to vector<8x1xf32>
    %562 = vector.broadcast %561 : vector<8x1xf32> to vector<8x8xf32>
    %563 = arith.addf %562, %2 : vector<8x8xf32>
    %564 = math.tanh %563 : vector<8x8xf32>
    %565 = arith.select %7, %564, %563 : vector<8x8xi1>, vector<8x8xf32>
    %566 = arith.mulf %565, %1 : vector<8x8xf32>
    %cst_105 = arith.constant dense<0.000000e+00> : vector<8xf32>
    %567 = vector.multi_reduction <add>, %566, %cst_105 [0] : vector<8x8xf32> to vector<8xf32>
    %568 = vector.shape_cast %567 : vector<8xf32> to vector<1x8xf32>
    %569 = vector.broadcast %568 : vector<1x8xf32> to vector<8x8xf32>
    %570 = arith.mulf %569, %0 : vector<8x8xf32>
    %cst_106 = arith.constant dense<0.000000e+00> : vector<8xf32>
    %571 = vector.multi_reduction <add>, %570, %cst_106 [1] : vector<8x8xf32> to vector<8xf32>
    %572 = vector.shape_cast %571 : vector<8xf32> to vector<8x1xf32>
    %573 = vector.broadcast %572 : vector<8x1xf32> to vector<8x8xf32>
    %574 = arith.addf %573, %2 : vector<8x8xf32>
    %575 = math.tanh %574 : vector<8x8xf32>
    %576 = arith.select %7, %575, %574 : vector<8x8xi1>, vector<8x8xf32>
    %577 = arith.mulf %576, %1 : vector<8x8xf32>
    %cst_107 = arith.constant dense<0.000000e+00> : vector<8xf32>
    %578 = vector.multi_reduction <add>, %577, %cst_107 [0] : vector<8x8xf32> to vector<8xf32>
    %579 = vector.shape_cast %578 : vector<8xf32> to vector<1x8xf32>
    %580 = vector.broadcast %579 : vector<1x8xf32> to vector<8x8xf32>
    %581 = arith.mulf %580, %0 : vector<8x8xf32>
    %cst_108 = arith.constant dense<0.000000e+00> : vector<8xf32>
    %582 = vector.multi_reduction <add>, %581, %cst_108 [1] : vector<8x8xf32> to vector<8xf32>
    %583 = vector.shape_cast %582 : vector<8xf32> to vector<8x1xf32>
    %584 = vector.broadcast %583 : vector<8x1xf32> to vector<8x8xf32>
    %585 = arith.addf %584, %2 : vector<8x8xf32>
    %586 = math.tanh %585 : vector<8x8xf32>
    %587 = arith.select %7, %586, %585 : vector<8x8xi1>, vector<8x8xf32>
    %588 = arith.mulf %587, %1 : vector<8x8xf32>
    %cst_109 = arith.constant dense<0.000000e+00> : vector<8xf32>
    %589 = vector.multi_reduction <add>, %588, %cst_109 [0] : vector<8x8xf32> to vector<8xf32>
    %590 = vector.shape_cast %589 : vector<8xf32> to vector<1x8xf32>
    %591 = vector.broadcast %590 : vector<1x8xf32> to vector<8x8xf32>
    %592 = arith.mulf %591, %0 : vector<8x8xf32>
    %cst_110 = arith.constant dense<0.000000e+00> : vector<8xf32>
    %593 = vector.multi_reduction <add>, %592, %cst_110 [1] : vector<8x8xf32> to vector<8xf32>
    %594 = vector.shape_cast %593 : vector<8xf32> to vector<8x1xf32>
    %595 = vector.broadcast %594 : vector<8x1xf32> to vector<8x8xf32>
    %596 = arith.addf %595, %2 : vector<8x8xf32>
    %597 = math.tanh %596 : vector<8x8xf32>
    %598 = arith.select %7, %597, %596 : vector<8x8xi1>, vector<8x8xf32>
    %599 = arith.mulf %598, %1 : vector<8x8xf32>
    %cst_111 = arith.constant dense<0.000000e+00> : vector<8xf32>
    %600 = vector.multi_reduction <add>, %599, %cst_111 [0] : vector<8x8xf32> to vector<8xf32>
    %601 = vector.shape_cast %600 : vector<8xf32> to vector<1x8xf32>
    %602 = vector.broadcast %601 : vector<1x8xf32> to vector<8x8xf32>
    %603 = arith.mulf %602, %0 : vector<8x8xf32>
    %cst_112 = arith.constant dense<0.000000e+00> : vector<8xf32>
    %604 = vector.multi_reduction <add>, %603, %cst_112 [1] : vector<8x8xf32> to vector<8xf32>
    %605 = vector.shape_cast %604 : vector<8xf32> to vector<8x1xf32>
    %606 = vector.broadcast %605 : vector<8x1xf32> to vector<8x8xf32>
    %607 = arith.addf %606, %2 : vector<8x8xf32>
    %608 = math.tanh %607 : vector<8x8xf32>
    %609 = arith.select %7, %608, %607 : vector<8x8xi1>, vector<8x8xf32>
    %610 = arith.mulf %609, %1 : vector<8x8xf32>
    %cst_113 = arith.constant dense<0.000000e+00> : vector<8xf32>
    %611 = vector.multi_reduction <add>, %610, %cst_113 [0] : vector<8x8xf32> to vector<8xf32>
    %612 = vector.shape_cast %611 : vector<8xf32> to vector<1x8xf32>
    %613 = vector.broadcast %612 : vector<1x8xf32> to vector<8x8xf32>
    %614 = arith.mulf %613, %0 : vector<8x8xf32>
    %cst_114 = arith.constant dense<0.000000e+00> : vector<8xf32>
    %615 = vector.multi_reduction <add>, %614, %cst_114 [1] : vector<8x8xf32> to vector<8xf32>
    %616 = vector.shape_cast %615 : vector<8xf32> to vector<8x1xf32>
    %617 = vector.broadcast %616 : vector<8x1xf32> to vector<8x8xf32>
    %618 = arith.addf %617, %2 : vector<8x8xf32>
    %619 = math.tanh %618 : vector<8x8xf32>
    %620 = arith.select %7, %619, %618 : vector<8x8xi1>, vector<8x8xf32>
    %621 = arith.mulf %620, %1 : vector<8x8xf32>
    %cst_115 = arith.constant dense<0.000000e+00> : vector<8xf32>
    %622 = vector.multi_reduction <add>, %621, %cst_115 [0] : vector<8x8xf32> to vector<8xf32>
    %623 = vector.shape_cast %622 : vector<8xf32> to vector<1x8xf32>
    %624 = vector.broadcast %623 : vector<1x8xf32> to vector<8x8xf32>
    %625 = arith.mulf %624, %0 : vector<8x8xf32>
    %cst_116 = arith.constant dense<0.000000e+00> : vector<8xf32>
    %626 = vector.multi_reduction <add>, %625, %cst_116 [1] : vector<8x8xf32> to vector<8xf32>
    %627 = vector.shape_cast %626 : vector<8xf32> to vector<8x1xf32>
    %628 = vector.broadcast %627 : vector<8x1xf32> to vector<8x8xf32>
    %629 = arith.addf %628, %2 : vector<8x8xf32>
    %630 = math.tanh %629 : vector<8x8xf32>
    %631 = arith.select %7, %630, %629 : vector<8x8xi1>, vector<8x8xf32>
    %632 = arith.mulf %631, %1 : vector<8x8xf32>
    %cst_117 = arith.constant dense<0.000000e+00> : vector<8xf32>
    %633 = vector.multi_reduction <add>, %632, %cst_117 [0] : vector<8x8xf32> to vector<8xf32>
    %634 = vector.shape_cast %633 : vector<8xf32> to vector<1x8xf32>
    %635 = vector.broadcast %634 : vector<1x8xf32> to vector<8x8xf32>
    %636 = arith.mulf %635, %0 : vector<8x8xf32>
    %cst_118 = arith.constant dense<0.000000e+00> : vector<8xf32>
    %637 = vector.multi_reduction <add>, %636, %cst_118 [1] : vector<8x8xf32> to vector<8xf32>
    %638 = vector.shape_cast %637 : vector<8xf32> to vector<8x1xf32>
    %639 = vector.broadcast %638 : vector<8x1xf32> to vector<8x8xf32>
    %640 = arith.addf %639, %2 : vector<8x8xf32>
    %641 = math.tanh %640 : vector<8x8xf32>
    %642 = arith.select %7, %641, %640 : vector<8x8xi1>, vector<8x8xf32>
    %643 = arith.mulf %642, %1 : vector<8x8xf32>
    %cst_119 = arith.constant dense<0.000000e+00> : vector<8xf32>
    %644 = vector.multi_reduction <add>, %643, %cst_119 [0] : vector<8x8xf32> to vector<8xf32>
    %645 = vector.shape_cast %644 : vector<8xf32> to vector<1x8xf32>
    %646 = vector.broadcast %645 : vector<1x8xf32> to vector<8x8xf32>
    %647 = arith.mulf %646, %0 : vector<8x8xf32>
    %cst_120 = arith.constant dense<0.000000e+00> : vector<8xf32>
    %648 = vector.multi_reduction <add>, %647, %cst_120 [1] : vector<8x8xf32> to vector<8xf32>
    %649 = vector.shape_cast %648 : vector<8xf32> to vector<8x1xf32>
    %650 = vector.broadcast %649 : vector<8x1xf32> to vector<8x8xf32>
    %651 = arith.addf %650, %2 : vector<8x8xf32>
    %652 = math.tanh %651 : vector<8x8xf32>
    %653 = arith.select %7, %652, %651 : vector<8x8xi1>, vector<8x8xf32>
    %654 = arith.mulf %653, %1 : vector<8x8xf32>
    %cst_121 = arith.constant dense<0.000000e+00> : vector<8xf32>
    %655 = vector.multi_reduction <add>, %654, %cst_121 [0] : vector<8x8xf32> to vector<8xf32>
    %656 = vector.shape_cast %655 : vector<8xf32> to vector<1x8xf32>
    %657 = vector.broadcast %656 : vector<1x8xf32> to vector<8x8xf32>
    %658 = arith.mulf %657, %0 : vector<8x8xf32>
    %cst_122 = arith.constant dense<0.000000e+00> : vector<8xf32>
    %659 = vector.multi_reduction <add>, %658, %cst_122 [1] : vector<8x8xf32> to vector<8xf32>
    %660 = vector.shape_cast %659 : vector<8xf32> to vector<8x1xf32>
    %661 = vector.broadcast %660 : vector<8x1xf32> to vector<8x8xf32>
    %662 = arith.addf %661, %2 : vector<8x8xf32>
    %663 = math.tanh %662 : vector<8x8xf32>
    %664 = arith.select %7, %663, %662 : vector<8x8xi1>, vector<8x8xf32>
    %665 = arith.mulf %664, %1 : vector<8x8xf32>
    %cst_123 = arith.constant dense<0.000000e+00> : vector<8xf32>
    %666 = vector.multi_reduction <add>, %665, %cst_123 [0] : vector<8x8xf32> to vector<8xf32>
    %667 = vector.shape_cast %666 : vector<8xf32> to vector<1x8xf32>
    %668 = vector.broadcast %667 : vector<1x8xf32> to vector<8x8xf32>
    %669 = arith.mulf %668, %0 : vector<8x8xf32>
    %cst_124 = arith.constant dense<0.000000e+00> : vector<8xf32>
    %670 = vector.multi_reduction <add>, %669, %cst_124 [1] : vector<8x8xf32> to vector<8xf32>
    %671 = vector.shape_cast %670 : vector<8xf32> to vector<8x1xf32>
    %672 = vector.broadcast %671 : vector<8x1xf32> to vector<8x8xf32>
    %673 = arith.addf %672, %2 : vector<8x8xf32>
    %674 = math.tanh %673 : vector<8x8xf32>
    %675 = arith.select %7, %674, %673 : vector<8x8xi1>, vector<8x8xf32>
    %676 = arith.mulf %675, %1 : vector<8x8xf32>
    %cst_125 = arith.constant dense<0.000000e+00> : vector<8xf32>
    %677 = vector.multi_reduction <add>, %676, %cst_125 [0] : vector<8x8xf32> to vector<8xf32>
    %678 = vector.shape_cast %677 : vector<8xf32> to vector<1x8xf32>
    %679 = vector.broadcast %678 : vector<1x8xf32> to vector<8x8xf32>
    %680 = arith.mulf %679, %0 : vector<8x8xf32>
    %cst_126 = arith.constant dense<0.000000e+00> : vector<8xf32>
    %681 = vector.multi_reduction <add>, %680, %cst_126 [1] : vector<8x8xf32> to vector<8xf32>
    %682 = vector.shape_cast %681 : vector<8xf32> to vector<8x1xf32>
    %683 = vector.broadcast %682 : vector<8x1xf32> to vector<8x8xf32>
    %684 = arith.addf %683, %2 : vector<8x8xf32>
    %685 = math.tanh %684 : vector<8x8xf32>
    %686 = arith.select %7, %685, %684 : vector<8x8xi1>, vector<8x8xf32>
    %687 = arith.mulf %686, %1 : vector<8x8xf32>
    %cst_127 = arith.constant dense<0.000000e+00> : vector<8xf32>
    %688 = vector.multi_reduction <add>, %687, %cst_127 [0] : vector<8x8xf32> to vector<8xf32>
    %689 = vector.shape_cast %688 : vector<8xf32> to vector<1x8xf32>
    %690 = vector.broadcast %689 : vector<1x8xf32> to vector<8x8xf32>
    %691 = arith.mulf %690, %0 : vector<8x8xf32>
    %cst_128 = arith.constant dense<0.000000e+00> : vector<8xf32>
    %692 = vector.multi_reduction <add>, %691, %cst_128 [1] : vector<8x8xf32> to vector<8xf32>
    %693 = vector.shape_cast %692 : vector<8xf32> to vector<8x1xf32>
    %694 = vector.broadcast %693 : vector<8x1xf32> to vector<8x8xf32>
    %695 = arith.addf %694, %2 : vector<8x8xf32>
    %696 = math.tanh %695 : vector<8x8xf32>
    %697 = arith.select %7, %696, %695 : vector<8x8xi1>, vector<8x8xf32>
    %698 = arith.mulf %697, %1 : vector<8x8xf32>
    %cst_129 = arith.constant dense<0.000000e+00> : vector<8xf32>
    %699 = vector.multi_reduction <add>, %698, %cst_129 [0] : vector<8x8xf32> to vector<8xf32>
    %700 = vector.shape_cast %699 : vector<8xf32> to vector<1x8xf32>
    %701 = vector.broadcast %700 : vector<1x8xf32> to vector<8x8xf32>
    %702 = arith.mulf %701, %0 : vector<8x8xf32>
    %cst_130 = arith.constant dense<0.000000e+00> : vector<8xf32>
    %703 = vector.multi_reduction <add>, %702, %cst_130 [1] : vector<8x8xf32> to vector<8xf32>
    %704 = vector.shape_cast %703 : vector<8xf32> to vector<8x1xf32>
    %705 = vector.broadcast %704 : vector<8x1xf32> to vector<8x8xf32>
    %706 = arith.addf %705, %2 : vector<8x8xf32>
    %707 = math.tanh %706 : vector<8x8xf32>
    %708 = arith.select %7, %707, %706 : vector<8x8xi1>, vector<8x8xf32>
    %709 = arith.mulf %708, %1 : vector<8x8xf32>
    %cst_131 = arith.constant dense<0.000000e+00> : vector<8xf32>
    %710 = vector.multi_reduction <add>, %709, %cst_131 [0] : vector<8x8xf32> to vector<8xf32>
    %711 = vector.shape_cast %710 : vector<8xf32> to vector<1x8xf32>
    %712 = vector.broadcast %711 : vector<1x8xf32> to vector<8x8xf32>
    %713 = arith.mulf %712, %0 : vector<8x8xf32>
    %cst_132 = arith.constant dense<0.000000e+00> : vector<8xf32>
    %714 = vector.multi_reduction <add>, %713, %cst_132 [1] : vector<8x8xf32> to vector<8xf32>
    %715 = vector.shape_cast %714 : vector<8xf32> to vector<8x1xf32>
    %716 = vector.broadcast %715 : vector<8x1xf32> to vector<8x8xf32>
    %717 = arith.addf %716, %2 : vector<8x8xf32>
    %718 = math.tanh %717 : vector<8x8xf32>
    %719 = arith.select %7, %718, %717 : vector<8x8xi1>, vector<8x8xf32>
    %720 = arith.mulf %719, %1 : vector<8x8xf32>
    %cst_133 = arith.constant dense<0.000000e+00> : vector<8xf32>
    %721 = vector.multi_reduction <add>, %720, %cst_133 [0] : vector<8x8xf32> to vector<8xf32>
    %722 = vector.shape_cast %721 : vector<8xf32> to vector<1x8xf32>
    %723 = vector.broadcast %722 : vector<1x8xf32> to vector<8x8xf32>
    %724 = arith.mulf %723, %0 : vector<8x8xf32>
    %cst_134 = arith.constant dense<0.000000e+00> : vector<8xf32>
    %725 = vector.multi_reduction <add>, %724, %cst_134 [1] : vector<8x8xf32> to vector<8xf32>
    %726 = vector.shape_cast %725 : vector<8xf32> to vector<8x1xf32>
    %727 = vector.broadcast %726 : vector<8x1xf32> to vector<8x8xf32>
    %728 = arith.addf %727, %2 : vector<8x8xf32>
    %729 = math.tanh %728 : vector<8x8xf32>
    %730 = arith.select %7, %729, %728 : vector<8x8xi1>, vector<8x8xf32>
    %731 = arith.mulf %730, %1 : vector<8x8xf32>
    %cst_135 = arith.constant dense<0.000000e+00> : vector<8xf32>
    %732 = vector.multi_reduction <add>, %731, %cst_135 [0] : vector<8x8xf32> to vector<8xf32>
    %733 = vector.shape_cast %732 : vector<8xf32> to vector<1x8xf32>
    %734 = vector.broadcast %733 : vector<1x8xf32> to vector<8x8xf32>
    %735 = arith.mulf %734, %0 : vector<8x8xf32>
    %cst_136 = arith.constant dense<0.000000e+00> : vector<8xf32>
    %736 = vector.multi_reduction <add>, %735, %cst_136 [1] : vector<8x8xf32> to vector<8xf32>
    %737 = vector.shape_cast %736 : vector<8xf32> to vector<8x1xf32>
    %738 = vector.broadcast %737 : vector<8x1xf32> to vector<8x8xf32>
    %739 = arith.addf %738, %2 : vector<8x8xf32>
    %740 = math.tanh %739 : vector<8x8xf32>
    %741 = arith.select %7, %740, %739 : vector<8x8xi1>, vector<8x8xf32>
    %742 = arith.mulf %741, %1 : vector<8x8xf32>
    %cst_137 = arith.constant dense<0.000000e+00> : vector<8xf32>
    %743 = vector.multi_reduction <add>, %742, %cst_137 [0] : vector<8x8xf32> to vector<8xf32>
    %744 = vector.shape_cast %743 : vector<8xf32> to vector<1x8xf32>
    %745 = vector.broadcast %744 : vector<1x8xf32> to vector<8x8xf32>
    %746 = arith.mulf %745, %0 : vector<8x8xf32>
    %cst_138 = arith.constant dense<0.000000e+00> : vector<8xf32>
    %747 = vector.multi_reduction <add>, %746, %cst_138 [1] : vector<8x8xf32> to vector<8xf32>
    %748 = vector.shape_cast %747 : vector<8xf32> to vector<8x1xf32>
    %749 = vector.broadcast %748 : vector<8x1xf32> to vector<8x8xf32>
    %750 = arith.addf %749, %2 : vector<8x8xf32>
    %751 = math.tanh %750 : vector<8x8xf32>
    %752 = arith.select %7, %751, %750 : vector<8x8xi1>, vector<8x8xf32>
    %753 = arith.mulf %752, %1 : vector<8x8xf32>
    %cst_139 = arith.constant dense<0.000000e+00> : vector<8xf32>
    %754 = vector.multi_reduction <add>, %753, %cst_139 [0] : vector<8x8xf32> to vector<8xf32>
    %755 = vector.shape_cast %754 : vector<8xf32> to vector<1x8xf32>
    %756 = vector.broadcast %755 : vector<1x8xf32> to vector<8x8xf32>
    %757 = arith.mulf %756, %0 : vector<8x8xf32>
    %cst_140 = arith.constant dense<0.000000e+00> : vector<8xf32>
    %758 = vector.multi_reduction <add>, %757, %cst_140 [1] : vector<8x8xf32> to vector<8xf32>
    %759 = vector.shape_cast %758 : vector<8xf32> to vector<8x1xf32>
    %760 = vector.broadcast %759 : vector<8x1xf32> to vector<8x8xf32>
    %761 = arith.addf %760, %2 : vector<8x8xf32>
    %762 = math.tanh %761 : vector<8x8xf32>
    %763 = arith.select %7, %762, %761 : vector<8x8xi1>, vector<8x8xf32>
    %764 = arith.mulf %763, %1 : vector<8x8xf32>
    %cst_141 = arith.constant dense<0.000000e+00> : vector<8xf32>
    %765 = vector.multi_reduction <add>, %764, %cst_141 [0] : vector<8x8xf32> to vector<8xf32>
    %766 = vector.shape_cast %765 : vector<8xf32> to vector<1x8xf32>
    %767 = vector.broadcast %766 : vector<1x8xf32> to vector<8x8xf32>
    %768 = arith.mulf %767, %0 : vector<8x8xf32>
    %cst_142 = arith.constant dense<0.000000e+00> : vector<8xf32>
    %769 = vector.multi_reduction <add>, %768, %cst_142 [1] : vector<8x8xf32> to vector<8xf32>
    %770 = vector.shape_cast %769 : vector<8xf32> to vector<8x1xf32>
    %771 = vector.broadcast %770 : vector<8x1xf32> to vector<8x8xf32>
    %772 = arith.addf %771, %2 : vector<8x8xf32>
    %773 = math.tanh %772 : vector<8x8xf32>
    %774 = arith.select %7, %773, %772 : vector<8x8xi1>, vector<8x8xf32>
    %775 = arith.mulf %774, %1 : vector<8x8xf32>
    %cst_143 = arith.constant dense<0.000000e+00> : vector<8xf32>
    %776 = vector.multi_reduction <add>, %775, %cst_143 [0] : vector<8x8xf32> to vector<8xf32>
    %777 = vector.shape_cast %776 : vector<8xf32> to vector<1x8xf32>
    %778 = vector.broadcast %777 : vector<1x8xf32> to vector<8x8xf32>
    %779 = arith.mulf %778, %0 : vector<8x8xf32>
    %cst_144 = arith.constant dense<0.000000e+00> : vector<8xf32>
    %780 = vector.multi_reduction <add>, %779, %cst_144 [1] : vector<8x8xf32> to vector<8xf32>
    %781 = vector.shape_cast %780 : vector<8xf32> to vector<8x1xf32>
    %782 = vector.broadcast %781 : vector<8x1xf32> to vector<8x8xf32>
    %783 = arith.addf %782, %2 : vector<8x8xf32>
    %784 = math.tanh %783 : vector<8x8xf32>
    %785 = arith.select %7, %784, %783 : vector<8x8xi1>, vector<8x8xf32>
    %786 = arith.mulf %785, %1 : vector<8x8xf32>
    %cst_145 = arith.constant dense<0.000000e+00> : vector<8xf32>
    %787 = vector.multi_reduction <add>, %786, %cst_145 [0] : vector<8x8xf32> to vector<8xf32>
    %788 = vector.shape_cast %787 : vector<8xf32> to vector<1x8xf32>
    %789 = vector.broadcast %788 : vector<1x8xf32> to vector<8x8xf32>
    %790 = arith.mulf %789, %0 : vector<8x8xf32>
    %cst_146 = arith.constant dense<0.000000e+00> : vector<8xf32>
    %791 = vector.multi_reduction <add>, %790, %cst_146 [1] : vector<8x8xf32> to vector<8xf32>
    %792 = vector.shape_cast %791 : vector<8xf32> to vector<8x1xf32>
    %793 = vector.broadcast %792 : vector<8x1xf32> to vector<8x8xf32>
    %794 = arith.addf %793, %2 : vector<8x8xf32>
    %795 = math.tanh %794 : vector<8x8xf32>
    %796 = arith.select %7, %795, %794 : vector<8x8xi1>, vector<8x8xf32>
    %797 = arith.mulf %796, %1 : vector<8x8xf32>
    %cst_147 = arith.constant dense<0.000000e+00> : vector<8xf32>
    %798 = vector.multi_reduction <add>, %797, %cst_147 [0] : vector<8x8xf32> to vector<8xf32>
    %799 = vector.shape_cast %798 : vector<8xf32> to vector<1x8xf32>
    %800 = vector.broadcast %799 : vector<1x8xf32> to vector<8x8xf32>
    %801 = arith.mulf %800, %0 : vector<8x8xf32>
    %cst_148 = arith.constant dense<0.000000e+00> : vector<8xf32>
    %802 = vector.multi_reduction <add>, %801, %cst_148 [1] : vector<8x8xf32> to vector<8xf32>
    %803 = vector.shape_cast %802 : vector<8xf32> to vector<8x1xf32>
    %804 = vector.broadcast %803 : vector<8x1xf32> to vector<8x8xf32>
    %805 = arith.addf %804, %2 : vector<8x8xf32>
    %806 = math.tanh %805 : vector<8x8xf32>
    %807 = arith.select %7, %806, %805 : vector<8x8xi1>, vector<8x8xf32>
    %808 = arith.mulf %807, %1 : vector<8x8xf32>
    %cst_149 = arith.constant dense<0.000000e+00> : vector<8xf32>
    %809 = vector.multi_reduction <add>, %808, %cst_149 [0] : vector<8x8xf32> to vector<8xf32>
    %810 = vector.shape_cast %809 : vector<8xf32> to vector<1x8xf32>
    %811 = vector.broadcast %810 : vector<1x8xf32> to vector<8x8xf32>
    %812 = arith.mulf %811, %0 : vector<8x8xf32>
    %cst_150 = arith.constant dense<0.000000e+00> : vector<8xf32>
    %813 = vector.multi_reduction <add>, %812, %cst_150 [1] : vector<8x8xf32> to vector<8xf32>
    %814 = vector.shape_cast %813 : vector<8xf32> to vector<8x1xf32>
    %815 = vector.broadcast %814 : vector<8x1xf32> to vector<8x8xf32>
    %816 = arith.addf %815, %2 : vector<8x8xf32>
    %817 = math.tanh %816 : vector<8x8xf32>
    %818 = arith.select %7, %817, %816 : vector<8x8xi1>, vector<8x8xf32>
    %819 = arith.mulf %818, %1 : vector<8x8xf32>
    %cst_151 = arith.constant dense<0.000000e+00> : vector<8xf32>
    %820 = vector.multi_reduction <add>, %819, %cst_151 [0] : vector<8x8xf32> to vector<8xf32>
    %821 = vector.shape_cast %820 : vector<8xf32> to vector<1x8xf32>
    %822 = vector.broadcast %821 : vector<1x8xf32> to vector<8x8xf32>
    %823 = arith.mulf %822, %0 : vector<8x8xf32>
    %cst_152 = arith.constant dense<0.000000e+00> : vector<8xf32>
    %824 = vector.multi_reduction <add>, %823, %cst_152 [1] : vector<8x8xf32> to vector<8xf32>
    %825 = vector.shape_cast %824 : vector<8xf32> to vector<8x1xf32>
    %826 = vector.broadcast %825 : vector<8x1xf32> to vector<8x8xf32>
    %827 = arith.addf %826, %2 : vector<8x8xf32>
    %828 = math.tanh %827 : vector<8x8xf32>
    %829 = arith.select %7, %828, %827 : vector<8x8xi1>, vector<8x8xf32>
    %830 = arith.mulf %829, %1 : vector<8x8xf32>
    %cst_153 = arith.constant dense<0.000000e+00> : vector<8xf32>
    %831 = vector.multi_reduction <add>, %830, %cst_153 [0] : vector<8x8xf32> to vector<8xf32>
    %832 = vector.shape_cast %831 : vector<8xf32> to vector<1x8xf32>
    %833 = vector.broadcast %832 : vector<1x8xf32> to vector<8x8xf32>
    %834 = arith.mulf %833, %0 : vector<8x8xf32>
    %cst_154 = arith.constant dense<0.000000e+00> : vector<8xf32>
    %835 = vector.multi_reduction <add>, %834, %cst_154 [1] : vector<8x8xf32> to vector<8xf32>
    %836 = vector.shape_cast %835 : vector<8xf32> to vector<8x1xf32>
    %837 = vector.broadcast %836 : vector<8x1xf32> to vector<8x8xf32>
    %838 = arith.addf %837, %2 : vector<8x8xf32>
    %839 = math.tanh %838 : vector<8x8xf32>
    %840 = arith.select %7, %839, %838 : vector<8x8xi1>, vector<8x8xf32>
    %841 = arith.mulf %840, %1 : vector<8x8xf32>
    %cst_155 = arith.constant dense<0.000000e+00> : vector<8xf32>
    %842 = vector.multi_reduction <add>, %841, %cst_155 [0] : vector<8x8xf32> to vector<8xf32>
    %843 = vector.shape_cast %842 : vector<8xf32> to vector<1x8xf32>
    %844 = vector.broadcast %843 : vector<1x8xf32> to vector<8x8xf32>
    %845 = arith.mulf %844, %0 : vector<8x8xf32>
    %cst_156 = arith.constant dense<0.000000e+00> : vector<8xf32>
    %846 = vector.multi_reduction <add>, %845, %cst_156 [1] : vector<8x8xf32> to vector<8xf32>
    %847 = vector.shape_cast %846 : vector<8xf32> to vector<8x1xf32>
    %848 = vector.broadcast %847 : vector<8x1xf32> to vector<8x8xf32>
    %849 = arith.addf %848, %2 : vector<8x8xf32>
    %850 = math.tanh %849 : vector<8x8xf32>
    %851 = arith.select %7, %850, %849 : vector<8x8xi1>, vector<8x8xf32>
    %852 = arith.mulf %851, %1 : vector<8x8xf32>
    %cst_157 = arith.constant dense<0.000000e+00> : vector<8xf32>
    %853 = vector.multi_reduction <add>, %852, %cst_157 [0] : vector<8x8xf32> to vector<8xf32>
    %854 = vector.shape_cast %853 : vector<8xf32> to vector<1x8xf32>
    %855 = vector.broadcast %854 : vector<1x8xf32> to vector<8x8xf32>
    %856 = arith.mulf %855, %0 : vector<8x8xf32>
    %cst_158 = arith.constant dense<0.000000e+00> : vector<8xf32>
    %857 = vector.multi_reduction <add>, %856, %cst_158 [1] : vector<8x8xf32> to vector<8xf32>
    %858 = vector.shape_cast %857 : vector<8xf32> to vector<8x1xf32>
    %859 = vector.broadcast %858 : vector<8x1xf32> to vector<8x8xf32>
    %860 = arith.addf %859, %2 : vector<8x8xf32>
    %861 = math.tanh %860 : vector<8x8xf32>
    %862 = arith.select %7, %861, %860 : vector<8x8xi1>, vector<8x8xf32>
    %863 = arith.mulf %862, %1 : vector<8x8xf32>
    %cst_159 = arith.constant dense<0.000000e+00> : vector<8xf32>
    %864 = vector.multi_reduction <add>, %863, %cst_159 [0] : vector<8x8xf32> to vector<8xf32>
    %865 = vector.shape_cast %864 : vector<8xf32> to vector<1x8xf32>
    %866 = vector.broadcast %865 : vector<1x8xf32> to vector<8x8xf32>
    %867 = arith.mulf %866, %0 : vector<8x8xf32>
    %cst_160 = arith.constant dense<0.000000e+00> : vector<8xf32>
    %868 = vector.multi_reduction <add>, %867, %cst_160 [1] : vector<8x8xf32> to vector<8xf32>
    %869 = vector.shape_cast %868 : vector<8xf32> to vector<8x1xf32>
    %870 = vector.broadcast %869 : vector<8x1xf32> to vector<8x8xf32>
    %871 = arith.addf %870, %2 : vector<8x8xf32>
    %872 = math.tanh %871 : vector<8x8xf32>
    %873 = arith.select %7, %872, %871 : vector<8x8xi1>, vector<8x8xf32>
    %874 = arith.mulf %873, %1 : vector<8x8xf32>
    %cst_161 = arith.constant dense<0.000000e+00> : vector<8xf32>
    %875 = vector.multi_reduction <add>, %874, %cst_161 [0] : vector<8x8xf32> to vector<8xf32>
    %876 = vector.shape_cast %875 : vector<8xf32> to vector<1x8xf32>
    %877 = vector.broadcast %876 : vector<1x8xf32> to vector<8x8xf32>
    %878 = arith.mulf %877, %0 : vector<8x8xf32>
    %cst_162 = arith.constant dense<0.000000e+00> : vector<8xf32>
    %879 = vector.multi_reduction <add>, %878, %cst_162 [1] : vector<8x8xf32> to vector<8xf32>
    %880 = vector.shape_cast %879 : vector<8xf32> to vector<8x1xf32>
    %881 = vector.broadcast %880 : vector<8x1xf32> to vector<8x8xf32>
    %882 = arith.addf %881, %2 : vector<8x8xf32>
    %883 = math.tanh %882 : vector<8x8xf32>
    %884 = arith.select %7, %883, %882 : vector<8x8xi1>, vector<8x8xf32>
    %885 = arith.mulf %884, %1 : vector<8x8xf32>
    %cst_163 = arith.constant dense<0.000000e+00> : vector<8xf32>
    %886 = vector.multi_reduction <add>, %885, %cst_163 [0] : vector<8x8xf32> to vector<8xf32>
    %887 = vector.shape_cast %886 : vector<8xf32> to vector<1x8xf32>
    %888 = vector.broadcast %887 : vector<1x8xf32> to vector<8x8xf32>
    %889 = arith.mulf %888, %0 : vector<8x8xf32>
    %cst_164 = arith.constant dense<0.000000e+00> : vector<8xf32>
    %890 = vector.multi_reduction <add>, %889, %cst_164 [1] : vector<8x8xf32> to vector<8xf32>
    %891 = vector.shape_cast %890 : vector<8xf32> to vector<8x1xf32>
    %892 = vector.broadcast %891 : vector<8x1xf32> to vector<8x8xf32>
    %893 = arith.addf %892, %2 : vector<8x8xf32>
    %894 = math.tanh %893 : vector<8x8xf32>
    %895 = arith.select %7, %894, %893 : vector<8x8xi1>, vector<8x8xf32>
    %896 = arith.mulf %895, %1 : vector<8x8xf32>
    %cst_165 = arith.constant dense<0.000000e+00> : vector<8xf32>
    %897 = vector.multi_reduction <add>, %896, %cst_165 [0] : vector<8x8xf32> to vector<8xf32>
    %898 = vector.shape_cast %897 : vector<8xf32> to vector<1x8xf32>
    %899 = vector.broadcast %898 : vector<1x8xf32> to vector<8x8xf32>
    %900 = arith.mulf %899, %0 : vector<8x8xf32>
    %cst_166 = arith.constant dense<0.000000e+00> : vector<8xf32>
    %901 = vector.multi_reduction <add>, %900, %cst_166 [1] : vector<8x8xf32> to vector<8xf32>
    %902 = vector.shape_cast %901 : vector<8xf32> to vector<8x1xf32>
    %903 = vector.broadcast %902 : vector<8x1xf32> to vector<8x8xf32>
    %904 = arith.addf %903, %2 : vector<8x8xf32>
    %905 = math.tanh %904 : vector<8x8xf32>
    %906 = arith.select %7, %905, %904 : vector<8x8xi1>, vector<8x8xf32>
    %907 = arith.mulf %906, %1 : vector<8x8xf32>
    %cst_167 = arith.constant dense<0.000000e+00> : vector<8xf32>
    %908 = vector.multi_reduction <add>, %907, %cst_167 [0] : vector<8x8xf32> to vector<8xf32>
    %909 = vector.shape_cast %908 : vector<8xf32> to vector<1x8xf32>
    %910 = vector.broadcast %909 : vector<1x8xf32> to vector<8x8xf32>
    %911 = arith.mulf %910, %0 : vector<8x8xf32>
    %cst_168 = arith.constant dense<0.000000e+00> : vector<8xf32>
    %912 = vector.multi_reduction <add>, %911, %cst_168 [1] : vector<8x8xf32> to vector<8xf32>
    %913 = vector.shape_cast %912 : vector<8xf32> to vector<8x1xf32>
    %914 = vector.broadcast %913 : vector<8x1xf32> to vector<8x8xf32>
    %915 = arith.addf %914, %2 : vector<8x8xf32>
    %916 = math.tanh %915 : vector<8x8xf32>
    %917 = arith.select %7, %916, %915 : vector<8x8xi1>, vector<8x8xf32>
    %918 = arith.mulf %917, %1 : vector<8x8xf32>
    %cst_169 = arith.constant dense<0.000000e+00> : vector<8xf32>
    %919 = vector.multi_reduction <add>, %918, %cst_169 [0] : vector<8x8xf32> to vector<8xf32>
    %920 = vector.shape_cast %919 : vector<8xf32> to vector<1x8xf32>
    %921 = vector.broadcast %920 : vector<1x8xf32> to vector<8x8xf32>
    %922 = arith.mulf %921, %0 : vector<8x8xf32>
    %cst_170 = arith.constant dense<0.000000e+00> : vector<8xf32>
    %923 = vector.multi_reduction <add>, %922, %cst_170 [1] : vector<8x8xf32> to vector<8xf32>
    %924 = vector.shape_cast %923 : vector<8xf32> to vector<8x1xf32>
    %925 = vector.broadcast %924 : vector<8x1xf32> to vector<8x8xf32>
    %926 = arith.addf %925, %2 : vector<8x8xf32>
    %927 = math.tanh %926 : vector<8x8xf32>
    %928 = arith.select %7, %927, %926 : vector<8x8xi1>, vector<8x8xf32>
    %929 = arith.mulf %928, %1 : vector<8x8xf32>
    %cst_171 = arith.constant dense<0.000000e+00> : vector<8xf32>
    %930 = vector.multi_reduction <add>, %929, %cst_171 [0] : vector<8x8xf32> to vector<8xf32>
    %931 = vector.shape_cast %930 : vector<8xf32> to vector<1x8xf32>
    %932 = vector.broadcast %931 : vector<1x8xf32> to vector<8x8xf32>
    %933 = arith.mulf %932, %0 : vector<8x8xf32>
    %cst_172 = arith.constant dense<0.000000e+00> : vector<8xf32>
    %934 = vector.multi_reduction <add>, %933, %cst_172 [1] : vector<8x8xf32> to vector<8xf32>
    %935 = vector.shape_cast %934 : vector<8xf32> to vector<8x1xf32>
    %936 = vector.broadcast %935 : vector<8x1xf32> to vector<8x8xf32>
    %937 = arith.addf %936, %2 : vector<8x8xf32>
    %938 = math.tanh %937 : vector<8x8xf32>
    %939 = arith.select %7, %938, %937 : vector<8x8xi1>, vector<8x8xf32>
    %940 = arith.mulf %939, %1 : vector<8x8xf32>
    %cst_173 = arith.constant dense<0.000000e+00> : vector<8xf32>
    %941 = vector.multi_reduction <add>, %940, %cst_173 [0] : vector<8x8xf32> to vector<8xf32>
    %942 = vector.shape_cast %941 : vector<8xf32> to vector<1x8xf32>
    %943 = vector.broadcast %942 : vector<1x8xf32> to vector<8x8xf32>
    %944 = arith.mulf %943, %0 : vector<8x8xf32>
    %cst_174 = arith.constant dense<0.000000e+00> : vector<8xf32>
    %945 = vector.multi_reduction <add>, %944, %cst_174 [1] : vector<8x8xf32> to vector<8xf32>
    %946 = vector.shape_cast %945 : vector<8xf32> to vector<8x1xf32>
    %947 = vector.broadcast %946 : vector<8x1xf32> to vector<8x8xf32>
    %948 = arith.addf %947, %2 : vector<8x8xf32>
    %949 = math.tanh %948 : vector<8x8xf32>
    %950 = arith.select %7, %949, %948 : vector<8x8xi1>, vector<8x8xf32>
    %951 = arith.mulf %950, %1 : vector<8x8xf32>
    %cst_175 = arith.constant dense<0.000000e+00> : vector<8xf32>
    %952 = vector.multi_reduction <add>, %951, %cst_175 [0] : vector<8x8xf32> to vector<8xf32>
    %953 = vector.shape_cast %952 : vector<8xf32> to vector<1x8xf32>
    %954 = vector.broadcast %953 : vector<1x8xf32> to vector<8x8xf32>
    %955 = arith.mulf %954, %0 : vector<8x8xf32>
    %cst_176 = arith.constant dense<0.000000e+00> : vector<8xf32>
    %956 = vector.multi_reduction <add>, %955, %cst_176 [1] : vector<8x8xf32> to vector<8xf32>
    %957 = vector.shape_cast %956 : vector<8xf32> to vector<8x1xf32>
    %958 = vector.broadcast %957 : vector<8x1xf32> to vector<8x8xf32>
    %959 = arith.addf %958, %2 : vector<8x8xf32>
    %960 = math.tanh %959 : vector<8x8xf32>
    %961 = arith.select %7, %960, %959 : vector<8x8xi1>, vector<8x8xf32>
    %962 = arith.mulf %961, %1 : vector<8x8xf32>
    %cst_177 = arith.constant dense<0.000000e+00> : vector<8xf32>
    %963 = vector.multi_reduction <add>, %962, %cst_177 [0] : vector<8x8xf32> to vector<8xf32>
    %964 = vector.shape_cast %963 : vector<8xf32> to vector<1x8xf32>
    %965 = vector.broadcast %964 : vector<1x8xf32> to vector<8x8xf32>
    %966 = arith.mulf %965, %0 : vector<8x8xf32>
    %cst_178 = arith.constant dense<0.000000e+00> : vector<8xf32>
    %967 = vector.multi_reduction <add>, %966, %cst_178 [1] : vector<8x8xf32> to vector<8xf32>
    %968 = vector.shape_cast %967 : vector<8xf32> to vector<8x1xf32>
    %969 = vector.broadcast %968 : vector<8x1xf32> to vector<8x8xf32>
    %970 = arith.addf %969, %2 : vector<8x8xf32>
    %971 = math.tanh %970 : vector<8x8xf32>
    %972 = arith.select %7, %971, %970 : vector<8x8xi1>, vector<8x8xf32>
    %973 = arith.mulf %972, %1 : vector<8x8xf32>
    %cst_179 = arith.constant dense<0.000000e+00> : vector<8xf32>
    %974 = vector.multi_reduction <add>, %973, %cst_179 [0] : vector<8x8xf32> to vector<8xf32>
    %975 = vector.shape_cast %974 : vector<8xf32> to vector<1x8xf32>
    %976 = vector.broadcast %975 : vector<1x8xf32> to vector<8x8xf32>
    %977 = arith.mulf %976, %0 : vector<8x8xf32>
    %cst_180 = arith.constant dense<0.000000e+00> : vector<8xf32>
    %978 = vector.multi_reduction <add>, %977, %cst_180 [1] : vector<8x8xf32> to vector<8xf32>
    %979 = vector.shape_cast %978 : vector<8xf32> to vector<8x1xf32>
    %980 = vector.broadcast %979 : vector<8x1xf32> to vector<8x8xf32>
    %981 = arith.addf %980, %2 : vector<8x8xf32>
    %982 = math.tanh %981 : vector<8x8xf32>
    %983 = arith.select %7, %982, %981 : vector<8x8xi1>, vector<8x8xf32>
    %984 = arith.mulf %983, %1 : vector<8x8xf32>
    %cst_181 = arith.constant dense<0.000000e+00> : vector<8xf32>
    %985 = vector.multi_reduction <add>, %984, %cst_181 [0] : vector<8x8xf32> to vector<8xf32>
    %986 = vector.shape_cast %985 : vector<8xf32> to vector<1x8xf32>
    %987 = vector.broadcast %986 : vector<1x8xf32> to vector<8x8xf32>
    %988 = arith.mulf %987, %0 : vector<8x8xf32>
    %cst_182 = arith.constant dense<0.000000e+00> : vector<8xf32>
    %989 = vector.multi_reduction <add>, %988, %cst_182 [1] : vector<8x8xf32> to vector<8xf32>
    %990 = vector.shape_cast %989 : vector<8xf32> to vector<8x1xf32>
    %991 = vector.broadcast %990 : vector<8x1xf32> to vector<8x8xf32>
    %992 = arith.addf %991, %2 : vector<8x8xf32>
    %993 = math.tanh %992 : vector<8x8xf32>
    %994 = arith.select %7, %993, %992 : vector<8x8xi1>, vector<8x8xf32>
    %995 = arith.mulf %994, %1 : vector<8x8xf32>
    %cst_183 = arith.constant dense<0.000000e+00> : vector<8xf32>
    %996 = vector.multi_reduction <add>, %995, %cst_183 [0] : vector<8x8xf32> to vector<8xf32>
    %997 = vector.shape_cast %996 : vector<8xf32> to vector<1x8xf32>
    %998 = vector.broadcast %997 : vector<1x8xf32> to vector<8x8xf32>
    %999 = arith.mulf %998, %0 : vector<8x8xf32>
    %cst_184 = arith.constant dense<0.000000e+00> : vector<8xf32>
    %1000 = vector.multi_reduction <add>, %999, %cst_184 [1] : vector<8x8xf32> to vector<8xf32>
    %1001 = vector.shape_cast %1000 : vector<8xf32> to vector<8x1xf32>
    %1002 = vector.broadcast %1001 : vector<8x1xf32> to vector<8x8xf32>
    %1003 = arith.addf %1002, %2 : vector<8x8xf32>
    %1004 = math.tanh %1003 : vector<8x8xf32>
    %1005 = arith.select %7, %1004, %1003 : vector<8x8xi1>, vector<8x8xf32>
    %1006 = arith.mulf %1005, %1 : vector<8x8xf32>
    %cst_185 = arith.constant dense<0.000000e+00> : vector<8xf32>
    %1007 = vector.multi_reduction <add>, %1006, %cst_185 [0] : vector<8x8xf32> to vector<8xf32>
    %1008 = vector.shape_cast %1007 : vector<8xf32> to vector<1x8xf32>
    %1009 = vector.broadcast %1008 : vector<1x8xf32> to vector<8x8xf32>
    %1010 = arith.mulf %1009, %0 : vector<8x8xf32>
    %cst_186 = arith.constant dense<0.000000e+00> : vector<8xf32>
    %1011 = vector.multi_reduction <add>, %1010, %cst_186 [1] : vector<8x8xf32> to vector<8xf32>
    %1012 = vector.shape_cast %1011 : vector<8xf32> to vector<8x1xf32>
    %1013 = vector.broadcast %1012 : vector<8x1xf32> to vector<8x8xf32>
    %1014 = arith.addf %1013, %2 : vector<8x8xf32>
    %1015 = math.tanh %1014 : vector<8x8xf32>
    %1016 = arith.select %7, %1015, %1014 : vector<8x8xi1>, vector<8x8xf32>
    %1017 = arith.mulf %1016, %1 : vector<8x8xf32>
    %cst_187 = arith.constant dense<0.000000e+00> : vector<8xf32>
    %1018 = vector.multi_reduction <add>, %1017, %cst_187 [0] : vector<8x8xf32> to vector<8xf32>
    %1019 = vector.shape_cast %1018 : vector<8xf32> to vector<1x8xf32>
    %1020 = vector.broadcast %1019 : vector<1x8xf32> to vector<8x8xf32>
    %1021 = arith.mulf %1020, %0 : vector<8x8xf32>
    %cst_188 = arith.constant dense<0.000000e+00> : vector<8xf32>
    %1022 = vector.multi_reduction <add>, %1021, %cst_188 [1] : vector<8x8xf32> to vector<8xf32>
    %1023 = vector.shape_cast %1022 : vector<8xf32> to vector<8x1xf32>
    %1024 = vector.broadcast %1023 : vector<8x1xf32> to vector<8x8xf32>
    %1025 = arith.addf %1024, %2 : vector<8x8xf32>
    %1026 = math.tanh %1025 : vector<8x8xf32>
    %1027 = arith.select %7, %1026, %1025 : vector<8x8xi1>, vector<8x8xf32>
    %1028 = arith.mulf %1027, %1 : vector<8x8xf32>
    %cst_189 = arith.constant dense<0.000000e+00> : vector<8xf32>
    %1029 = vector.multi_reduction <add>, %1028, %cst_189 [0] : vector<8x8xf32> to vector<8xf32>
    %1030 = vector.shape_cast %1029 : vector<8xf32> to vector<1x8xf32>
    %1031 = vector.broadcast %1030 : vector<1x8xf32> to vector<8x8xf32>
    %1032 = arith.mulf %1031, %0 : vector<8x8xf32>
    %cst_190 = arith.constant dense<0.000000e+00> : vector<8xf32>
    %1033 = vector.multi_reduction <add>, %1032, %cst_190 [1] : vector<8x8xf32> to vector<8xf32>
    %1034 = vector.shape_cast %1033 : vector<8xf32> to vector<8x1xf32>
    %1035 = vector.broadcast %1034 : vector<8x1xf32> to vector<8x8xf32>
    %1036 = arith.addf %1035, %2 : vector<8x8xf32>
    %1037 = math.tanh %1036 : vector<8x8xf32>
    %1038 = arith.select %7, %1037, %1036 : vector<8x8xi1>, vector<8x8xf32>
    %1039 = arith.mulf %1038, %1 : vector<8x8xf32>
    %cst_191 = arith.constant dense<0.000000e+00> : vector<8xf32>
    %1040 = vector.multi_reduction <add>, %1039, %cst_191 [0] : vector<8x8xf32> to vector<8xf32>
    %1041 = vector.shape_cast %1040 : vector<8xf32> to vector<1x8xf32>
    %1042 = vector.broadcast %1041 : vector<1x8xf32> to vector<8x8xf32>
    %1043 = arith.mulf %1042, %0 : vector<8x8xf32>
    %cst_192 = arith.constant dense<0.000000e+00> : vector<8xf32>
    %1044 = vector.multi_reduction <add>, %1043, %cst_192 [1] : vector<8x8xf32> to vector<8xf32>
    %1045 = vector.shape_cast %1044 : vector<8xf32> to vector<8x1xf32>
    %1046 = vector.broadcast %1045 : vector<8x1xf32> to vector<8x8xf32>
    %1047 = arith.addf %1046, %2 : vector<8x8xf32>
    %1048 = math.tanh %1047 : vector<8x8xf32>
    %1049 = arith.select %7, %1048, %1047 : vector<8x8xi1>, vector<8x8xf32>
    %1050 = arith.mulf %1049, %1 : vector<8x8xf32>
    %cst_193 = arith.constant dense<0.000000e+00> : vector<8xf32>
    %1051 = vector.multi_reduction <add>, %1050, %cst_193 [0] : vector<8x8xf32> to vector<8xf32>
    %1052 = vector.shape_cast %1051 : vector<8xf32> to vector<1x8xf32>
    %1053 = vector.broadcast %1052 : vector<1x8xf32> to vector<8x8xf32>
    %1054 = arith.mulf %1053, %0 : vector<8x8xf32>
    %cst_194 = arith.constant dense<0.000000e+00> : vector<8xf32>
    %1055 = vector.multi_reduction <add>, %1054, %cst_194 [1] : vector<8x8xf32> to vector<8xf32>
    %1056 = vector.shape_cast %1055 : vector<8xf32> to vector<8x1xf32>
    %1057 = vector.broadcast %1056 : vector<8x1xf32> to vector<8x8xf32>
    %1058 = arith.addf %1057, %2 : vector<8x8xf32>
    %1059 = math.tanh %1058 : vector<8x8xf32>
    %1060 = arith.select %7, %1059, %1058 : vector<8x8xi1>, vector<8x8xf32>
    %1061 = arith.mulf %1060, %1 : vector<8x8xf32>
    %cst_195 = arith.constant dense<0.000000e+00> : vector<8xf32>
    %1062 = vector.multi_reduction <add>, %1061, %cst_195 [0] : vector<8x8xf32> to vector<8xf32>
    %1063 = vector.shape_cast %1062 : vector<8xf32> to vector<1x8xf32>
    %1064 = vector.broadcast %1063 : vector<1x8xf32> to vector<8x8xf32>
    %1065 = arith.mulf %1064, %0 : vector<8x8xf32>
    %cst_196 = arith.constant dense<0.000000e+00> : vector<8xf32>
    %1066 = vector.multi_reduction <add>, %1065, %cst_196 [1] : vector<8x8xf32> to vector<8xf32>
    %1067 = vector.shape_cast %1066 : vector<8xf32> to vector<8x1xf32>
    %1068 = vector.broadcast %1067 : vector<8x1xf32> to vector<8x8xf32>
    %1069 = arith.addf %1068, %2 : vector<8x8xf32>
    %1070 = math.tanh %1069 : vector<8x8xf32>
    %1071 = arith.select %7, %1070, %1069 : vector<8x8xi1>, vector<8x8xf32>
    %1072 = arith.mulf %1071, %1 : vector<8x8xf32>
    %cst_197 = arith.constant dense<0.000000e+00> : vector<8xf32>
    %1073 = vector.multi_reduction <add>, %1072, %cst_197 [0] : vector<8x8xf32> to vector<8xf32>
    %1074 = vector.shape_cast %1073 : vector<8xf32> to vector<1x8xf32>
    %1075 = vector.broadcast %1074 : vector<1x8xf32> to vector<8x8xf32>
    %1076 = arith.mulf %1075, %0 : vector<8x8xf32>
    %cst_198 = arith.constant dense<0.000000e+00> : vector<8xf32>
    %1077 = vector.multi_reduction <add>, %1076, %cst_198 [1] : vector<8x8xf32> to vector<8xf32>
    %1078 = vector.shape_cast %1077 : vector<8xf32> to vector<8x1xf32>
    %1079 = vector.broadcast %1078 : vector<8x1xf32> to vector<8x8xf32>
    %1080 = arith.addf %1079, %2 : vector<8x8xf32>
    %1081 = math.tanh %1080 : vector<8x8xf32>
    %1082 = arith.select %7, %1081, %1080 : vector<8x8xi1>, vector<8x8xf32>
    %1083 = arith.mulf %1082, %1 : vector<8x8xf32>
    %cst_199 = arith.constant dense<0.000000e+00> : vector<8xf32>
    %1084 = vector.multi_reduction <add>, %1083, %cst_199 [0] : vector<8x8xf32> to vector<8xf32>
    %1085 = vector.shape_cast %1084 : vector<8xf32> to vector<1x8xf32>
    %1086 = vector.broadcast %1085 : vector<1x8xf32> to vector<8x8xf32>
    %1087 = arith.mulf %1086, %0 : vector<8x8xf32>
    %cst_200 = arith.constant dense<0.000000e+00> : vector<8xf32>
    %1088 = vector.multi_reduction <add>, %1087, %cst_200 [1] : vector<8x8xf32> to vector<8xf32>
    %1089 = vector.shape_cast %1088 : vector<8xf32> to vector<8x1xf32>
    %1090 = vector.broadcast %1089 : vector<8x1xf32> to vector<8x8xf32>
    %1091 = arith.addf %1090, %2 : vector<8x8xf32>
    %1092 = math.tanh %1091 : vector<8x8xf32>
    %1093 = arith.select %7, %1092, %1091 : vector<8x8xi1>, vector<8x8xf32>
    %1094 = arith.mulf %1093, %1 : vector<8x8xf32>
    %cst_201 = arith.constant dense<0.000000e+00> : vector<8xf32>
    %1095 = vector.multi_reduction <add>, %1094, %cst_201 [0] : vector<8x8xf32> to vector<8xf32>
    %1096 = vector.shape_cast %1095 : vector<8xf32> to vector<1x8xf32>
    %1097 = vector.broadcast %1096 : vector<1x8xf32> to vector<8x8xf32>
    %1098 = arith.mulf %1097, %0 : vector<8x8xf32>
    %cst_202 = arith.constant dense<0.000000e+00> : vector<8xf32>
    %1099 = vector.multi_reduction <add>, %1098, %cst_202 [1] : vector<8x8xf32> to vector<8xf32>
    %1100 = vector.shape_cast %1099 : vector<8xf32> to vector<8x1xf32>
    %1101 = vector.broadcast %1100 : vector<8x1xf32> to vector<8x8xf32>
    %1102 = arith.addf %1101, %2 : vector<8x8xf32>
    %1103 = math.tanh %1102 : vector<8x8xf32>
    %1104 = arith.select %7, %1103, %1102 : vector<8x8xi1>, vector<8x8xf32>
    %1105 = arith.mulf %1104, %1 : vector<8x8xf32>
    %cst_203 = arith.constant dense<0.000000e+00> : vector<8xf32>
    %1106 = vector.multi_reduction <add>, %1105, %cst_203 [0] : vector<8x8xf32> to vector<8xf32>
    %1107 = vector.shape_cast %1106 : vector<8xf32> to vector<1x8xf32>
    %1108 = arith.mulf %3, %1107 : vector<1x8xf32>
    %1109 = arith.mulf %1108, %1107 : vector<1x8xf32>
    %1110 = vector.shape_cast %1109 : vector<1x8xf32> to vector<1x1x8xf32>
    %cst_204 = arith.constant dense<0.000000e+00> : vector<1xf32>
    %1111 = vector.multi_reduction <add>, %1110, %cst_204 [1, 2] : vector<1x1x8xf32> to vector<1xf32>
    %1112 = vector.shape_cast %1111 : vector<1xf32> to vector<1x1x1xf32>
    %1113 = vector.extract %1112[0, 0, 0] : f32 from vector<1x1x1xf32>
    %1114 = vector.broadcast %1113 : f32 to vector<1x1xf32>
    %c0_205 = arith.constant 0 : index
    %c0_206 = arith.constant 0 : index
    %1115 = vector.load %arg1[%c0_205, %c0_206] : memref<1x1xf32, #tpu.memory_space<vmem>>, vector<1x1xf32>
    tpu.vector_store %arg1[%c0_205, %c0_206], %1114 {strides = array<i32>} : memref<1x1xf32, #tpu.memory_space<vmem>>, vector<1x1xf32>,
    return
  }
}

</mosaic_0001>

<bundles_post_ra>
// kernel: simulation_forward.1
= control target key start
LH: loop header
LB: loop body
LE: loop exit
PB: predicated region body
PF: predicated region fallthrough
CT: control target
= control target key end

     0   :  { %vm19_vm0 = vcmask 64512   ;;  %s2555_s0 = inlined_call_operand.vmem [shape: f32[32,8], index: 0, kind: input, shape index: {}]   ;;  %s2556_s1 = inlined_call_operand.hbm [shape: f32[1,1], index: 1, kind: output, shape index: {}]  }
   0x1   :  { %v1804_v0 = vld [vmem:[%s2555_s0] sm:$0xff]  ;;  %v1554_v1 = vld [vmem:[%s2555_s0 + $0x19] ss:$0 sm:$0xff] }
   0x2   :  { %6 = vsyncpa [#allocation3], 0  ;;  %v18_v2 = vmul.f32 %v1554_v1, %v1804_v0  ;;  %v1814_v4 = vld [vmem:[%s2555_s0 + $0x10] sm:$0xff]  ;;  %v14_v5 = vlaneseq  ;;  %v1823_v9 = vld [vmem:[%s2555_s0 + $0x8] sm:$0xff]  ;;  %vm1521_vm2 = vcmask 57344   ;;  %s1790_s5 = smov [#allocation2]  }
   0x3   :  { %s1540_s6 = sshll.u32 %s1790_s5, 4  ;;  %vm1533_vm3 = vcmask 0   ;;  %s1541_s6 = int_to_ptr.vmem [resolvable:$true] %s1540_s6 }
   0x4   :  { %v20_v3 = vsel %vm19_vm0, %v18_v2, 0.0  ;;  %v1817_v8 = vshrl.u32 %v14_v5, 7 }
   0x5   :  { %21 = vadd.xlane.f32.xlu0 %v20_v3 }
   0x6   :  { %vm16_vm1 = vcmp.ge.s32.totalorder %v1817_v8, 6 }
  0x78   :  { %v22_v6 = vpop.xlane.xlu0 %21 }
  0x79   :  { %v23_v7 = vadd.f32 %v22_v6, %v1814_v4 }
  0x7b   :  { %1555 = vtanh.f32 %v23_v7 }
  0x81   :  { %v1556_v10 = vpop.eup %1555 }
  0x82   :  { %v25_v11 = vsel %vm16_vm1, %v1556_v10, %v23_v7 }
  0x83   :  { %v26_v12 = vmul.f32 %v25_v11, %v1823_v9 }
  0x85   :  { %v27_v13 = vsel %vm19_vm0, %v26_v12, 0.0 }
  0x86   :  { %v28_v14 = vrot.slane %v27_v13, 4 }
  0x88   :  { %v29_v15 = vadd.f32 %v28_v14, %v27_v13 }
  0x8a   :  { %v30_v16 = vrot.slane %v29_v15, 2 }
  0x8c   :  { %v31_v17 = vadd.f32 %v30_v16, %v29_v15 }
  0x8e   :  { %v32_v18 = vrot.slane %v31_v17, 1 }
  0x90   :  { %v33_v19 = vadd.f32 %v32_v18, %v31_v17 }
  0x92   :  { %v34_v20 = vmul.f32 %v33_v19, %v1804_v0 }
  0x94   :  { %v35_v21 = vsel %vm19_vm0, %v34_v20, 0.0 }
  0x95   :  { %36 = vadd.xlane.f32.xlu0 %v35_v21 }
 0x108   :  { %v37_v22 = vpop.xlane.xlu0 %36 }
 0x109   :  { %v38_v23 = vadd.f32 %v37_v22, %v1814_v4 }
 0x10b   :  { %1557 = vtanh.f32 %v38_v23 }
 0x111   :  { %v1558_v24 = vpop.eup %1557 }
 0x112   :  { %v40_v25 = vsel %vm16_vm1, %v1558_v24, %v38_v23 }
 0x113   :  { %v41_v26 = vmul.f32 %v40_v25, %v1823_v9 }
 0x115   :  { %v42_v27 = vsel %vm19_vm0, %v41_v26, 0.0 }
 0x116   :  { %v43_v28 = vrot.slane %v42_v27, 4 }
 0x118   :  { %v44_v29 = vadd.f32 %v43_v28, %v42_v27 }
 0x11a   :  { %v45_v30 = vrot.slane %v44_v29, 2 }
 0x11c   :  { %v46_v31 = vadd.f32 %v45_v30, %v44_v29 }
 0x11e   :  { %v47_v32 = vrot.slane %v46_v31, 1 }
 0x120   :  { %v48_v33 = vadd.f32 %v47_v32, %v46_v31 }
 0x122   :  { %v49_v34 = vmul.f32 %v48_v33, %v1804_v0 }
 0x124   :  { %v50_v35 = vsel %vm19_vm0, %v49_v34, 0.0 }
 0x125   :  { %51 = vadd.xlane.f32.xlu1 %v50_v35 }
 0x198   :  { %v52_v36 = vpop.xlane.xlu1 %51 }
 0x199   :  { %v53_v37 = vadd.f32 %v52_v36, %v1814_v4 }
 0x19b   :  { %1559 = vtanh.f32 %v53_v37 }
 0x1a1   :  { %v1560_v38 = vpop.eup %1559 }
 0x1a2   :  { %v55_v39 = vsel %vm16_vm1, %v1560_v38, %v53_v37 }
 0x1a3   :  { %v56_v40 = vmul.f32 %v55_v39, %v1823_v9 }
 0x1a5   :  { %v57_v41 = vsel %vm19_vm0, %v56_v40, 0.0 }
 0x1a6   :  { %v58_v42 = vrot.slane %v57_v41, 4 }
 0x1a8   :  { %v59_v43 = vadd.f32 %v58_v42, %v57_v41 }
 0x1aa   :  { %v60_v44 = vrot.slane %v59_v43, 2 }
 0x1ac   :  { %v61_v45 = vadd.f32 %v60_v44, %v59_v43 }
 0x1ae   :  { %v62_v46 = vrot.slane %v61_v45, 1 }
 0x1b0   :  { %v63_v47 = vadd.f32 %v62_v46, %v61_v45 }
 0x1b2   :  { %v64_v48 = vmul.f32 %v63_v47, %v1804_v0 }
 0x1b4   :  { %v65_v49 = vsel %vm19_vm0, %v64_v48, 0.0 }
 0x1b5   :  { %66 = vadd.xlane.f32.xlu1 %v65_v49 }
 0x228   :  { %v67_v50 = vpop.xlane.xlu1 %66 }
 0x229   :  { %v68_v51 = vadd.f32 %v67_v50, %v1814_v4 }
 0x22b   :  { %1561 = vtanh.f32 %v68_v51 }
 0x231   :  { %v1562_v52 = vpop.eup %1561 }
 0x232   :  { %v70_v53 = vsel %vm16_vm1, %v1562_v52, %v68_v51 }
 0x233   :  { %v71_v54 = vmul.f32 %v70_v53, %v1823_v9 }
 0x235   :  { %v72_v55 = vsel %vm19_vm0, %v71_v54, 0.0 }
 0x236   :  { %v73_v56 = vrot.slane %v72_v55, 4 }
 0x238   :  { %v74_v57 = vadd.f32 %v73_v56, %v72_v55 }
 0x23a   :  { %v75_v58 = vrot.slane %v74_v57, 2 }
 0x23c   :  { %v76_v59 = vadd.f32 %v75_v58, %v74_v57 }
 0x23e   :  { %v77_v60 = vrot.slane %v76_v59, 1 }
 0x240   :  { %v78_v61 = vadd.f32 %v77_v60, %v76_v59 }
 0x242   :  { %v79_v62 = vmul.f32 %v78_v61, %v1804_v0 }
 0x244   :  { %v80_v63 = vsel %vm19_vm0, %v79_v62, 0.0 }
 0x245   :  { %81 = vadd.xlane.f32.xlu2 %v80_v63 }
 0x2b8   :  { %v82_v1 = vpop.xlane.xlu2 %81 }
 0x2b9   :  { %v83_v2 = vadd.f32 %v82_v1, %v1814_v4 }
 0x2bb   :  { %1563 = vtanh.f32 %v83_v2 }
 0x2c1   :  { %v1564_v3 = vpop.eup %1563 }
 0x2c2   :  { %v85_v5 = vsel %vm16_vm1, %v1564_v3, %v83_v2 }
 0x2c3   :  { %v86_v6 = vmul.f32 %v85_v5, %v1823_v9 }
 0x2c5   :  { %v87_v7 = vsel %vm19_vm0, %v86_v6, 0.0 }
 0x2c6   :  { %v88_v10 = vrot.slane %v87_v7, 4 }
 0x2c8   :  { %v89_v11 = vadd.f32 %v88_v10, %v87_v7 }
 0x2ca   :  { %v90_v12 = vrot.slane %v89_v11, 2 }
 0x2cc   :  { %v91_v13 = vadd.f32 %v90_v12, %v89_v11 }
 0x2ce   :  { %v92_v14 = vrot.slane %v91_v13, 1 }
 0x2d0   :  { %v93_v15 = vadd.f32 %v92_v14, %v91_v13 }
 0x2d2   :  { %v94_v16 = vmul.f32 %v93_v15, %v1804_v0 }
 0x2d4   :  { %v95_v17 = vsel %vm19_vm0, %v94_v16, 0.0 }
 0x2d5   :  { %96 = vadd.xlane.f32.xlu2 %v95_v17 }
 0x348   :  { %v97_v18 = vpop.xlane.xlu2 %96 }
 0x349   :  { %v98_v19 = vadd.f32 %v97_v18, %v1814_v4 }
 0x34b   :  { %1565 = vtanh.f32 %v98_v19 }
 0x351   :  { %v1566_v20 = vpop.eup %1565 }
 0x352   :  { %v100_v21 = vsel %vm16_vm1, %v1566_v20, %v98_v19 }
 0x353   :  { %v101_v22 = vmul.f32 %v100_v21, %v1823_v9 }
 0x355   :  { %v102_v23 = vsel %vm19_vm0, %v101_v22, 0.0 }
 0x356   :  { %v103_v24 = vrot.slane %v102_v23, 4 }
 0x358   :  { %v104_v25 = vadd.f32 %v103_v24, %v102_v23 }
 0x35a   :  { %v105_v26 = vrot.slane %v104_v25, 2 }
 0x35c   :  { %v106_v27 = vadd.f32 %v105_v26, %v104_v25 }
 0x35e   :  { %v107_v28 = vrot.slane %v106_v27, 1 }
 0x360   :  { %v108_v29 = vadd.f32 %v107_v28, %v106_v27 }
 0x362   :  { %v109_v30 = vmul.f32 %v108_v29, %v1804_v0 }
 0x364   :  { %v110_v31 = vsel %vm19_vm0, %v109_v30, 0.0 }
 0x365   :  { %111 = vadd.xlane.f32.xlu0 %v110_v31 }
 0x3d8   :  { %v112_v32 = vpop.xlane.xlu0 %111 }
 0x3d9   :  { %v113_v33 = vadd.f32 %v112_v32, %v1814_v4 }
 0x3db   :  { %1567 = vtanh.f32 %v113_v33 }
 0x3e1   :  { %v1568_v34 = vpop.eup %1567 }
 0x3e2   :  { %v115_v35 = vsel %vm16_vm1, %v1568_v34, %v113_v33 }
 0x3e3   :  { %v116_v36 = vmul.f32 %v115_v35, %v1823_v9 }
 0x3e5   :  { %v117_v37 = vsel %vm19_vm0, %v116_v36, 0.0 }
 0x3e6   :  { %v118_v38 = vrot.slane %v117_v37, 4 }
 0x3e8   :  { %v119_v39 = vadd.f32 %v118_v38, %v117_v37 }
 0x3ea   :  { %v120_v40 = vrot.slane %v119_v39, 2 }
 0x3ec   :  { %v121_v41 = vadd.f32 %v120_v40, %v119_v39 }
 0x3ee   :  { %v122_v42 = vrot.slane %v121_v41, 1 }
 0x3f0   :  { %v123_v43 = vadd.f32 %v122_v42, %v121_v41 }
 0x3f2   :  { %v124_v44 = vmul.f32 %v123_v43, %v1804_v0 }
 0x3f4   :  { %v125_v45 = vsel %vm19_vm0, %v124_v44, 0.0 }
 0x3f5   :  { %126 = vadd.xlane.f32.xlu1 %v125_v45 }
 0x468   :  { %v127_v46 = vpop.xlane.xlu1 %126 }
 0x469   :  { %v128_v47 = vadd.f32 %v127_v46, %v1814_v4 }
 0x46b   :  { %1569 = vtanh.f32 %v128_v47 }
 0x471   :  { %v1570_v48 = vpop.eup %1569 }
 0x472   :  { %v130_v49 = vsel %vm16_vm1, %v1570_v48, %v128_v47 }
 0x473   :  { %v131_v50 = vmul.f32 %v130_v49, %v1823_v9 }
 0x475   :  { %v132_v51 = vsel %vm19_vm0, %v131_v50, 0.0 }
 0x476   :  { %v133_v52 = vrot.slane %v132_v51, 4 }
 0x478   :  { %v134_v53 = vadd.f32 %v133_v52, %v132_v51 }
 0x47a   :  { %v135_v54 = vrot.slane %v134_v53, 2 }
 0x47c   :  { %v136_v55 = vadd.f32 %v135_v54, %v134_v53 }
 0x47e   :  { %v137_v56 = vrot.slane %v136_v55, 1 }
 0x480   :  { %v138_v57 = vadd.f32 %v137_v56, %v136_v55 }
 0x482   :  { %v139_v58 = vmul.f32 %v138_v57, %v1804_v0 }
 0x484   :  { %v140_v59 = vsel %vm19_vm0, %v139_v58, 0.0 }
 0x485   :  { %141 = vadd.xlane.f32.xlu2 %v140_v59 }
 0x4f8   :  { %v142_v60 = vpop.xlane.xlu2 %141 }
 0x4f9   :  { %v143_v61 = vadd.f32 %v142_v60, %v1814_v4 }
 0x4fb   :  { %1571 = vtanh.f32 %v143_v61 }
 0x501   :  { %v1572_v62 = vpop.eup %1571 }
 0x502   :  { %v145_v63 = vsel %vm16_vm1, %v1572_v62, %v143_v61 }
 0x503   :  { %v146_v1 = vmul.f32 %v145_v63, %v1823_v9 }
 0x505   :  { %v147_v2 = vsel %vm19_vm0, %v146_v1, 0.0 }
 0x506   :  { %v148_v3 = vrot.slane %v147_v2, 4 }
 0x508   :  { %v149_v5 = vadd.f32 %v148_v3, %v147_v2 }
 0x50a   :  { %v150_v6 = vrot.slane %v149_v5, 2 }
 0x50c   :  { %v151_v7 = vadd.f32 %v150_v6, %v149_v5 }
 0x50e   :  { %v152_v10 = vrot.slane %v151_v7, 1 }
 0x510   :  { %v153_v11 = vadd.f32 %v152_v10, %v151_v7 }
 0x512   :  { %v154_v12 = vmul.f32 %v153_v11, %v1804_v0 }
 0x514   :  { %v155_v13 = vsel %vm19_vm0, %v154_v12, 0.0 }
 0x515   :  { %156 = vadd.xlane.f32.xlu0 %v155_v13 }
 0x588   :  { %v157_v14 = vpop.xlane.xlu0 %156 }
 0x589   :  { %v158_v15 = vadd.f32 %v157_v14, %v1814_v4 }
 0x58b   :  { %1573 = vtanh.f32 %v158_v15 }
 0x591   :  { %v1574_v16 = vpop.eup %1573 }
 0x592   :  { %v160_v17 = vsel %vm16_vm1, %v1574_v16, %v158_v15 }
 0x593   :  { %v161_v18 = vmul.f32 %v160_v17, %v1823_v9 }
 0x595   :  { %v162_v19 = vsel %vm19_vm0, %v161_v18, 0.0 }
 0x596   :  { %v163_v20 = vrot.slane %v162_v19, 4 }
 0x598   :  { %v164_v21 = vadd.f32 %v163_v20, %v162_v19 }
 0x59a   :  { %v165_v22 = vrot.slane %v164_v21, 2 }
 0x59c   :  { %v166_v23 = vadd.f32 %v165_v22, %v164_v21 }
 0x59e   :  { %v167_v24 = vrot.slane %v166_v23, 1 }
 0x5a0   :  { %v168_v25 = vadd.f32 %v167_v24, %v166_v23 }
 0x5a2   :  { %v169_v26 = vmul.f32 %v168_v25, %v1804_v0 }
 0x5a4   :  { %v170_v27 = vsel %vm19_vm0, %v169_v26, 0.0 }
 0x5a5   :  { %171 = vadd.xlane.f32.xlu1 %v170_v27 }
 0x618   :  { %v172_v28 = vpop.xlane.xlu1 %171 }
 0x619   :  { %v173_v29 = vadd.f32 %v172_v28, %v1814_v4 }
 0x61b   :  { %1575 = vtanh.f32 %v173_v29 }
 0x621   :  { %v1576_v30 = vpop.eup %1575 }
 0x622   :  { %v175_v31 = vsel %vm16_vm1, %v1576_v30, %v173_v29 }
 0x623   :  { %v176_v32 = vmul.f32 %v175_v31, %v1823_v9 }
 0x625   :  { %v177_v33 = vsel %vm19_vm0, %v176_v32, 0.0 }
 0x626   :  { %v178_v34 = vrot.slane %v177_v33, 4 }
 0x628   :  { %v179_v35 = vadd.f32 %v178_v34, %v177_v33 }
 0x62a   :  { %v180_v36 = vrot.slane %v179_v35, 2 }
 0x62c   :  { %v181_v37 = vadd.f32 %v180_v36, %v179_v35 }
 0x62e   :  { %v182_v38 = vrot.slane %v181_v37, 1 }
 0x630   :  { %v183_v39 = vadd.f32 %v182_v38, %v181_v37 }
 0x632   :  { %v184_v40 = vmul.f32 %v183_v39, %v1804_v0 }
 0x634   :  { %v185_v41 = vsel %vm19_vm0, %v184_v40, 0.0 }
 0x635   :  { %186 = vadd.xlane.f32.xlu2 %v185_v41 }
 0x6a8   :  { %v187_v42 = vpop.xlane.xlu2 %186 }
 0x6a9   :  { %v188_v43 = vadd.f32 %v187_v42, %v1814_v4 }
 0x6ab   :  { %1577 = vtanh.f32 %v188_v43 }
 0x6b1   :  { %v1578_v44 = vpop.eup %1577 }
 0x6b2   :  { %v190_v45 = vsel %vm16_vm1, %v1578_v44, %v188_v43 }
 0x6b3   :  { %v191_v46 = vmul.f32 %v190_v45, %v1823_v9 }
 0x6b5   :  { %v192_v47 = vsel %vm19_vm0, %v191_v46, 0.0 }
 0x6b6   :  { %v193_v48 = vrot.slane %v192_v47, 4 }
 0x6b8   :  { %v194_v49 = vadd.f32 %v193_v48, %v192_v47 }
 0x6ba   :  { %v195_v50 = vrot.slane %v194_v49, 2 }
 0x6bc   :  { %v196_v51 = vadd.f32 %v195_v50, %v194_v49 }
 0x6be   :  { %v197_v52 = vrot.slane %v196_v51, 1 }
 0x6c0   :  { %v198_v53 = vadd.f32 %v197_v52, %v196_v51 }
 0x6c2   :  { %v199_v54 = vmul.f32 %v198_v53, %v1804_v0 }
 0x6c4   :  { %v200_v55 = vsel %vm19_vm0, %v199_v54, 0.0 }
 0x6c5   :  { %201 = vadd.xlane.f32.xlu0 %v200_v55 }
 0x738   :  { %v202_v56 = vpop.xlane.xlu0 %201 }
 0x739   :  { %v203_v57 = vadd.f32 %v202_v56, %v1814_v4 }
 0x73b   :  { %1579 = vtanh.f32 %v203_v57 }
 0x741   :  { %v1580_v58 = vpop.eup %1579 }
 0x742   :  { %v205_v59 = vsel %vm16_vm1, %v1580_v58, %v203_v57 }
 0x743   :  { %v206_v60 = vmul.f32 %v205_v59, %v1823_v9 }
 0x745   :  { %v207_v61 = vsel %vm19_vm0, %v206_v60, 0.0 }
 0x746   :  { %v208_v62 = vrot.slane %v207_v61, 4 }
 0x748   :  { %v209_v63 = vadd.f32 %v208_v62, %v207_v61 }
 0x74a   :  { %v210_v1 = vrot.slane %v209_v63, 2 }
 0x74c   :  { %v211_v2 = vadd.f32 %v210_v1, %v209_v63 }
 0x74e   :  { %v212_v3 = vrot.slane %v211_v2, 1 }
 0x750   :  { %v213_v5 = vadd.f32 %v212_v3, %v211_v2 }
 0x752   :  { %v214_v6 = vmul.f32 %v213_v5, %v1804_v0 }
 0x754   :  { %v215_v7 = vsel %vm19_vm0, %v214_v6, 0.0 }
 0x755   :  { %216 = vadd.xlane.f32.xlu1 %v215_v7 }
 0x7c8   :  { %v217_v10 = vpop.xlane.xlu1 %216 }
 0x7c9   :  { %v218_v11 = vadd.f32 %v217_v10, %v1814_v4 }
 0x7cb   :  { %1581 = vtanh.f32 %v218_v11 }
 0x7d1   :  { %v1582_v12 = vpop.eup %1581 }
 0x7d2   :  { %v220_v13 = vsel %vm16_vm1, %v1582_v12, %v218_v11 }
 0x7d3   :  { %v221_v14 = vmul.f32 %v220_v13, %v1823_v9 }
 0x7d5   :  { %v222_v15 = vsel %vm19_vm0, %v221_v14, 0.0 }
 0x7d6   :  { %v223_v16 = vrot.slane %v222_v15, 4 }
 0x7d8   :  { %v224_v17 = vadd.f32 %v223_v16, %v222_v15 }
 0x7da   :  { %v225_v18 = vrot.slane %v224_v17, 2 }
 0x7dc   :  { %v226_v19 = vadd.f32 %v225_v18, %v224_v17 }
 0x7de   :  { %v227_v20 = vrot.slane %v226_v19, 1 }
 0x7e0   :  { %v228_v21 = vadd.f32 %v227_v20, %v226_v19 }
 0x7e2   :  { %v229_v22 = vmul.f32 %v228_v21, %v1804_v0 }
 0x7e4   :  { %v230_v23 = vsel %vm19_vm0, %v229_v22, 0.0 }
 0x7e5   :  { %231 = vadd.xlane.f32.xlu2 %v230_v23 }
 0x858   :  { %v232_v24 = vpop.xlane.xlu2 %231 }
 0x859   :  { %v233_v25 = vadd.f32 %v232_v24, %v1814_v4 }
 0x85b   :  { %1583 = vtanh.f32 %v233_v25 }
 0x861   :  { %v1584_v26 = vpop.eup %1583 }
 0x862   :  { %v235_v27 = vsel %vm16_vm1, %v1584_v26, %v233_v25 }
 0x863   :  { %v236_v28 = vmul.f32 %v235_v27, %v1823_v9 }
 0x865   :  { %v237_v29 = vsel %vm19_vm0, %v236_v28, 0.0 }
 0x866   :  { %v238_v30 = vrot.slane %v237_v29, 4 }
 0x868   :  { %v239_v31 = vadd.f32 %v238_v30, %v237_v29 }
 0x86a   :  { %v240_v32 = vrot.slane %v239_v31, 2 }
 0x86c   :  { %v241_v33 = vadd.f32 %v240_v32, %v239_v31 }
 0x86e   :  { %v242_v34 = vrot.slane %v241_v33, 1 }
 0x870   :  { %v243_v35 = vadd.f32 %v242_v34, %v241_v33 }
 0x872   :  { %v244_v36 = vmul.f32 %v243_v35, %v1804_v0 }
 0x874   :  { %v245_v37 = vsel %vm19_vm0, %v244_v36, 0.0 }
 0x875   :  { %246 = vadd.xlane.f32.xlu0 %v245_v37 }
 0x8e8   :  { %v247_v38 = vpop.xlane.xlu0 %246 }
 0x8e9   :  { %v248_v39 = vadd.f32 %v247_v38, %v1814_v4 }
 0x8eb   :  { %1585 = vtanh.f32 %v248_v39 }
 0x8f1   :  { %v1586_v40 = vpop.eup %1585 }
 0x8f2   :  { %v250_v41 = vsel %vm16_vm1, %v1586_v40, %v248_v39 }
 0x8f3   :  { %v251_v42 = vmul.f32 %v250_v41, %v1823_v9 }
 0x8f5   :  { %v252_v43 = vsel %vm19_vm0, %v251_v42, 0.0 }
 0x8f6   :  { %v253_v44 = vrot.slane %v252_v43, 4 }
 0x8f8   :  { %v254_v45 = vadd.f32 %v253_v44, %v252_v43 }
 0x8fa   :  { %v255_v46 = vrot.slane %v254_v45, 2 }
 0x8fc   :  { %v256_v47 = vadd.f32 %v255_v46, %v254_v45 }
 0x8fe   :  { %v257_v48 = vrot.slane %v256_v47, 1 }
 0x900   :  { %v258_v49 = vadd.f32 %v257_v48, %v256_v47 }
 0x902   :  { %v259_v50 = vmul.f32 %v258_v49, %v1804_v0 }
 0x904   :  { %v260_v51 = vsel %vm19_vm0, %v259_v50, 0.0 }
 0x905   :  { %261 = vadd.xlane.f32.xlu1 %v260_v51 }
 0x978   :  { %v262_v52 = vpop.xlane.xlu1 %261 }
 0x979   :  { %v263_v53 = vadd.f32 %v262_v52, %v1814_v4 }
 0x97b   :  { %1587 = vtanh.f32 %v263_v53 }
 0x981   :  { %v1588_v54 = vpop.eup %1587 }
 0x982   :  { %v265_v55 = vsel %vm16_vm1, %v1588_v54, %v263_v53 }
 0x983   :  { %v266_v56 = vmul.f32 %v265_v55, %v1823_v9 }
 0x985   :  { %v267_v57 = vsel %vm19_vm0, %v266_v56, 0.0 }
 0x986   :  { %v268_v58 = vrot.slane %v267_v57, 4 }
 0x988   :  { %v269_v59 = vadd.f32 %v268_v58, %v267_v57 }
 0x98a   :  { %v270_v60 = vrot.slane %v269_v59, 2 }
 0x98c   :  { %v271_v61 = vadd.f32 %v270_v60, %v269_v59 }
 0x98e   :  { %v272_v62 = vrot.slane %v271_v61, 1 }
 0x990   :  { %v273_v63 = vadd.f32 %v272_v62, %v271_v61 }
 0x992   :  { %v274_v1 = vmul.f32 %v273_v63, %v1804_v0 }
 0x994   :  { %v275_v2 = vsel %vm19_vm0, %v274_v1, 0.0 }
 0x995   :  { %276 = vadd.xlane.f32.xlu2 %v275_v2 }
 0xa08   :  { %v277_v3 = vpop.xlane.xlu2 %276 }
 0xa09   :  { %v278_v5 = vadd.f32 %v277_v3, %v1814_v4 }
 0xa0b   :  { %1589 = vtanh.f32 %v278_v5 }
 0xa11   :  { %v1590_v6 = vpop.eup %1589 }
 0xa12   :  { %v280_v7 = vsel %vm16_vm1, %v1590_v6, %v278_v5 }
 0xa13   :  { %v281_v10 = vmul.f32 %v280_v7, %v1823_v9 }
 0xa15   :  { %v282_v11 = vsel %vm19_vm0, %v281_v10, 0.0 }
 0xa16   :  { %v283_v12 = vrot.slane %v282_v11, 4 }
 0xa18   :  { %v284_v13 = vadd.f32 %v283_v12, %v282_v11 }
 0xa1a   :  { %v285_v14 = vrot.slane %v284_v13, 2 }
 0xa1c   :  { %v286_v15 = vadd.f32 %v285_v14, %v284_v13 }
 0xa1e   :  { %v287_v16 = vrot.slane %v286_v15, 1 }
 0xa20   :  { %v288_v17 = vadd.f32 %v287_v16, %v286_v15 }
 0xa22   :  { %v289_v18 = vmul.f32 %v288_v17, %v1804_v0 }
 0xa24   :  { %v290_v19 = vsel %vm19_vm0, %v289_v18, 0.0 }
 0xa25   :  { %291 = vadd.xlane.f32.xlu0 %v290_v19 }
 0xa98   :  { %v292_v20 = vpop.xlane.xlu0 %291 }
 0xa99   :  { %v293_v21 = vadd.f32 %v292_v20, %v1814_v4 }
 0xa9b   :  { %1591 = vtanh.f32 %v293_v21 }
 0xaa1   :  { %v1592_v22 = vpop.eup %1591 }
 0xaa2   :  { %v295_v23 = vsel %vm16_vm1, %v1592_v22, %v293_v21 }
 0xaa3   :  { %v296_v24 = vmul.f32 %v295_v23, %v1823_v9 }
 0xaa5   :  { %v297_v25 = vsel %vm19_vm0, %v296_v24, 0.0 }
 0xaa6   :  { %v298_v26 = vrot.slane %v297_v25, 4 }
 0xaa8   :  { %v299_v27 = vadd.f32 %v298_v26, %v297_v25 }
 0xaaa   :  { %v300_v28 = vrot.slane %v299_v27, 2 }
 0xaac   :  { %v301_v29 = vadd.f32 %v300_v28, %v299_v27 }
 0xaae   :  { %v302_v30 = vrot.slane %v301_v29, 1 }
 0xab0   :  { %v303_v31 = vadd.f32 %v302_v30, %v301_v29 }
 0xab2   :  { %v304_v32 = vmul.f32 %v303_v31, %v1804_v0 }
 0xab4   :  { %v305_v33 = vsel %vm19_vm0, %v304_v32, 0.0 }
 0xab5   :  { %306 = vadd.xlane.f32.xlu1 %v305_v33 }
 0xb28   :  { %v307_v34 = vpop.xlane.xlu1 %306 }
 0xb29   :  { %v308_v35 = vadd.f32 %v307_v34, %v1814_v4 }
 0xb2b   :  { %1593 = vtanh.f32 %v308_v35 }
 0xb31   :  { %v1594_v36 = vpop.eup %1593 }
 0xb32   :  { %v310_v37 = vsel %vm16_vm1, %v1594_v36, %v308_v35 }
 0xb33   :  { %v311_v38 = vmul.f32 %v310_v37, %v1823_v9 }
 0xb35   :  { %v312_v39 = vsel %vm19_vm0, %v311_v38, 0.0 }
 0xb36   :  { %v313_v40 = vrot.slane %v312_v39, 4 }
 0xb38   :  { %v314_v41 = vadd.f32 %v313_v40, %v312_v39 }
 0xb3a   :  { %v315_v42 = vrot.slane %v314_v41, 2 }
 0xb3c   :  { %v316_v43 = vadd.f32 %v315_v42, %v314_v41 }
 0xb3e   :  { %v317_v44 = vrot.slane %v316_v43, 1 }
 0xb40   :  { %v318_v45 = vadd.f32 %v317_v44, %v316_v43 }
 0xb42   :  { %v319_v46 = vmul.f32 %v318_v45, %v1804_v0 }
 0xb44   :  { %v320_v47 = vsel %vm19_vm0, %v319_v46, 0.0 }
 0xb45   :  { %321 = vadd.xlane.f32.xlu2 %v320_v47 }
 0xbb8   :  { %v322_v48 = vpop.xlane.xlu2 %321 }
 0xbb9   :  { %v323_v49 = vadd.f32 %v322_v48, %v1814_v4 }
 0xbbb   :  { %1595 = vtanh.f32 %v323_v49 }
 0xbc1   :  { %v1596_v50 = vpop.eup %1595 }
 0xbc2   :  { %v325_v51 = vsel %vm16_vm1, %v1596_v50, %v323_v49 }
 0xbc3   :  { %v326_v52 = vmul.f32 %v325_v51, %v1823_v9 }
 0xbc5   :  { %v327_v53 = vsel %vm19_vm0, %v326_v52, 0.0 }
 0xbc6   :  { %v328_v54 = vrot.slane %v327_v53, 4 }
 0xbc8   :  { %v329_v55 = vadd.f32 %v328_v54, %v327_v53 }
 0xbca   :  { %v330_v56 = vrot.slane %v329_v55, 2 }
 0xbcc   :  { %v331_v57 = vadd.f32 %v330_v56, %v329_v55 }
 0xbce   :  { %v332_v58 = vrot.slane %v331_v57, 1 }
 0xbd0   :  { %v333_v59 = vadd.f32 %v332_v58, %v331_v57 }
 0xbd2   :  { %v334_v60 = vmul.f32 %v333_v59, %v1804_v0 }
 0xbd4   :  { %v335_v61 = vsel %vm19_vm0, %v334_v60, 0.0 }
 0xbd5   :  { %336 = vadd.xlane.f32.xlu0 %v335_v61 }
 0xc48   :  { %v337_v62 = vpop.xlane.xlu0 %336 }
 0xc49   :  { %v338_v63 = vadd.f32 %v337_v62, %v1814_v4 }
 0xc4b   :  { %1597 = vtanh.f32 %v338_v63 }
 0xc51   :  { %v1598_v1 = vpop.eup %1597 }
 0xc52   :  { %v340_v2 = vsel %vm16_vm1, %v1598_v1, %v338_v63 }
 0xc53   :  { %v341_v3 = vmul.f32 %v340_v2, %v1823_v9 }
 0xc55   :  { %v342_v5 = vsel %vm19_vm0, %v341_v3, 0.0 }
 0xc56   :  { %v343_v6 = vrot.slane %v342_v5, 4 }
 0xc58   :  { %v344_v7 = vadd.f32 %v343_v6, %v342_v5 }
 0xc5a   :  { %v345_v10 = vrot.slane %v344_v7, 2 }
 0xc5c   :  { %v346_v11 = vadd.f32 %v345_v10, %v344_v7 }
 0xc5e   :  { %v347_v12 = vrot.slane %v346_v11, 1 }
 0xc60   :  { %v348_v13 = vadd.f32 %v347_v12, %v346_v11 }
 0xc62   :  { %v349_v14 = vmul.f32 %v348_v13, %v1804_v0 }
 0xc64   :  { %v350_v15 = vsel %vm19_vm0, %v349_v14, 0.0 }
 0xc65   :  { %351 = vadd.xlane.f32.xlu1 %v350_v15 }
 0xcd8   :  { %v352_v16 = vpop.xlane.xlu1 %351 }
 0xcd9   :  { %v353_v17 = vadd.f32 %v352_v16, %v1814_v4 }
 0xcdb   :  { %1599 = vtanh.f32 %v353_v17 }
 0xce1   :  { %v1600_v18 = vpop.eup %1599 }
 0xce2   :  { %v355_v19 = vsel %vm16_vm1, %v1600_v18, %v353_v17 }
 0xce3   :  { %v356_v20 = vmul.f32 %v355_v19, %v1823_v9 }
 0xce5   :  { %v357_v21 = vsel %vm19_vm0, %v356_v20, 0.0 }
 0xce6   :  { %v358_v22 = vrot.slane %v357_v21, 4 }
 0xce8   :  { %v359_v23 = vadd.f32 %v358_v22, %v357_v21 }
 0xcea   :  { %v360_v24 = vrot.slane %v359_v23, 2 }
 0xcec   :  { %v361_v25 = vadd.f32 %v360_v24, %v359_v23 }
 0xcee   :  { %v362_v26 = vrot.slane %v361_v25, 1 }
 0xcf0   :  { %v363_v27 = vadd.f32 %v362_v26, %v361_v25 }
 0xcf2   :  { %v364_v28 = vmul.f32 %v363_v27, %v1804_v0 }
 0xcf4   :  { %v365_v29 = vsel %vm19_vm0, %v364_v28, 0.0 }
 0xcf5   :  { %366 = vadd.xlane.f32.xlu2 %v365_v29 }
 0xd68   :  { %v367_v30 = vpop.xlane.xlu2 %366 }
 0xd69   :  { %v368_v31 = vadd.f32 %v367_v30, %v1814_v4 }
 0xd6b   :  { %1601 = vtanh.f32 %v368_v31 }
 0xd71   :  { %v1602_v32 = vpop.eup %1601 }
 0xd72   :  { %v370_v33 = vsel %vm16_vm1, %v1602_v32, %v368_v31 }
 0xd73   :  { %v371_v34 = vmul.f32 %v370_v33, %v1823_v9 }
 0xd75   :  { %v372_v35 = vsel %vm19_vm0, %v371_v34, 0.0 }
 0xd76   :  { %v373_v36 = vrot.slane %v372_v35, 4 }
 0xd78   :  { %v374_v37 = vadd.f32 %v373_v36, %v372_v35 }
 0xd7a   :  { %v375_v38 = vrot.slane %v374_v37, 2 }
 0xd7c   :  { %v376_v39 = vadd.f32 %v375_v38, %v374_v37 }
 0xd7e   :  { %v377_v40 = vrot.slane %v376_v39, 1 }
 0xd80   :  { %v378_v41 = vadd.f32 %v377_v40, %v376_v39 }
 0xd82   :  { %v379_v42 = vmul.f32 %v378_v41, %v1804_v0 }
 0xd84   :  { %v380_v43 = vsel %vm19_vm0, %v379_v42, 0.0 }
 0xd85   :  { %381 = vadd.xlane.f32.xlu0 %v380_v43 }
 0xdf8   :  { %v382_v44 = vpop.xlane.xlu0 %381 }
 0xdf9   :  { %v383_v45 = vadd.f32 %v382_v44, %v1814_v4 }
 0xdfb   :  { %1603 = vtanh.f32 %v383_v45 }
 0xe01   :  { %v1604_v46 = vpop.eup %1603 }
 0xe02   :  { %v385_v47 = vsel %vm16_vm1, %v1604_v46, %v383_v45 }
 0xe03   :  { %v386_v48 = vmul.f32 %v385_v47, %v1823_v9 }
 0xe05   :  { %v387_v49 = vsel %vm19_vm0, %v386_v48, 0.0 }
 0xe06   :  { %v388_v50 = vrot.slane %v387_v49, 4 }
 0xe08   :  { %v389_v51 = vadd.f32 %v388_v50, %v387_v49 }
 0xe0a   :  { %v390_v52 = vrot.slane %v389_v51, 2 }
 0xe0c   :  { %v391_v53 = vadd.f32 %v390_v52, %v389_v51 }
 0xe0e   :  { %v392_v54 = vrot.slane %v391_v53, 1 }
 0xe10   :  { %v393_v55 = vadd.f32 %v392_v54, %v391_v53 }
 0xe12   :  { %v394_v56 = vmul.f32 %v393_v55, %v1804_v0 }
 0xe14   :  { %v395_v57 = vsel %vm19_vm0, %v394_v56, 0.0 }
 0xe15   :  { %396 = vadd.xlane.f32.xlu1 %v395_v57 }
 0xe88   :  { %v397_v58 = vpop.xlane.xlu1 %396 }
 0xe89   :  { %v398_v59 = vadd.f32 %v397_v58, %v1814_v4 }
 0xe8b   :  { %1605 = vtanh.f32 %v398_v59 }
 0xe91   :  { %v1606_v60 = vpop.eup %1605 }
 0xe92   :  { %v400_v61 = vsel %vm16_vm1, %v1606_v60, %v398_v59 }
 0xe93   :  { %v401_v62 = vmul.f32 %v400_v61, %v1823_v9 }
 0xe95   :  { %v402_v63 = vsel %vm19_vm0, %v401_v62, 0.0 }
 0xe96   :  { %v403_v1 = vrot.slane %v402_v63, 4 }
 0xe98   :  { %v404_v2 = vadd.f32 %v403_v1, %v402_v63 }
 0xe9a   :  { %v405_v3 = vrot.slane %v404_v2, 2 }
 0xe9c   :  { %v406_v5 = vadd.f32 %v405_v3, %v404_v2 }
 0xe9e   :  { %v407_v6 = vrot.slane %v406_v5, 1 }
 0xea0   :  { %v408_v7 = vadd.f32 %v407_v6, %v406_v5 }
 0xea2   :  { %v409_v10 = vmul.f32 %v408_v7, %v1804_v0 }
 0xea4   :  { %v410_v11 = vsel %vm19_vm0, %v409_v10, 0.0 }
 0xea5   :  { %411 = vadd.xlane.f32.xlu2 %v410_v11 }
 0xf18   :  { %v412_v12 = vpop.xlane.xlu2 %411 }
 0xf19   :  { %v413_v13 = vadd.f32 %v412_v12, %v1814_v4 }
 0xf1b   :  { %1607 = vtanh.f32 %v413_v13 }
 0xf21   :  { %v1608_v14 = vpop.eup %1607 }
 0xf22   :  { %v415_v15 = vsel %vm16_vm1, %v1608_v14, %v413_v13 }
 0xf23   :  { %v416_v16 = vmul.f32 %v415_v15, %v1823_v9 }
 0xf25   :  { %v417_v17 = vsel %vm19_vm0, %v416_v16, 0.0 }
 0xf26   :  { %v418_v18 = vrot.slane %v417_v17, 4 }
 0xf28   :  { %v419_v19 = vadd.f32 %v418_v18, %v417_v17 }
 0xf2a   :  { %v420_v20 = vrot.slane %v419_v19, 2 }
 0xf2c   :  { %v421_v21 = vadd.f32 %v420_v20, %v419_v19 }
 0xf2e   :  { %v422_v22 = vrot.slane %v421_v21, 1 }
 0xf30   :  { %v423_v23 = vadd.f32 %v422_v22, %v421_v21 }
 0xf32   :  { %v424_v24 = vmul.f32 %v423_v23, %v1804_v0 }
 0xf34   :  { %v425_v25 = vsel %vm19_vm0, %v424_v24, 0.0 }
 0xf35   :  { %426 = vadd.xlane.f32.xlu0 %v425_v25 }
 0xfa8   :  { %v427_v26 = vpop.xlane.xlu0 %426 }
 0xfa9   :  { %v428_v27 = vadd.f32 %v427_v26, %v1814_v4 }
 0xfab   :  { %1609 = vtanh.f32 %v428_v27 }
 0xfb1   :  { %v1610_v28 = vpop.eup %1609 }
 0xfb2   :  { %v430_v29 = vsel %vm16_vm1, %v1610_v28, %v428_v27 }
 0xfb3   :  { %v431_v30 = vmul.f32 %v430_v29, %v1823_v9 }
 0xfb5   :  { %v432_v31 = vsel %vm19_vm0, %v431_v30, 0.0 }
 0xfb6   :  { %v433_v32 = vrot.slane %v432_v31, 4 }
 0xfb8   :  { %v434_v33 = vadd.f32 %v433_v32, %v432_v31 }
 0xfba   :  { %v435_v34 = vrot.slane %v434_v33, 2 }
 0xfbc   :  { %v436_v35 = vadd.f32 %v435_v34, %v434_v33  ;;  %v2049_v33 = vld [vmem:[%s2555_s0] sm:$0xff] }
 0xfbe   :  { %v437_v36 = vrot.slane %v436_v35, 1 }
 0xfc0   :  { %v438_v37 = vadd.f32 %v437_v36, %v436_v35 }
 0xfc2   :  { %v439_v38 = vmul.f32 %v438_v37, %v1804_v0 }
 0xfc4   :  { %v440_v39 = vsel %vm19_vm0, %v439_v38, 0.0 }
 0xfc5   :  { %441 = vadd.xlane.f32.xlu1 %v440_v39  ;;  %v2064_v39 = vld [vmem:[%s2555_s0 + $0x8] sm:$0xff] }
0x1038   :  { %v442_v40 = vpop.xlane.xlu1 %441 }
0x1039   :  { %v443_v41 = vadd.f32 %v442_v40, %v1814_v4 }
0x103b   :  { %1611 = vtanh.f32 %v443_v41 }
0x1041   :  { %v1612_v42 = vpop.eup %1611 }
0x1042   :  { %v445_v43 = vsel %vm16_vm1, %v1612_v42, %v443_v41 }
0x1043   :  { %v446_v44 = vmul.f32 %v445_v43, %v1823_v9 }
0x1045   :  { %v447_v45 = vsel %vm19_vm0, %v446_v44, 0.0 }
0x1046   :  { %v448_v46 = vrot.slane %v447_v45, 4 }
0x1048   :  { %v449_v47 = vadd.f32 %v448_v46, %v447_v45 }
0x104a   :  { %v450_v48 = vrot.slane %v449_v47, 2 }
0x104c   :  { %v451_v49 = vadd.f32 %v450_v48, %v449_v47 }
0x104e   :  { %v452_v50 = vrot.slane %v451_v49, 1 }
0x1050   :  { %v453_v51 = vadd.f32 %v452_v50, %v451_v49 }
0x1052   :  { %v454_v52 = vmul.f32 %v453_v51, %v1804_v0 }
0x1054   :  { %v455_v53 = vsel %vm19_vm0, %v454_v52, 0.0 }
0x1055   :  { %456 = vadd.xlane.f32.xlu2 %v455_v53 }
0x10c8   :  { %v457_v54 = vpop.xlane.xlu2 %456 }
0x10c9   :  { %v458_v55 = vadd.f32 %v457_v54, %v1814_v4 }
0x10cb   :  { %1613 = vtanh.f32 %v458_v55 }
0x10d1   :  { %v1614_v56 = vpop.eup %1613 }
0x10d2   :  { %v460_v57 = vsel %vm16_vm1, %v1614_v56, %v458_v55 }
0x10d3   :  { %v461_v58 = vmul.f32 %v460_v57, %v1823_v9 }
0x10d5   :  { %v462_v59 = vsel %vm19_vm0, %v461_v58, 0.0 }
0x10d6   :  { %v463_v60 = vrot.slane %v462_v59, 4 }
0x10d8   :  { %v464_v61 = vadd.f32 %v463_v60, %v462_v59 }
0x10da   :  { %v465_v62 = vrot.slane %v464_v61, 2 }
0x10dc   :  { %v466_v63 = vadd.f32 %v465_v62, %v464_v61 }
0x10de   :  { %v467_v1 = vrot.slane %v466_v63, 1 }
0x10e0   :  { %v468_v2 = vadd.f32 %v467_v1, %v466_v63 }
0x10e2   :  { %v469_v3 = vmul.f32 %v468_v2, %v1804_v0 }
0x10e4   :  { %v470_v5 = vsel %vm19_vm0, %v469_v3, 0.0 }
0x10e5   :  { %471 = vadd.xlane.f32.xlu0 %v470_v5 }
0x1158   :  { %v472_v6 = vpop.xlane.xlu0 %471 }
0x1159   :  { %v473_v7 = vadd.f32 %v472_v6, %v1814_v4 }
0x115b   :  { %1615 = vtanh.f32 %v473_v7 }
0x1161   :  { %v1616_v10 = vpop.eup %1615 }
0x1162   :  { %v475_v11 = vsel %vm16_vm1, %v1616_v10, %v473_v7 }
0x1163   :  { %v476_v12 = vmul.f32 %v475_v11, %v1823_v9 }
0x1165   :  { %v477_v13 = vsel %vm19_vm0, %v476_v12, 0.0 }
0x1166   :  { %v478_v14 = vrot.slane %v477_v13, 4 }
0x1168   :  { %v479_v15 = vadd.f32 %v478_v14, %v477_v13 }
0x116a   :  { %v480_v16 = vrot.slane %v479_v15, 2 }
0x116c   :  { %v481_v17 = vadd.f32 %v480_v16, %v479_v15 }
0x116e   :  { %v482_v18 = vrot.slane %v481_v17, 1 }
0x1170   :  { %v483_v19 = vadd.f32 %v482_v18, %v481_v17 }
0x1172   :  { %v484_v20 = vmul.f32 %v483_v19, %v1804_v0 }
0x1174   :  { %v485_v21 = vsel %vm19_vm0, %v484_v20, 0.0 }
0x1175   :  { %486 = vadd.xlane.f32.xlu1 %v485_v21 }
0x11e8   :  { %v487_v22 = vpop.xlane.xlu1 %486 }
0x11e9   :  { %v488_v23 = vadd.f32 %v487_v22, %v1814_v4 }
0x11eb   :  { %1617 = vtanh.f32 %v488_v23 }
0x11f1   :  { %v1618_v24 = vpop.eup %1617 }
0x11f2   :  { %v490_v25 = vsel %vm16_vm1, %v1618_v24, %v488_v23 }
0x11f3   :  { %v491_v26 = vmul.f32 %v490_v25, %v1823_v9  ;;  %v2056_v9 = vld [vmem:[%s2555_s0 + $0x10] sm:$0xff] }
0x11f5   :  { %v492_v27 = vsel %vm19_vm0, %v491_v26, 0.0 }
0x11f6   :  { %v493_v28 = vrot.slane %v492_v27, 4 }
0x11f8   :  { %v494_v29 = vadd.f32 %v493_v28, %v492_v27 }
0x11fa   :  { %v495_v30 = vrot.slane %v494_v29, 2 }
0x11fc   :  { %v496_v31 = vadd.f32 %v495_v30, %v494_v29 }
0x11fe   :  { %v497_v0 = vrot.slane %v496_v31, 1 }
0x1200   :  { %v498_v32 = vadd.f32 %v497_v0, %v496_v31 }
0x1202   :  { %v499_v4 = vmul.f32 %v2049_v33, %v498_v32 }
0x1204   :  { %v500_v34 = vsel %vm19_vm0, %v499_v4, 0.0 }
0x1205   :  { %501 = vadd.xlane.f32.xlu2 %v500_v34 }
0x1278   :  { %v502_v35 = vpop.xlane.xlu2 %501 }
0x1279   :  { %v503_v36 = vadd.f32 %v2056_v9, %v502_v35 }
0x127b   :  { %1619 = vtanh.f32 %v503_v36 }
0x1281   :  { %v1620_v37 = vpop.eup %1619 }
0x1282   :  { %v505_v38 = vsel %vm16_vm1, %v1620_v37, %v503_v36 }
0x1283   :  { %v506_v40 = vmul.f32 %v2064_v39, %v505_v38 }
0x1285   :  { %v507_v41 = vsel %vm19_vm0, %v506_v40, 0.0 }
0x1286   :  { %v508_v42 = vrot.slane %v507_v41, 4 }
0x1288   :  { %v509_v43 = vadd.f32 %v508_v42, %v507_v41 }
0x128a   :  { %v510_v44 = vrot.slane %v509_v43, 2 }
0x128c   :  { %v511_v45 = vadd.f32 %v510_v44, %v509_v43 }
0x128e   :  { %v512_v46 = vrot.slane %v511_v45, 1 }
0x1290   :  { %v513_v47 = vadd.f32 %v512_v46, %v511_v45 }
0x1292   :  { %v514_v48 = vmul.f32 %v2049_v33, %v513_v47 }
0x1294   :  { %v515_v49 = vsel %vm19_vm0, %v514_v48, 0.0 }
0x1295   :  { %516 = vadd.xlane.f32.xlu0 %v515_v49 }
0x1308   :  { %v517_v50 = vpop.xlane.xlu0 %516 }
0x1309   :  { %v518_v51 = vadd.f32 %v2056_v9, %v517_v50 }
0x130b   :  { %1621 = vtanh.f32 %v518_v51 }
0x1311   :  { %v1622_v52 = vpop.eup %1621 }
0x1312   :  { %v520_v53 = vsel %vm16_vm1, %v1622_v52, %v518_v51 }
0x1313   :  { %v521_v54 = vmul.f32 %v2064_v39, %v520_v53 }
0x1315   :  { %v522_v55 = vsel %vm19_vm0, %v521_v54, 0.0 }
0x1316   :  { %v523_v56 = vrot.slane %v522_v55, 4 }
0x1318   :  { %v524_v57 = vadd.f32 %v523_v56, %v522_v55 }
0x131a   :  { %v525_v58 = vrot.slane %v524_v57, 2 }
0x131c   :  { %v526_v59 = vadd.f32 %v525_v58, %v524_v57 }
0x131e   :  { %v527_v60 = vrot.slane %v526_v59, 1 }
0x1320   :  { %v528_v61 = vadd.f32 %v527_v60, %v526_v59 }
0x1322   :  { %v529_v62 = vmul.f32 %v2049_v33, %v528_v61 }
0x1324   :  { %v530_v63 = vsel %vm19_vm0, %v529_v62, 0.0 }
0x1325   :  { %531 = vadd.xlane.f32.xlu1 %v530_v63 }
0x1398   :  { %v532_v1 = vpop.xlane.xlu1 %531 }
0x1399   :  { %v533_v2 = vadd.f32 %v2056_v9, %v532_v1 }
0x139b   :  { %1623 = vtanh.f32 %v533_v2 }
0x13a1   :  { %v1624_v3 = vpop.eup %1623 }
0x13a2   :  { %v535_v5 = vsel %vm16_vm1, %v1624_v3, %v533_v2 }
0x13a3   :  { %v536_v6 = vmul.f32 %v2064_v39, %v535_v5 }
0x13a5   :  { %v537_v7 = vsel %vm19_vm0, %v536_v6, 0.0 }
0x13a6   :  { %v538_v10 = vrot.slane %v537_v7, 4 }
0x13a8   :  { %v539_v11 = vadd.f32 %v538_v10, %v537_v7 }
0x13aa   :  { %v540_v12 = vrot.slane %v539_v11, 2 }
0x13ac   :  { %v541_v13 = vadd.f32 %v540_v12, %v539_v11 }
0x13ae   :  { %v542_v14 = vrot.slane %v541_v13, 1 }
0x13b0   :  { %v543_v15 = vadd.f32 %v542_v14, %v541_v13 }
0x13b2   :  { %v544_v16 = vmul.f32 %v2049_v33, %v543_v15 }
0x13b4   :  { %v545_v17 = vsel %vm19_vm0, %v544_v16, 0.0 }
0x13b5   :  { %546 = vadd.xlane.f32.xlu2 %v545_v17 }
0x1428   :  { %v547_v18 = vpop.xlane.xlu2 %546 }
0x1429   :  { %v548_v19 = vadd.f32 %v2056_v9, %v547_v18 }
0x142b   :  { %1625 = vtanh.f32 %v548_v19 }
0x1431   :  { %v1626_v20 = vpop.eup %1625 }
0x1432   :  { %v550_v21 = vsel %vm16_vm1, %v1626_v20, %v548_v19 }
0x1433   :  { %v551_v22 = vmul.f32 %v2064_v39, %v550_v21 }
0x1435   :  { %v552_v23 = vsel %vm19_vm0, %v551_v22, 0.0 }
0x1436   :  { %v553_v24 = vrot.slane %v552_v23, 4 }
0x1438   :  { %v554_v25 = vadd.f32 %v553_v24, %v552_v23 }
0x143a   :  { %v555_v26 = vrot.slane %v554_v25, 2 }
0x143c   :  { %v556_v27 = vadd.f32 %v555_v26, %v554_v25 }
0x143e   :  { %v557_v28 = vrot.slane %v556_v27, 1 }
0x1440   :  { %v558_v29 = vadd.f32 %v557_v28, %v556_v27 }
0x1442   :  { %v559_v30 = vmul.f32 %v2049_v33, %v558_v29 }
0x1444   :  { %v560_v31 = vsel %vm19_vm0, %v559_v30, 0.0 }
0x1445   :  { %561 = vadd.xlane.f32.xlu0 %v560_v31 }
0x14b8   :  { %v562_v0 = vpop.xlane.xlu0 %561 }
0x14b9   :  { %v563_v32 = vadd.f32 %v2056_v9, %v562_v0 }
0x14bb   :  { %1627 = vtanh.f32 %v563_v32 }
0x14c1   :  { %v1628_v4 = vpop.eup %1627 }
0x14c2   :  { %v565_v34 = vsel %vm16_vm1, %v1628_v4, %v563_v32 }
0x14c3   :  { %v566_v35 = vmul.f32 %v2064_v39, %v565_v34 }
0x14c5   :  { %v567_v36 = vsel %vm19_vm0, %v566_v35, 0.0 }
0x14c6   :  { %v568_v37 = vrot.slane %v567_v36, 4 }
0x14c8   :  { %v569_v38 = vadd.f32 %v568_v37, %v567_v36 }
0x14ca   :  { %v570_v40 = vrot.slane %v569_v38, 2 }
0x14cc   :  { %v571_v41 = vadd.f32 %v570_v40, %v569_v38 }
0x14ce   :  { %v572_v42 = vrot.slane %v571_v41, 1 }
0x14d0   :  { %v573_v43 = vadd.f32 %v572_v42, %v571_v41 }
0x14d2   :  { %v574_v44 = vmul.f32 %v2049_v33, %v573_v43 }
0x14d4   :  { %v575_v45 = vsel %vm19_vm0, %v574_v44, 0.0 }
0x14d5   :  { %576 = vadd.xlane.f32.xlu1 %v575_v45 }
0x1548   :  { %v577_v46 = vpop.xlane.xlu1 %576 }
0x1549   :  { %v578_v47 = vadd.f32 %v2056_v9, %v577_v46 }
0x154b   :  { %1629 = vtanh.f32 %v578_v47 }
0x1551   :  { %v1630_v48 = vpop.eup %1629 }
0x1552   :  { %v580_v49 = vsel %vm16_vm1, %v1630_v48, %v578_v47 }
0x1553   :  { %v581_v50 = vmul.f32 %v2064_v39, %v580_v49 }
0x1555   :  { %v582_v51 = vsel %vm19_vm0, %v581_v50, 0.0 }
0x1556   :  { %v583_v52 = vrot.slane %v582_v51, 4 }
0x1558   :  { %v584_v53 = vadd.f32 %v583_v52, %v582_v51 }
0x155a   :  { %v585_v54 = vrot.slane %v584_v53, 2 }
0x155c   :  { %v586_v55 = vadd.f32 %v585_v54, %v584_v53 }
0x155e   :  { %v587_v56 = vrot.slane %v586_v55, 1 }
0x1560   :  { %v588_v57 = vadd.f32 %v587_v56, %v586_v55 }
0x1562   :  { %v589_v58 = vmul.f32 %v2049_v33, %v588_v57 }
0x1564   :  { %v590_v59 = vsel %vm19_vm0, %v589_v58, 0.0 }
0x1565   :  { %591 = vadd.xlane.f32.xlu2 %v590_v59 }
0x15d8   :  { %v592_v60 = vpop.xlane.xlu2 %591 }
0x15d9   :  { %v593_v61 = vadd.f32 %v2056_v9, %v592_v60 }
0x15db   :  { %1631 = vtanh.f32 %v593_v61 }
0x15e1   :  { %v1632_v62 = vpop.eup %1631 }
0x15e2   :  { %v595_v63 = vsel %vm16_vm1, %v1632_v62, %v593_v61 }
0x15e3   :  { %v596_v1 = vmul.f32 %v2064_v39, %v595_v63 }
0x15e5   :  { %v597_v2 = vsel %vm19_vm0, %v596_v1, 0.0 }
0x15e6   :  { %v598_v3 = vrot.slane %v597_v2, 4 }
0x15e8   :  { %v599_v5 = vadd.f32 %v598_v3, %v597_v2 }
0x15ea   :  { %v600_v6 = vrot.slane %v599_v5, 2 }
0x15ec   :  { %v601_v7 = vadd.f32 %v600_v6, %v599_v5 }
0x15ee   :  { %v602_v10 = vrot.slane %v601_v7, 1 }
0x15f0   :  { %v603_v11 = vadd.f32 %v602_v10, %v601_v7 }
0x15f2   :  { %v604_v12 = vmul.f32 %v2049_v33, %v603_v11 }
0x15f4   :  { %v605_v13 = vsel %vm19_vm0, %v604_v12, 0.0 }
0x15f5   :  { %606 = vadd.xlane.f32.xlu0 %v605_v13 }
0x1668   :  { %v607_v14 = vpop.xlane.xlu0 %606 }
0x1669   :  { %v608_v15 = vadd.f32 %v2056_v9, %v607_v14 }
0x166b   :  { %1633 = vtanh.f32 %v608_v15 }
0x1671   :  { %v1634_v16 = vpop.eup %1633 }
0x1672   :  { %v610_v17 = vsel %vm16_vm1, %v1634_v16, %v608_v15 }
0x1673   :  { %v611_v18 = vmul.f32 %v2064_v39, %v610_v17 }
0x1675   :  { %v612_v19 = vsel %vm19_vm0, %v611_v18, 0.0 }
0x1676   :  { %v613_v20 = vrot.slane %v612_v19, 4 }
0x1678   :  { %v614_v21 = vadd.f32 %v613_v20, %v612_v19 }
0x167a   :  { %v615_v22 = vrot.slane %v614_v21, 2 }
0x167c   :  { %v616_v23 = vadd.f32 %v615_v22, %v614_v21 }
0x167e   :  { %v617_v24 = vrot.slane %v616_v23, 1 }
0x1680   :  { %v618_v25 = vadd.f32 %v617_v24, %v616_v23 }
0x1682   :  { %v619_v26 = vmul.f32 %v2049_v33, %v618_v25 }
0x1684   :  { %v620_v27 = vsel %vm19_vm0, %v619_v26, 0.0 }
0x1685   :  { %621 = vadd.xlane.f32.xlu1 %v620_v27 }
0x16f8   :  { %v622_v28 = vpop.xlane.xlu1 %621 }
0x16f9   :  { %v623_v29 = vadd.f32 %v2056_v9, %v622_v28 }
0x16fb   :  { %1635 = vtanh.f32 %v623_v29 }
0x1701   :  { %v1636_v30 = vpop.eup %1635 }
0x1702   :  { %v625_v31 = vsel %vm16_vm1, %v1636_v30, %v623_v29 }
0x1703   :  { %v626_v0 = vmul.f32 %v2064_v39, %v625_v31 }
0x1705   :  { %v627_v32 = vsel %vm19_vm0, %v626_v0, 0.0 }
0x1706   :  { %v628_v4 = vrot.slane %v627_v32, 4 }
0x1708   :  { %v629_v34 = vadd.f32 %v628_v4, %v627_v32 }
0x170a   :  { %v630_v35 = vrot.slane %v629_v34, 2 }
0x170c   :  { %v631_v36 = vadd.f32 %v630_v35, %v629_v34 }
0x170e   :  { %v632_v37 = vrot.slane %v631_v36, 1 }
0x1710   :  { %v633_v38 = vadd.f32 %v632_v37, %v631_v36 }
0x1712   :  { %v634_v40 = vmul.f32 %v2049_v33, %v633_v38 }
0x1714   :  { %v635_v41 = vsel %vm19_vm0, %v634_v40, 0.0 }
0x1715   :  { %636 = vadd.xlane.f32.xlu2 %v635_v41 }
0x1788   :  { %v637_v42 = vpop.xlane.xlu2 %636 }
0x1789   :  { %v638_v43 = vadd.f32 %v2056_v9, %v637_v42 }
0x178b   :  { %1637 = vtanh.f32 %v638_v43 }
0x1791   :  { %v1638_v44 = vpop.eup %1637 }
0x1792   :  { %v640_v45 = vsel %vm16_vm1, %v1638_v44, %v638_v43 }
0x1793   :  { %v641_v46 = vmul.f32 %v2064_v39, %v640_v45 }
0x1795   :  { %v642_v47 = vsel %vm19_vm0, %v641_v46, 0.0 }
0x1796   :  { %v643_v48 = vrot.slane %v642_v47, 4 }
0x1798   :  { %v644_v49 = vadd.f32 %v643_v48, %v642_v47 }
0x179a   :  { %v645_v50 = vrot.slane %v644_v49, 2 }
0x179c   :  { %v646_v51 = vadd.f32 %v645_v50, %v644_v49 }
0x179e   :  { %v647_v52 = vrot.slane %v646_v51, 1 }
0x17a0   :  { %v648_v53 = vadd.f32 %v647_v52, %v646_v51 }
0x17a2   :  { %v649_v54 = vmul.f32 %v2049_v33, %v648_v53 }
0x17a4   :  { %v650_v55 = vsel %vm19_vm0, %v649_v54, 0.0 }
0x17a5   :  { %651 = vadd.xlane.f32.xlu0 %v650_v55 }
0x1818   :  { %v652_v56 = vpop.xlane.xlu0 %651 }
0x1819   :  { %v653_v57 = vadd.f32 %v2056_v9, %v652_v56 }
0x181b   :  { %1639 = vtanh.f32 %v653_v57 }
0x1821   :  { %v1640_v58 = vpop.eup %1639 }
0x1822   :  { %v655_v59 = vsel %vm16_vm1, %v1640_v58, %v653_v57 }
0x1823   :  { %v656_v60 = vmul.f32 %v2064_v39, %v655_v59 }
0x1825   :  { %v657_v61 = vsel %vm19_vm0, %v656_v60, 0.0 }
0x1826   :  { %v658_v62 = vrot.slane %v657_v61, 4 }
0x1828   :  { %v659_v63 = vadd.f32 %v658_v62, %v657_v61 }
0x182a   :  { %v660_v1 = vrot.slane %v659_v63, 2 }
0x182c   :  { %v661_v2 = vadd.f32 %v660_v1, %v659_v63 }
0x182e   :  { %v662_v3 = vrot.slane %v661_v2, 1 }
0x1830   :  { %v663_v5 = vadd.f32 %v662_v3, %v661_v2 }
0x1832   :  { %v664_v6 = vmul.f32 %v2049_v33, %v663_v5 }
0x1834   :  { %v665_v7 = vsel %vm19_vm0, %v664_v6, 0.0 }
0x1835   :  { %666 = vadd.xlane.f32.xlu1 %v665_v7 }
0x18a8   :  { %v667_v10 = vpop.xlane.xlu1 %666 }
0x18a9   :  { %v668_v11 = vadd.f32 %v2056_v9, %v667_v10 }
0x18ab   :  { %1641 = vtanh.f32 %v668_v11 }
0x18b1   :  { %v1642_v12 = vpop.eup %1641 }
0x18b2   :  { %v670_v13 = vsel %vm16_vm1, %v1642_v12, %v668_v11 }
0x18b3   :  { %v671_v14 = vmul.f32 %v2064_v39, %v670_v13 }
0x18b5   :  { %v672_v15 = vsel %vm19_vm0, %v671_v14, 0.0 }
0x18b6   :  { %v673_v16 = vrot.slane %v672_v15, 4 }
0x18b8   :  { %v674_v17 = vadd.f32 %v673_v16, %v672_v15 }
0x18ba   :  { %v675_v18 = vrot.slane %v674_v17, 2 }
0x18bc   :  { %v676_v19 = vadd.f32 %v675_v18, %v674_v17 }
0x18be   :  { %v677_v20 = vrot.slane %v676_v19, 1 }
0x18c0   :  { %v678_v21 = vadd.f32 %v677_v20, %v676_v19 }
0x18c2   :  { %v679_v22 = vmul.f32 %v2049_v33, %v678_v21 }
0x18c4   :  { %v680_v23 = vsel %vm19_vm0, %v679_v22, 0.0 }
0x18c5   :  { %681 = vadd.xlane.f32.xlu2 %v680_v23 }
0x1938   :  { %v682_v24 = vpop.xlane.xlu2 %681 }
0x1939   :  { %v683_v25 = vadd.f32 %v2056_v9, %v682_v24 }
0x193b   :  { %1643 = vtanh.f32 %v683_v25 }
0x1941   :  { %v1644_v26 = vpop.eup %1643 }
0x1942   :  { %v685_v27 = vsel %vm16_vm1, %v1644_v26, %v683_v25 }
0x1943   :  { %v686_v28 = vmul.f32 %v2064_v39, %v685_v27 }
0x1945   :  { %v687_v29 = vsel %vm19_vm0, %v686_v28, 0.0 }
0x1946   :  { %v688_v30 = vrot.slane %v687_v29, 4 }
0x1948   :  { %v689_v31 = vadd.f32 %v688_v30, %v687_v29 }
0x194a   :  { %v690_v0 = vrot.slane %v689_v31, 2 }
0x194c   :  { %v691_v32 = vadd.f32 %v690_v0, %v689_v31 }
0x194e   :  { %v692_v4 = vrot.slane %v691_v32, 1 }
0x1950   :  { %v693_v34 = vadd.f32 %v692_v4, %v691_v32 }
0x1952   :  { %v694_v35 = vmul.f32 %v2049_v33, %v693_v34 }
0x1954   :  { %v695_v36 = vsel %vm19_vm0, %v694_v35, 0.0 }
0x1955   :  { %696 = vadd.xlane.f32.xlu0 %v695_v36 }
0x19c8   :  { %v697_v37 = vpop.xlane.xlu0 %696 }
0x19c9   :  { %v698_v38 = vadd.f32 %v2056_v9, %v697_v37 }
0x19cb   :  { %1645 = vtanh.f32 %v698_v38 }
0x19d1   :  { %v1646_v40 = vpop.eup %1645 }
0x19d2   :  { %v700_v41 = vsel %vm16_vm1, %v1646_v40, %v698_v38 }
0x19d3   :  { %v701_v42 = vmul.f32 %v2064_v39, %v700_v41 }
0x19d5   :  { %v702_v43 = vsel %vm19_vm0, %v701_v42, 0.0 }
0x19d6   :  { %v703_v44 = vrot.slane %v702_v43, 4 }
0x19d8   :  { %v704_v45 = vadd.f32 %v703_v44, %v702_v43 }
0x19da   :  { %v705_v46 = vrot.slane %v704_v45, 2 }
0x19dc   :  { %v706_v47 = vadd.f32 %v705_v46, %v704_v45 }
0x19de   :  { %v707_v48 = vrot.slane %v706_v47, 1 }
0x19e0   :  { %v708_v49 = vadd.f32 %v707_v48, %v706_v47 }
0x19e2   :  { %v709_v50 = vmul.f32 %v2049_v33, %v708_v49 }
0x19e4   :  { %v710_v51 = vsel %vm19_vm0, %v709_v50, 0.0 }
0x19e5   :  { %711 = vadd.xlane.f32.xlu1 %v710_v51 }
0x1a58   :  { %v712_v52 = vpop.xlane.xlu1 %711 }
0x1a59   :  { %v713_v53 = vadd.f32 %v2056_v9, %v712_v52 }
0x1a5b   :  { %1647 = vtanh.f32 %v713_v53 }
0x1a61   :  { %v1648_v54 = vpop.eup %1647 }
0x1a62   :  { %v715_v55 = vsel %vm16_vm1, %v1648_v54, %v713_v53 }
0x1a63   :  { %v716_v56 = vmul.f32 %v2064_v39, %v715_v55 }
0x1a65   :  { %v717_v57 = vsel %vm19_vm0, %v716_v56, 0.0 }
0x1a66   :  { %v718_v58 = vrot.slane %v717_v57, 4 }
0x1a68   :  { %v719_v59 = vadd.f32 %v718_v58, %v717_v57 }
0x1a6a   :  { %v720_v60 = vrot.slane %v719_v59, 2 }
0x1a6c   :  { %v721_v61 = vadd.f32 %v720_v60, %v719_v59 }
0x1a6e   :  { %v722_v62 = vrot.slane %v721_v61, 1 }
0x1a70   :  { %v723_v63 = vadd.f32 %v722_v62, %v721_v61 }
0x1a72   :  { %v724_v1 = vmul.f32 %v2049_v33, %v723_v63 }
0x1a74   :  { %v725_v2 = vsel %vm19_vm0, %v724_v1, 0.0 }
0x1a75   :  { %726 = vadd.xlane.f32.xlu2 %v725_v2 }
0x1ae8   :  { %v727_v3 = vpop.xlane.xlu2 %726 }
0x1ae9   :  { %v728_v5 = vadd.f32 %v2056_v9, %v727_v3 }
0x1aeb   :  { %1649 = vtanh.f32 %v728_v5 }
0x1af1   :  { %v1650_v6 = vpop.eup %1649 }
0x1af2   :  { %v730_v7 = vsel %vm16_vm1, %v1650_v6, %v728_v5 }
0x1af3   :  { %v731_v10 = vmul.f32 %v2064_v39, %v730_v7 }
0x1af5   :  { %v732_v11 = vsel %vm19_vm0, %v731_v10, 0.0 }
0x1af6   :  { %v733_v12 = vrot.slane %v732_v11, 4 }
0x1af8   :  { %v734_v13 = vadd.f32 %v733_v12, %v732_v11 }
0x1afa   :  { %v735_v14 = vrot.slane %v734_v13, 2 }
0x1afc   :  { %v736_v15 = vadd.f32 %v735_v14, %v734_v13 }
0x1afe   :  { %v737_v16 = vrot.slane %v736_v15, 1 }
0x1b00   :  { %v738_v17 = vadd.f32 %v737_v16, %v736_v15 }
0x1b02   :  { %v739_v18 = vmul.f32 %v2049_v33, %v738_v17 }
0x1b04   :  { %v740_v19 = vsel %vm19_vm0, %v739_v18, 0.0 }
0x1b05   :  { %741 = vadd.xlane.f32.xlu0 %v740_v19 }
0x1b78   :  { %v742_v20 = vpop.xlane.xlu0 %741 }
0x1b79   :  { %v743_v21 = vadd.f32 %v2056_v9, %v742_v20 }
0x1b7b   :  { %1651 = vtanh.f32 %v743_v21 }
0x1b81   :  { %v1652_v22 = vpop.eup %1651 }
0x1b82   :  { %v745_v23 = vsel %vm16_vm1, %v1652_v22, %v743_v21 }
0x1b83   :  { %v746_v24 = vmul.f32 %v2064_v39, %v745_v23 }
0x1b85   :  { %v747_v25 = vsel %vm19_vm0, %v746_v24, 0.0 }
0x1b86   :  { %v748_v26 = vrot.slane %v747_v25, 4 }
0x1b88   :  { %v749_v27 = vadd.f32 %v748_v26, %v747_v25 }
0x1b8a   :  { %v750_v28 = vrot.slane %v749_v27, 2 }
0x1b8c   :  { %v751_v29 = vadd.f32 %v750_v28, %v749_v27 }
0x1b8e   :  { %v752_v30 = vrot.slane %v751_v29, 1 }
0x1b90   :  { %v753_v31 = vadd.f32 %v752_v30, %v751_v29 }
0x1b92   :  { %v754_v0 = vmul.f32 %v2049_v33, %v753_v31 }
0x1b94   :  { %v755_v32 = vsel %vm19_vm0, %v754_v0, 0.0 }
0x1b95   :  { %756 = vadd.xlane.f32.xlu1 %v755_v32 }
0x1c08   :  { %v757_v4 = vpop.xlane.xlu1 %756 }
0x1c09   :  { %v758_v34 = vadd.f32 %v2056_v9, %v757_v4 }
0x1c0b   :  { %1653 = vtanh.f32 %v758_v34 }
0x1c11   :  { %v1654_v35 = vpop.eup %1653 }
0x1c12   :  { %v760_v36 = vsel %vm16_vm1, %v1654_v35, %v758_v34 }
0x1c13   :  { %v761_v37 = vmul.f32 %v2064_v39, %v760_v36 }
0x1c15   :  { %v762_v38 = vsel %vm19_vm0, %v761_v37, 0.0 }
0x1c16   :  { %v763_v40 = vrot.slane %v762_v38, 4 }
0x1c18   :  { %v764_v41 = vadd.f32 %v763_v40, %v762_v38 }
0x1c1a   :  { %v765_v42 = vrot.slane %v764_v41, 2 }
0x1c1c   :  { %v766_v43 = vadd.f32 %v765_v42, %v764_v41 }
0x1c1e   :  { %v767_v44 = vrot.slane %v766_v43, 1 }
0x1c20   :  { %v768_v45 = vadd.f32 %v767_v44, %v766_v43 }
0x1c22   :  { %v769_v46 = vmul.f32 %v2049_v33, %v768_v45 }
0x1c24   :  { %v770_v47 = vsel %vm19_vm0, %v769_v46, 0.0 }
0x1c25   :  { %771 = vadd.xlane.f32.xlu2 %v770_v47 }
0x1c98   :  { %v772_v48 = vpop.xlane.xlu2 %771 }
0x1c99   :  { %v773_v49 = vadd.f32 %v2056_v9, %v772_v48 }
0x1c9b   :  { %1655 = vtanh.f32 %v773_v49 }
0x1ca1   :  { %v1656_v50 = vpop.eup %1655 }
0x1ca2   :  { %v775_v51 = vsel %vm16_vm1, %v1656_v50, %v773_v49 }
0x1ca3   :  { %v776_v52 = vmul.f32 %v2064_v39, %v775_v51 }
0x1ca5   :  { %v777_v53 = vsel %vm19_vm0, %v776_v52, 0.0 }
0x1ca6   :  { %v778_v54 = vrot.slane %v777_v53, 4 }
0x1ca8   :  { %v779_v55 = vadd.f32 %v778_v54, %v777_v53 }
0x1caa   :  { %v780_v56 = vrot.slane %v779_v55, 2 }
0x1cac   :  { %v781_v57 = vadd.f32 %v780_v56, %v779_v55 }
0x1cae   :  { %v782_v58 = vrot.slane %v781_v57, 1 }
0x1cb0   :  { %v783_v59 = vadd.f32 %v782_v58, %v781_v57 }
0x1cb2   :  { %v784_v60 = vmul.f32 %v2049_v33, %v783_v59 }
0x1cb4   :  { %v785_v61 = vsel %vm19_vm0, %v784_v60, 0.0 }
0x1cb5   :  { %786 = vadd.xlane.f32.xlu0 %v785_v61 }
0x1d28   :  { %v787_v62 = vpop.xlane.xlu0 %786 }
0x1d29   :  { %v788_v63 = vadd.f32 %v2056_v9, %v787_v62 }
0x1d2b   :  { %1657 = vtanh.f32 %v788_v63 }
0x1d31   :  { %v1658_v1 = vpop.eup %1657 }
0x1d32   :  { %v790_v2 = vsel %vm16_vm1, %v1658_v1, %v788_v63 }
0x1d33   :  { %v791_v3 = vmul.f32 %v2064_v39, %v790_v2 }
0x1d35   :  { %v792_v5 = vsel %vm19_vm0, %v791_v3, 0.0 }
0x1d36   :  { %v793_v6 = vrot.slane %v792_v5, 4 }
0x1d38   :  { %v794_v7 = vadd.f32 %v793_v6, %v792_v5 }
0x1d3a   :  { %v795_v10 = vrot.slane %v794_v7, 2 }
0x1d3c   :  { %v796_v11 = vadd.f32 %v795_v10, %v794_v7 }
0x1d3e   :  { %v797_v12 = vrot.slane %v796_v11, 1 }
0x1d40   :  { %v798_v13 = vadd.f32 %v797_v12, %v796_v11 }
0x1d42   :  { %v799_v14 = vmul.f32 %v2049_v33, %v798_v13 }
0x1d44   :  { %v800_v15 = vsel %vm19_vm0, %v799_v14, 0.0 }
0x1d45   :  { %801 = vadd.xlane.f32.xlu1 %v800_v15 }
0x1db8   :  { %v802_v16 = vpop.xlane.xlu1 %801 }
0x1db9   :  { %v803_v17 = vadd.f32 %v2056_v9, %v802_v16 }
0x1dbb   :  { %1659 = vtanh.f32 %v803_v17 }
0x1dc1   :  { %v1660_v18 = vpop.eup %1659 }
0x1dc2   :  { %v805_v19 = vsel %vm16_vm1, %v1660_v18, %v803_v17 }
0x1dc3   :  { %v806_v20 = vmul.f32 %v2064_v39, %v805_v19 }
0x1dc5   :  { %v807_v21 = vsel %vm19_vm0, %v806_v20, 0.0 }
0x1dc6   :  { %v808_v22 = vrot.slane %v807_v21, 4 }
0x1dc8   :  { %v809_v23 = vadd.f32 %v808_v22, %v807_v21 }
0x1dca   :  { %v810_v24 = vrot.slane %v809_v23, 2 }
0x1dcc   :  { %v811_v25 = vadd.f32 %v810_v24, %v809_v23 }
0x1dce   :  { %v812_v26 = vrot.slane %v811_v25, 1 }
0x1dd0   :  { %v813_v27 = vadd.f32 %v812_v26, %v811_v25 }
0x1dd2   :  { %v814_v28 = vmul.f32 %v2049_v33, %v813_v27 }
0x1dd4   :  { %v815_v29 = vsel %vm19_vm0, %v814_v28, 0.0 }
0x1dd5   :  { %816 = vadd.xlane.f32.xlu2 %v815_v29 }
0x1e48   :  { %v817_v30 = vpop.xlane.xlu2 %816 }
0x1e49   :  { %v818_v31 = vadd.f32 %v2056_v9, %v817_v30 }
0x1e4b   :  { %1661 = vtanh.f32 %v818_v31 }
0x1e51   :  { %v1662_v0 = vpop.eup %1661 }
0x1e52   :  { %v820_v32 = vsel %vm16_vm1, %v1662_v0, %v818_v31 }
0x1e53   :  { %v821_v4 = vmul.f32 %v2064_v39, %v820_v32 }
0x1e55   :  { %v822_v34 = vsel %vm19_vm0, %v821_v4, 0.0 }
0x1e56   :  { %v823_v35 = vrot.slane %v822_v34, 4 }
0x1e58   :  { %v824_v36 = vadd.f32 %v823_v35, %v822_v34 }
0x1e5a   :  { %v825_v37 = vrot.slane %v824_v36, 2 }
0x1e5c   :  { %v826_v38 = vadd.f32 %v825_v37, %v824_v36 }
0x1e5e   :  { %v827_v40 = vrot.slane %v826_v38, 1 }
0x1e60   :  { %v828_v41 = vadd.f32 %v827_v40, %v826_v38 }
0x1e62   :  { %v829_v42 = vmul.f32 %v2049_v33, %v828_v41 }
0x1e64   :  { %v830_v43 = vsel %vm19_vm0, %v829_v42, 0.0 }
0x1e65   :  { %831 = vadd.xlane.f32.xlu0 %v830_v43 }
0x1ed8   :  { %v832_v44 = vpop.xlane.xlu0 %831 }
0x1ed9   :  { %v833_v45 = vadd.f32 %v2056_v9, %v832_v44 }
0x1edb   :  { %1663 = vtanh.f32 %v833_v45 }
0x1ee1   :  { %v1664_v46 = vpop.eup %1663 }
0x1ee2   :  { %v835_v47 = vsel %vm16_vm1, %v1664_v46, %v833_v45 }
0x1ee3   :  { %v836_v48 = vmul.f32 %v2064_v39, %v835_v47 }
0x1ee5   :  { %v837_v49 = vsel %vm19_vm0, %v836_v48, 0.0 }
0x1ee6   :  { %v838_v50 = vrot.slane %v837_v49, 4 }
0x1ee8   :  { %v839_v51 = vadd.f32 %v838_v50, %v837_v49 }
0x1eea   :  { %v840_v52 = vrot.slane %v839_v51, 2 }
0x1eec   :  { %v841_v53 = vadd.f32 %v840_v52, %v839_v51 }
0x1eee   :  { %v842_v54 = vrot.slane %v841_v53, 1 }
0x1ef0   :  { %v843_v55 = vadd.f32 %v842_v54, %v841_v53 }
0x1ef2   :  { %v844_v56 = vmul.f32 %v2049_v33, %v843_v55 }
0x1ef4   :  { %v845_v57 = vsel %vm19_vm0, %v844_v56, 0.0 }
0x1ef5   :  { %846 = vadd.xlane.f32.xlu1 %v845_v57 }
0x1f68   :  { %v847_v58 = vpop.xlane.xlu1 %846 }
0x1f69   :  { %v848_v59 = vadd.f32 %v2056_v9, %v847_v58 }
0x1f6b   :  { %1665 = vtanh.f32 %v848_v59 }
0x1f71   :  { %v1666_v60 = vpop.eup %1665 }
0x1f72   :  { %v850_v61 = vsel %vm16_vm1, %v1666_v60, %v848_v59 }
0x1f73   :  { %v851_v62 = vmul.f32 %v2064_v39, %v850_v61 }
0x1f75   :  { %v852_v63 = vsel %vm19_vm0, %v851_v62, 0.0 }
0x1f76   :  { %v853_v1 = vrot.slane %v852_v63, 4 }
0x1f78   :  { %v854_v2 = vadd.f32 %v853_v1, %v852_v63 }
0x1f7a   :  { %v855_v3 = vrot.slane %v854_v2, 2 }
0x1f7c   :  { %v856_v5 = vadd.f32 %v855_v3, %v854_v2 }
0x1f7e   :  { %v857_v6 = vrot.slane %v856_v5, 1 }
0x1f80   :  { %v858_v7 = vadd.f32 %v857_v6, %v856_v5 }
0x1f82   :  { %v859_v10 = vmul.f32 %v2049_v33, %v858_v7 }
0x1f84   :  { %v860_v11 = vsel %vm19_vm0, %v859_v10, 0.0 }
0x1f85   :  { %861 = vadd.xlane.f32.xlu2 %v860_v11 }
0x1ff8   :  { %v862_v12 = vpop.xlane.xlu2 %861 }
0x1ff9   :  { %v863_v13 = vadd.f32 %v2056_v9, %v862_v12 }
0x1ffb   :  { %1667 = vtanh.f32 %v863_v13 }
0x2001   :  { %v1668_v14 = vpop.eup %1667 }
0x2002   :  { %v865_v15 = vsel %vm16_vm1, %v1668_v14, %v863_v13 }
0x2003   :  { %v866_v16 = vmul.f32 %v2064_v39, %v865_v15 }
0x2005   :  { %v867_v17 = vsel %vm19_vm0, %v866_v16, 0.0 }
0x2006   :  { %v868_v18 = vrot.slane %v867_v17, 4 }
0x2008   :  { %v869_v19 = vadd.f32 %v868_v18, %v867_v17 }
0x200a   :  { %v870_v20 = vrot.slane %v869_v19, 2 }
0x200c   :  { %v871_v21 = vadd.f32 %v870_v20, %v869_v19 }
0x200e   :  { %v872_v22 = vrot.slane %v871_v21, 1 }
0x2010   :  { %v873_v23 = vadd.f32 %v872_v22, %v871_v21 }
0x2012   :  { %v874_v24 = vmul.f32 %v2049_v33, %v873_v23 }
0x2014   :  { %v875_v25 = vsel %vm19_vm0, %v874_v24, 0.0 }
0x2015   :  { %876 = vadd.xlane.f32.xlu0 %v875_v25 }
0x2088   :  { %v877_v26 = vpop.xlane.xlu0 %876 }
0x2089   :  { %v878_v27 = vadd.f32 %v2056_v9, %v877_v26 }
0x208b   :  { %1669 = vtanh.f32 %v878_v27 }
0x2091   :  { %v1670_v28 = vpop.eup %1669 }
0x2092   :  { %v880_v29 = vsel %vm16_vm1, %v1670_v28, %v878_v27 }
0x2093   :  { %v881_v30 = vmul.f32 %v2064_v39, %v880_v29 }
0x2095   :  { %v882_v31 = vsel %vm19_vm0, %v881_v30, 0.0 }
0x2096   :  { %v883_v0 = vrot.slane %v882_v31, 4 }
0x2098   :  { %v884_v32 = vadd.f32 %v883_v0, %v882_v31 }
0x209a   :  { %v885_v4 = vrot.slane %v884_v32, 2 }
0x209c   :  { %v886_v34 = vadd.f32 %v885_v4, %v884_v32 }
0x209e   :  { %v887_v35 = vrot.slane %v886_v34, 1 }
0x20a0   :  { %v888_v36 = vadd.f32 %v887_v35, %v886_v34 }
0x20a2   :  { %v889_v37 = vmul.f32 %v2049_v33, %v888_v36 }
0x20a4   :  { %v890_v38 = vsel %vm19_vm0, %v889_v37, 0.0 }
0x20a5   :  { %891 = vadd.xlane.f32.xlu1 %v890_v38 }
0x2118   :  { %v892_v40 = vpop.xlane.xlu1 %891 }
0x2119   :  { %v893_v41 = vadd.f32 %v2056_v9, %v892_v40 }
0x211b   :  { %1671 = vtanh.f32 %v893_v41 }
0x2121   :  { %v1672_v42 = vpop.eup %1671 }
0x2122   :  { %v895_v43 = vsel %vm16_vm1, %v1672_v42, %v893_v41 }
0x2123   :  { %v896_v44 = vmul.f32 %v2064_v39, %v895_v43 }
0x2125   :  { %v897_v45 = vsel %vm19_vm0, %v896_v44, 0.0 }
0x2126   :  { %v898_v46 = vrot.slane %v897_v45, 4 }
0x2128   :  { %v899_v47 = vadd.f32 %v898_v46, %v897_v45 }
0x212a   :  { %v900_v48 = vrot.slane %v899_v47, 2 }
0x212c   :  { %v901_v49 = vadd.f32 %v900_v48, %v899_v47 }
0x212e   :  { %v902_v50 = vrot.slane %v901_v49, 1 }
0x2130   :  { %v903_v51 = vadd.f32 %v902_v50, %v901_v49 }
0x2132   :  { %v904_v52 = vmul.f32 %v2049_v33, %v903_v51 }
0x2134   :  { %v905_v53 = vsel %vm19_vm0, %v904_v52, 0.0 }
0x2135   :  { %906 = vadd.xlane.f32.xlu2 %v905_v53 }
0x21a8   :  { %v907_v54 = vpop.xlane.xlu2 %906 }
0x21a9   :  { %v908_v55 = vadd.f32 %v2056_v9, %v907_v54 }
0x21ab   :  { %1673 = vtanh.f32 %v908_v55 }
0x21b1   :  { %v1674_v56 = vpop.eup %1673 }
0x21b2   :  { %v910_v57 = vsel %vm16_vm1, %v1674_v56, %v908_v55 }
0x21b3   :  { %v911_v58 = vmul.f32 %v2064_v39, %v910_v57 }
0x21b5   :  { %v912_v59 = vsel %vm19_vm0, %v911_v58, 0.0 }
0x21b6   :  { %v913_v60 = vrot.slane %v912_v59, 4 }
0x21b8   :  { %v914_v61 = vadd.f32 %v913_v60, %v912_v59 }
0x21ba   :  { %v915_v62 = vrot.slane %v914_v61, 2 }
0x21bc   :  { %v916_v63 = vadd.f32 %v915_v62, %v914_v61  ;;  %v2288_v61 = vld [vmem:[%s2555_s0] sm:$0xff] }
0x21be   :  { %v917_v1 = vrot.slane %v916_v63, 1 }
0x21c0   :  { %v918_v2 = vadd.f32 %v917_v1, %v916_v63 }
0x21c2   :  { %v919_v3 = vmul.f32 %v2049_v33, %v918_v2 }
0x21c4   :  { %v920_v5 = vsel %vm19_vm0, %v919_v3, 0.0 }
0x21c5   :  { %921 = vadd.xlane.f32.xlu0 %v920_v5  ;;  %v2303_v5 = vld [vmem:[%s2555_s0 + $0x8] sm:$0xff] }
0x2238   :  { %v922_v6 = vpop.xlane.xlu0 %921 }
0x2239   :  { %v923_v7 = vadd.f32 %v2056_v9, %v922_v6 }
0x223b   :  { %1675 = vtanh.f32 %v923_v7 }
0x2241   :  { %v1676_v10 = vpop.eup %1675 }
0x2242   :  { %v925_v11 = vsel %vm16_vm1, %v1676_v10, %v923_v7 }
0x2243   :  { %v926_v12 = vmul.f32 %v2064_v39, %v925_v11 }
0x2245   :  { %v927_v13 = vsel %vm19_vm0, %v926_v12, 0.0 }
0x2246   :  { %v928_v14 = vrot.slane %v927_v13, 4 }
0x2248   :  { %v929_v15 = vadd.f32 %v928_v14, %v927_v13 }
0x224a   :  { %v930_v16 = vrot.slane %v929_v15, 2 }
0x224c   :  { %v931_v17 = vadd.f32 %v930_v16, %v929_v15 }
0x224e   :  { %v932_v18 = vrot.slane %v931_v17, 1 }
0x2250   :  { %v933_v19 = vadd.f32 %v932_v18, %v931_v17 }
0x2252   :  { %v934_v20 = vmul.f32 %v2049_v33, %v933_v19 }
0x2254   :  { %v935_v21 = vsel %vm19_vm0, %v934_v20, 0.0 }
0x2255   :  { %936 = vadd.xlane.f32.xlu1 %v935_v21 }
0x22c8   :  { %v937_v22 = vpop.xlane.xlu1 %936 }
0x22c9   :  { %v938_v23 = vadd.f32 %v2056_v9, %v937_v22 }
0x22cb   :  { %1677 = vtanh.f32 %v938_v23 }
0x22d1   :  { %v1678_v24 = vpop.eup %1677 }
0x22d2   :  { %v940_v25 = vsel %vm16_vm1, %v1678_v24, %v938_v23 }
0x22d3   :  { %v941_v26 = vmul.f32 %v2064_v39, %v940_v25 }
0x22d5   :  { %v942_v27 = vsel %vm19_vm0, %v941_v26, 0.0 }
0x22d6   :  { %v943_v28 = vrot.slane %v942_v27, 4 }
0x22d8   :  { %v944_v29 = vadd.f32 %v943_v28, %v942_v27 }
0x22da   :  { %v945_v30 = vrot.slane %v944_v29, 2 }
0x22dc   :  { %v946_v31 = vadd.f32 %v945_v30, %v944_v29 }
0x22de   :  { %v947_v0 = vrot.slane %v946_v31, 1 }
0x22e0   :  { %v948_v32 = vadd.f32 %v947_v0, %v946_v31 }
0x22e2   :  { %v949_v4 = vmul.f32 %v2049_v33, %v948_v32 }
0x22e4   :  { %v950_v34 = vsel %vm19_vm0, %v949_v4, 0.0 }
0x22e5   :  { %951 = vadd.xlane.f32.xlu2 %v950_v34 }
0x2358   :  { %v952_v35 = vpop.xlane.xlu2 %951 }
0x2359   :  { %v953_v36 = vadd.f32 %v2056_v9, %v952_v35 }
0x235b   :  { %1679 = vtanh.f32 %v953_v36 }
0x2361   :  { %v1680_v37 = vpop.eup %1679 }
0x2362   :  { %v955_v38 = vsel %vm16_vm1, %v1680_v37, %v953_v36 }
0x2363   :  { %v956_v40 = vmul.f32 %v2064_v39, %v955_v38 }
0x2365   :  { %v957_v41 = vsel %vm19_vm0, %v956_v40, 0.0 }
0x2366   :  { %v958_v42 = vrot.slane %v957_v41, 4 }
0x2368   :  { %v959_v43 = vadd.f32 %v958_v42, %v957_v41 }
0x236a   :  { %v960_v44 = vrot.slane %v959_v43, 2 }
0x236c   :  { %v961_v45 = vadd.f32 %v960_v44, %v959_v43 }
0x236e   :  { %v962_v46 = vrot.slane %v961_v45, 1 }
0x2370   :  { %v963_v47 = vadd.f32 %v962_v46, %v961_v45 }
0x2372   :  { %v964_v48 = vmul.f32 %v2049_v33, %v963_v47 }
0x2374   :  { %v965_v49 = vsel %vm19_vm0, %v964_v48, 0.0 }
0x2375   :  { %966 = vadd.xlane.f32.xlu0 %v965_v49 }
0x23e8   :  { %v967_v50 = vpop.xlane.xlu0 %966 }
0x23e9   :  { %v968_v51 = vadd.f32 %v2056_v9, %v967_v50 }
0x23eb   :  { %1681 = vtanh.f32 %v968_v51 }
0x23f1   :  { %v1682_v52 = vpop.eup %1681 }
0x23f2   :  { %v970_v53 = vsel %vm16_vm1, %v1682_v52, %v968_v51 }
0x23f3   :  { %v971_v54 = vmul.f32 %v2064_v39, %v970_v53  ;;  %v2295_v39 = vld [vmem:[%s2555_s0 + $0x10] sm:$0xff] }
0x23f5   :  { %v972_v55 = vsel %vm19_vm0, %v971_v54, 0.0 }
0x23f6   :  { %v973_v56 = vrot.slane %v972_v55, 4 }
0x23f8   :  { %v974_v57 = vadd.f32 %v973_v56, %v972_v55 }
0x23fa   :  { %v975_v58 = vrot.slane %v974_v57, 2 }
0x23fc   :  { %v976_v59 = vadd.f32 %v975_v58, %v974_v57 }
0x23fe   :  { %v977_v33 = vrot.slane %v976_v59, 1 }
0x2400   :  { %v978_v60 = vadd.f32 %v977_v33, %v976_v59 }
0x2402   :  { %v979_v9 = vmul.f32 %v2288_v61, %v978_v60 }
0x2404   :  { %v980_v62 = vsel %vm19_vm0, %v979_v9, 0.0 }
0x2405   :  { %981 = vadd.xlane.f32.xlu1 %v980_v62 }
0x2478   :  { %v982_v63 = vpop.xlane.xlu1 %981 }
0x2479   :  { %v983_v1 = vadd.f32 %v2295_v39, %v982_v63 }
0x247b   :  { %1683 = vtanh.f32 %v983_v1 }
0x2481   :  { %v1684_v2 = vpop.eup %1683 }
0x2482   :  { %v985_v3 = vsel %vm16_vm1, %v1684_v2, %v983_v1 }
0x2483   :  { %v986_v6 = vmul.f32 %v2303_v5, %v985_v3 }
0x2485   :  { %v987_v7 = vsel %vm19_vm0, %v986_v6, 0.0 }
0x2486   :  { %v988_v10 = vrot.slane %v987_v7, 4 }
0x2488   :  { %v989_v11 = vadd.f32 %v988_v10, %v987_v7 }
0x248a   :  { %v990_v12 = vrot.slane %v989_v11, 2 }
0x248c   :  { %v991_v13 = vadd.f32 %v990_v12, %v989_v11 }
0x248e   :  { %v992_v14 = vrot.slane %v991_v13, 1 }
0x2490   :  { %v993_v15 = vadd.f32 %v992_v14, %v991_v13 }
0x2492   :  { %v994_v16 = vmul.f32 %v2288_v61, %v993_v15 }
0x2494   :  { %v995_v17 = vsel %vm19_vm0, %v994_v16, 0.0 }
0x2495   :  { %996 = vadd.xlane.f32.xlu2 %v995_v17 }
0x2508   :  { %v997_v18 = vpop.xlane.xlu2 %996 }
0x2509   :  { %v998_v19 = vadd.f32 %v2295_v39, %v997_v18 }
0x250b   :  { %1685 = vtanh.f32 %v998_v19 }
0x2511   :  { %v1686_v20 = vpop.eup %1685 }
0x2512   :  { %v1000_v21 = vsel %vm16_vm1, %v1686_v20, %v998_v19 }
0x2513   :  { %v1001_v22 = vmul.f32 %v2303_v5, %v1000_v21 }
0x2515   :  { %v1002_v23 = vsel %vm19_vm0, %v1001_v22, 0.0 }
0x2516   :  { %v1003_v24 = vrot.slane %v1002_v23, 4 }
0x2518   :  { %v1004_v25 = vadd.f32 %v1003_v24, %v1002_v23 }
0x251a   :  { %v1005_v26 = vrot.slane %v1004_v25, 2 }
0x251c   :  { %v1006_v27 = vadd.f32 %v1005_v26, %v1004_v25 }
0x251e   :  { %v1007_v28 = vrot.slane %v1006_v27, 1 }
0x2520   :  { %v1008_v29 = vadd.f32 %v1007_v28, %v1006_v27 }
0x2522   :  { %v1009_v30 = vmul.f32 %v2288_v61, %v1008_v29 }
0x2524   :  { %v1010_v31 = vsel %vm19_vm0, %v1009_v30, 0.0 }
0x2525   :  { %1011 = vadd.xlane.f32.xlu0 %v1010_v31 }
0x2598   :  { %v1012_v0 = vpop.xlane.xlu0 %1011 }
0x2599   :  { %v1013_v32 = vadd.f32 %v2295_v39, %v1012_v0 }
0x259b   :  { %1687 = vtanh.f32 %v1013_v32 }
0x25a1   :  { %v1688_v4 = vpop.eup %1687 }
0x25a2   :  { %v1015_v34 = vsel %vm16_vm1, %v1688_v4, %v1013_v32 }
0x25a3   :  { %v1016_v35 = vmul.f32 %v2303_v5, %v1015_v34 }
0x25a5   :  { %v1017_v36 = vsel %vm19_vm0, %v1016_v35, 0.0 }
0x25a6   :  { %v1018_v37 = vrot.slane %v1017_v36, 4 }
0x25a8   :  { %v1019_v38 = vadd.f32 %v1018_v37, %v1017_v36 }
0x25aa   :  { %v1020_v40 = vrot.slane %v1019_v38, 2 }
0x25ac   :  { %v1021_v41 = vadd.f32 %v1020_v40, %v1019_v38 }
0x25ae   :  { %v1022_v42 = vrot.slane %v1021_v41, 1 }
0x25b0   :  { %v1023_v43 = vadd.f32 %v1022_v42, %v1021_v41 }
0x25b2   :  { %v1024_v44 = vmul.f32 %v2288_v61, %v1023_v43 }
0x25b4   :  { %v1025_v45 = vsel %vm19_vm0, %v1024_v44, 0.0 }
0x25b5   :  { %1026 = vadd.xlane.f32.xlu1 %v1025_v45 }
0x2628   :  { %v1027_v46 = vpop.xlane.xlu1 %1026 }
0x2629   :  { %v1028_v47 = vadd.f32 %v2295_v39, %v1027_v46 }
0x262b   :  { %1689 = vtanh.f32 %v1028_v47 }
0x2631   :  { %v1690_v48 = vpop.eup %1689 }
0x2632   :  { %v1030_v49 = vsel %vm16_vm1, %v1690_v48, %v1028_v47 }
0x2633   :  { %v1031_v50 = vmul.f32 %v2303_v5, %v1030_v49 }
0x2635   :  { %v1032_v51 = vsel %vm19_vm0, %v1031_v50, 0.0 }
0x2636   :  { %v1033_v52 = vrot.slane %v1032_v51, 4 }
0x2638   :  { %v1034_v53 = vadd.f32 %v1033_v52, %v1032_v51 }
0x263a   :  { %v1035_v54 = vrot.slane %v1034_v53, 2 }
0x263c   :  { %v1036_v55 = vadd.f32 %v1035_v54, %v1034_v53 }
0x263e   :  { %v1037_v56 = vrot.slane %v1036_v55, 1 }
0x2640   :  { %v1038_v57 = vadd.f32 %v1037_v56, %v1036_v55 }
0x2642   :  { %v1039_v58 = vmul.f32 %v2288_v61, %v1038_v57 }
0x2644   :  { %v1040_v59 = vsel %vm19_vm0, %v1039_v58, 0.0 }
0x2645   :  { %1041 = vadd.xlane.f32.xlu2 %v1040_v59 }
0x26b8   :  { %v1042_v33 = vpop.xlane.xlu2 %1041 }
0x26b9   :  { %v1043_v60 = vadd.f32 %v2295_v39, %v1042_v33 }
0x26bb   :  { %1691 = vtanh.f32 %v1043_v60 }
0x26c1   :  { %v1692_v9 = vpop.eup %1691 }
0x26c2   :  { %v1045_v62 = vsel %vm16_vm1, %v1692_v9, %v1043_v60 }
0x26c3   :  { %v1046_v63 = vmul.f32 %v2303_v5, %v1045_v62 }
0x26c5   :  { %v1047_v1 = vsel %vm19_vm0, %v1046_v63, 0.0 }
0x26c6   :  { %v1048_v2 = vrot.slane %v1047_v1, 4 }
0x26c8   :  { %v1049_v3 = vadd.f32 %v1048_v2, %v1047_v1 }
0x26ca   :  { %v1050_v6 = vrot.slane %v1049_v3, 2 }
0x26cc   :  { %v1051_v7 = vadd.f32 %v1050_v6, %v1049_v3 }
0x26ce   :  { %v1052_v10 = vrot.slane %v1051_v7, 1 }
0x26d0   :  { %v1053_v11 = vadd.f32 %v1052_v10, %v1051_v7 }
0x26d2   :  { %v1054_v12 = vmul.f32 %v2288_v61, %v1053_v11 }
0x26d4   :  { %v1055_v13 = vsel %vm19_vm0, %v1054_v12, 0.0 }
0x26d5   :  { %1056 = vadd.xlane.f32.xlu0 %v1055_v13 }
0x2748   :  { %v1057_v14 = vpop.xlane.xlu0 %1056 }
0x2749   :  { %v1058_v15 = vadd.f32 %v2295_v39, %v1057_v14 }
0x274b   :  { %1693 = vtanh.f32 %v1058_v15 }
0x2751   :  { %v1694_v16 = vpop.eup %1693 }
0x2752   :  { %v1060_v17 = vsel %vm16_vm1, %v1694_v16, %v1058_v15 }
0x2753   :  { %v1061_v18 = vmul.f32 %v2303_v5, %v1060_v17 }
0x2755   :  { %v1062_v19 = vsel %vm19_vm0, %v1061_v18, 0.0 }
0x2756   :  { %v1063_v20 = vrot.slane %v1062_v19, 4 }
0x2758   :  { %v1064_v21 = vadd.f32 %v1063_v20, %v1062_v19 }
0x275a   :  { %v1065_v22 = vrot.slane %v1064_v21, 2 }
0x275c   :  { %v1066_v23 = vadd.f32 %v1065_v22, %v1064_v21 }
0x275e   :  { %v1067_v24 = vrot.slane %v1066_v23, 1 }
0x2760   :  { %v1068_v25 = vadd.f32 %v1067_v24, %v1066_v23 }
0x2762   :  { %v1069_v26 = vmul.f32 %v2288_v61, %v1068_v25 }
0x2764   :  { %v1070_v27 = vsel %vm19_vm0, %v1069_v26, 0.0 }
0x2765   :  { %1071 = vadd.xlane.f32.xlu1 %v1070_v27 }
0x27d8   :  { %v1072_v28 = vpop.xlane.xlu1 %1071 }
0x27d9   :  { %v1073_v29 = vadd.f32 %v2295_v39, %v1072_v28 }
0x27db   :  { %1695 = vtanh.f32 %v1073_v29 }
0x27e1   :  { %v1696_v30 = vpop.eup %1695 }
0x27e2   :  { %v1075_v31 = vsel %vm16_vm1, %v1696_v30, %v1073_v29 }
0x27e3   :  { %v1076_v0 = vmul.f32 %v2303_v5, %v1075_v31 }
0x27e5   :  { %v1077_v32 = vsel %vm19_vm0, %v1076_v0, 0.0 }
0x27e6   :  { %v1078_v4 = vrot.slane %v1077_v32, 4 }
0x27e8   :  { %v1079_v34 = vadd.f32 %v1078_v4, %v1077_v32 }
0x27ea   :  { %v1080_v35 = vrot.slane %v1079_v34, 2 }
0x27ec   :  { %v1081_v36 = vadd.f32 %v1080_v35, %v1079_v34 }
0x27ee   :  { %v1082_v37 = vrot.slane %v1081_v36, 1 }
0x27f0   :  { %v1083_v38 = vadd.f32 %v1082_v37, %v1081_v36 }
0x27f2   :  { %v1084_v40 = vmul.f32 %v2288_v61, %v1083_v38 }
0x27f4   :  { %v1085_v41 = vsel %vm19_vm0, %v1084_v40, 0.0 }
0x27f5   :  { %1086 = vadd.xlane.f32.xlu2 %v1085_v41 }
0x2868   :  { %v1087_v42 = vpop.xlane.xlu2 %1086 }
0x2869   :  { %v1088_v43 = vadd.f32 %v2295_v39, %v1087_v42 }
0x286b   :  { %1697 = vtanh.f32 %v1088_v43 }
0x2871   :  { %v1698_v44 = vpop.eup %1697 }
0x2872   :  { %v1090_v45 = vsel %vm16_vm1, %v1698_v44, %v1088_v43 }
0x2873   :  { %v1091_v46 = vmul.f32 %v2303_v5, %v1090_v45 }
0x2875   :  { %v1092_v47 = vsel %vm19_vm0, %v1091_v46, 0.0 }
0x2876   :  { %v1093_v48 = vrot.slane %v1092_v47, 4 }
0x2878   :  { %v1094_v49 = vadd.f32 %v1093_v48, %v1092_v47 }
0x287a   :  { %v1095_v50 = vrot.slane %v1094_v49, 2 }
0x287c   :  { %v1096_v51 = vadd.f32 %v1095_v50, %v1094_v49 }
0x287e   :  { %v1097_v52 = vrot.slane %v1096_v51, 1 }
0x2880   :  { %v1098_v53 = vadd.f32 %v1097_v52, %v1096_v51 }
0x2882   :  { %v1099_v54 = vmul.f32 %v2288_v61, %v1098_v53 }
0x2884   :  { %v1100_v55 = vsel %vm19_vm0, %v1099_v54, 0.0 }
0x2885   :  { %1101 = vadd.xlane.f32.xlu0 %v1100_v55 }
0x28f8   :  { %v1102_v56 = vpop.xlane.xlu0 %1101 }
0x28f9   :  { %v1103_v57 = vadd.f32 %v2295_v39, %v1102_v56 }
0x28fb   :  { %1699 = vtanh.f32 %v1103_v57 }
0x2901   :  { %v1700_v58 = vpop.eup %1699 }
0x2902   :  { %v1105_v59 = vsel %vm16_vm1, %v1700_v58, %v1103_v57 }
0x2903   :  { %v1106_v33 = vmul.f32 %v2303_v5, %v1105_v59 }
0x2905   :  { %v1107_v60 = vsel %vm19_vm0, %v1106_v33, 0.0 }
0x2906   :  { %v1108_v9 = vrot.slane %v1107_v60, 4 }
0x2908   :  { %v1109_v62 = vadd.f32 %v1108_v9, %v1107_v60 }
0x290a   :  { %v1110_v63 = vrot.slane %v1109_v62, 2 }
0x290c   :  { %v1111_v1 = vadd.f32 %v1110_v63, %v1109_v62 }
0x290e   :  { %v1112_v2 = vrot.slane %v1111_v1, 1 }
0x2910   :  { %v1113_v3 = vadd.f32 %v1112_v2, %v1111_v1 }
0x2912   :  { %v1114_v6 = vmul.f32 %v2288_v61, %v1113_v3 }
0x2914   :  { %v1115_v7 = vsel %vm19_vm0, %v1114_v6, 0.0 }
0x2915   :  { %1116 = vadd.xlane.f32.xlu1 %v1115_v7 }
0x2988   :  { %v1117_v10 = vpop.xlane.xlu1 %1116 }
0x2989   :  { %v1118_v11 = vadd.f32 %v2295_v39, %v1117_v10 }
0x298b   :  { %1701 = vtanh.f32 %v1118_v11 }
0x2991   :  { %v1702_v12 = vpop.eup %1701 }
0x2992   :  { %v1120_v13 = vsel %vm16_vm1, %v1702_v12, %v1118_v11 }
0x2993   :  { %v1121_v14 = vmul.f32 %v2303_v5, %v1120_v13 }
0x2995   :  { %v1122_v15 = vsel %vm19_vm0, %v1121_v14, 0.0 }
0x2996   :  { %v1123_v16 = vrot.slane %v1122_v15, 4 }
0x2998   :  { %v1124_v17 = vadd.f32 %v1123_v16, %v1122_v15 }
0x299a   :  { %v1125_v18 = vrot.slane %v1124_v17, 2 }
0x299c   :  { %v1126_v19 = vadd.f32 %v1125_v18, %v1124_v17 }
0x299e   :  { %v1127_v20 = vrot.slane %v1126_v19, 1 }
0x29a0   :  { %v1128_v21 = vadd.f32 %v1127_v20, %v1126_v19 }
0x29a2   :  { %v1129_v22 = vmul.f32 %v2288_v61, %v1128_v21 }
0x29a4   :  { %v1130_v23 = vsel %vm19_vm0, %v1129_v22, 0.0 }
0x29a5   :  { %1131 = vadd.xlane.f32.xlu2 %v1130_v23 }
0x2a18   :  { %v1132_v24 = vpop.xlane.xlu2 %1131 }
0x2a19   :  { %v1133_v25 = vadd.f32 %v2295_v39, %v1132_v24 }
0x2a1b   :  { %1703 = vtanh.f32 %v1133_v25 }
0x2a21   :  { %v1704_v26 = vpop.eup %1703 }
0x2a22   :  { %v1135_v27 = vsel %vm16_vm1, %v1704_v26, %v1133_v25 }
0x2a23   :  { %v1136_v28 = vmul.f32 %v2303_v5, %v1135_v27 }
0x2a25   :  { %v1137_v29 = vsel %vm19_vm0, %v1136_v28, 0.0 }
0x2a26   :  { %v1138_v30 = vrot.slane %v1137_v29, 4 }
0x2a28   :  { %v1139_v31 = vadd.f32 %v1138_v30, %v1137_v29 }
0x2a2a   :  { %v1140_v0 = vrot.slane %v1139_v31, 2 }
0x2a2c   :  { %v1141_v32 = vadd.f32 %v1140_v0, %v1139_v31 }
0x2a2e   :  { %v1142_v4 = vrot.slane %v1141_v32, 1 }
0x2a30   :  { %v1143_v34 = vadd.f32 %v1142_v4, %v1141_v32 }
0x2a32   :  { %v1144_v35 = vmul.f32 %v2288_v61, %v1143_v34 }
0x2a34   :  { %v1145_v36 = vsel %vm19_vm0, %v1144_v35, 0.0 }
0x2a35   :  { %1146 = vadd.xlane.f32.xlu0 %v1145_v36 }
0x2aa8   :  { %v1147_v37 = vpop.xlane.xlu0 %1146 }
0x2aa9   :  { %v1148_v38 = vadd.f32 %v2295_v39, %v1147_v37 }
0x2aab   :  { %1705 = vtanh.f32 %v1148_v38 }
0x2ab1   :  { %v1706_v40 = vpop.eup %1705 }
0x2ab2   :  { %v1150_v41 = vsel %vm16_vm1, %v1706_v40, %v1148_v38 }
0x2ab3   :  { %v1151_v42 = vmul.f32 %v2303_v5, %v1150_v41 }
0x2ab5   :  { %v1152_v43 = vsel %vm19_vm0, %v1151_v42, 0.0 }
0x2ab6   :  { %v1153_v44 = vrot.slane %v1152_v43, 4 }
0x2ab8   :  { %v1154_v45 = vadd.f32 %v1153_v44, %v1152_v43 }
0x2aba   :  { %v1155_v46 = vrot.slane %v1154_v45, 2 }
0x2abc   :  { %v1156_v47 = vadd.f32 %v1155_v46, %v1154_v45 }
0x2abe   :  { %v1157_v48 = vrot.slane %v1156_v47, 1 }
0x2ac0   :  { %v1158_v49 = vadd.f32 %v1157_v48, %v1156_v47 }
0x2ac2   :  { %v1159_v50 = vmul.f32 %v2288_v61, %v1158_v49 }
0x2ac4   :  { %v1160_v51 = vsel %vm19_vm0, %v1159_v50, 0.0 }
0x2ac5   :  { %1161 = vadd.xlane.f32.xlu1 %v1160_v51 }
0x2b38   :  { %v1162_v52 = vpop.xlane.xlu1 %1161 }
0x2b39   :  { %v1163_v53 = vadd.f32 %v2295_v39, %v1162_v52 }
0x2b3b   :  { %1707 = vtanh.f32 %v1163_v53 }
0x2b41   :  { %v1708_v54 = vpop.eup %1707 }
0x2b42   :  { %v1165_v55 = vsel %vm16_vm1, %v1708_v54, %v1163_v53 }
0x2b43   :  { %v1166_v56 = vmul.f32 %v2303_v5, %v1165_v55 }
0x2b45   :  { %v1167_v57 = vsel %vm19_vm0, %v1166_v56, 0.0 }
0x2b46   :  { %v1168_v58 = vrot.slane %v1167_v57, 4 }
0x2b48   :  { %v1169_v59 = vadd.f32 %v1168_v58, %v1167_v57 }
0x2b4a   :  { %v1170_v33 = vrot.slane %v1169_v59, 2 }
0x2b4c   :  { %v1171_v60 = vadd.f32 %v1170_v33, %v1169_v59 }
0x2b4e   :  { %v1172_v9 = vrot.slane %v1171_v60, 1 }
0x2b50   :  { %v1173_v62 = vadd.f32 %v1172_v9, %v1171_v60 }
0x2b52   :  { %v1174_v63 = vmul.f32 %v2288_v61, %v1173_v62 }
0x2b54   :  { %v1175_v1 = vsel %vm19_vm0, %v1174_v63, 0.0 }
0x2b55   :  { %1176 = vadd.xlane.f32.xlu2 %v1175_v1 }
0x2bc8   :  { %v1177_v2 = vpop.xlane.xlu2 %1176 }
0x2bc9   :  { %v1178_v3 = vadd.f32 %v2295_v39, %v1177_v2 }
0x2bcb   :  { %1709 = vtanh.f32 %v1178_v3 }
0x2bd1   :  { %v1710_v6 = vpop.eup %1709 }
0x2bd2   :  { %v1180_v7 = vsel %vm16_vm1, %v1710_v6, %v1178_v3 }
0x2bd3   :  { %v1181_v10 = vmul.f32 %v2303_v5, %v1180_v7 }
0x2bd5   :  { %v1182_v11 = vsel %vm19_vm0, %v1181_v10, 0.0 }
0x2bd6   :  { %v1183_v12 = vrot.slane %v1182_v11, 4 }
0x2bd8   :  { %v1184_v13 = vadd.f32 %v1183_v12, %v1182_v11 }
0x2bda   :  { %v1185_v14 = vrot.slane %v1184_v13, 2 }
0x2bdc   :  { %v1186_v15 = vadd.f32 %v1185_v14, %v1184_v13 }
0x2bde   :  { %v1187_v16 = vrot.slane %v1186_v15, 1 }
0x2be0   :  { %v1188_v17 = vadd.f32 %v1187_v16, %v1186_v15 }
0x2be2   :  { %v1189_v18 = vmul.f32 %v2288_v61, %v1188_v17 }
0x2be4   :  { %v1190_v19 = vsel %vm19_vm0, %v1189_v18, 0.0 }
0x2be5   :  { %1191 = vadd.xlane.f32.xlu0 %v1190_v19 }
0x2c58   :  { %v1192_v20 = vpop.xlane.xlu0 %1191 }
0x2c59   :  { %v1193_v21 = vadd.f32 %v2295_v39, %v1192_v20 }
0x2c5b   :  { %1711 = vtanh.f32 %v1193_v21 }
0x2c61   :  { %v1712_v22 = vpop.eup %1711 }
0x2c62   :  { %v1195_v23 = vsel %vm16_vm1, %v1712_v22, %v1193_v21 }
0x2c63   :  { %v1196_v24 = vmul.f32 %v2303_v5, %v1195_v23 }
0x2c65   :  { %v1197_v25 = vsel %vm19_vm0, %v1196_v24, 0.0 }
0x2c66   :  { %v1198_v26 = vrot.slane %v1197_v25, 4 }
0x2c68   :  { %v1199_v27 = vadd.f32 %v1198_v26, %v1197_v25 }
0x2c6a   :  { %v1200_v28 = vrot.slane %v1199_v27, 2 }
0x2c6c   :  { %v1201_v29 = vadd.f32 %v1200_v28, %v1199_v27 }
0x2c6e   :  { %v1202_v30 = vrot.slane %v1201_v29, 1 }
0x2c70   :  { %v1203_v31 = vadd.f32 %v1202_v30, %v1201_v29 }
0x2c72   :  { %v1204_v0 = vmul.f32 %v2288_v61, %v1203_v31 }
0x2c74   :  { %v1205_v32 = vsel %vm19_vm0, %v1204_v0, 0.0 }
0x2c75   :  { %1206 = vadd.xlane.f32.xlu1 %v1205_v32 }
0x2ce8   :  { %v1207_v4 = vpop.xlane.xlu1 %1206 }
0x2ce9   :  { %v1208_v34 = vadd.f32 %v2295_v39, %v1207_v4 }
0x2ceb   :  { %1713 = vtanh.f32 %v1208_v34 }
0x2cf1   :  { %v1714_v35 = vpop.eup %1713 }
0x2cf2   :  { %v1210_v36 = vsel %vm16_vm1, %v1714_v35, %v1208_v34 }
0x2cf3   :  { %v1211_v37 = vmul.f32 %v2303_v5, %v1210_v36 }
0x2cf5   :  { %v1212_v38 = vsel %vm19_vm0, %v1211_v37, 0.0 }
0x2cf6   :  { %v1213_v40 = vrot.slane %v1212_v38, 4 }
0x2cf8   :  { %v1214_v41 = vadd.f32 %v1213_v40, %v1212_v38 }
0x2cfa   :  { %v1215_v42 = vrot.slane %v1214_v41, 2 }
0x2cfc   :  { %v1216_v43 = vadd.f32 %v1215_v42, %v1214_v41 }
0x2cfe   :  { %v1217_v44 = vrot.slane %v1216_v43, 1 }
0x2d00   :  { %v1218_v45 = vadd.f32 %v1217_v44, %v1216_v43 }
0x2d02   :  { %v1219_v46 = vmul.f32 %v2288_v61, %v1218_v45 }
0x2d04   :  { %v1220_v47 = vsel %vm19_vm0, %v1219_v46, 0.0 }
0x2d05   :  { %1221 = vadd.xlane.f32.xlu2 %v1220_v47 }
0x2d78   :  { %v1222_v48 = vpop.xlane.xlu2 %1221 }
0x2d79   :  { %v1223_v49 = vadd.f32 %v2295_v39, %v1222_v48 }
0x2d7b   :  { %1715 = vtanh.f32 %v1223_v49 }
0x2d81   :  { %v1716_v50 = vpop.eup %1715 }
0x2d82   :  { %v1225_v51 = vsel %vm16_vm1, %v1716_v50, %v1223_v49 }
0x2d83   :  { %v1226_v52 = vmul.f32 %v2303_v5, %v1225_v51 }
0x2d85   :  { %v1227_v53 = vsel %vm19_vm0, %v1226_v52, 0.0 }
0x2d86   :  { %v1228_v54 = vrot.slane %v1227_v53, 4 }
0x2d88   :  { %v1229_v55 = vadd.f32 %v1228_v54, %v1227_v53 }
0x2d8a   :  { %v1230_v56 = vrot.slane %v1229_v55, 2 }
0x2d8c   :  { %v1231_v57 = vadd.f32 %v1230_v56, %v1229_v55 }
0x2d8e   :  { %v1232_v58 = vrot.slane %v1231_v57, 1 }
0x2d90   :  { %v1233_v59 = vadd.f32 %v1232_v58, %v1231_v57 }
0x2d92   :  { %v1234_v33 = vmul.f32 %v2288_v61, %v1233_v59 }
0x2d94   :  { %v1235_v60 = vsel %vm19_vm0, %v1234_v33, 0.0 }
0x2d95   :  { %1236 = vadd.xlane.f32.xlu0 %v1235_v60 }
0x2e08   :  { %v1237_v9 = vpop.xlane.xlu0 %1236 }
0x2e09   :  { %v1238_v62 = vadd.f32 %v2295_v39, %v1237_v9 }
0x2e0b   :  { %1717 = vtanh.f32 %v1238_v62 }
0x2e11   :  { %v1718_v63 = vpop.eup %1717 }
0x2e12   :  { %v1240_v1 = vsel %vm16_vm1, %v1718_v63, %v1238_v62 }
0x2e13   :  { %v1241_v2 = vmul.f32 %v2303_v5, %v1240_v1 }
0x2e15   :  { %v1242_v3 = vsel %vm19_vm0, %v1241_v2, 0.0 }
0x2e16   :  { %v1243_v6 = vrot.slane %v1242_v3, 4 }
0x2e18   :  { %v1244_v7 = vadd.f32 %v1243_v6, %v1242_v3 }
0x2e1a   :  { %v1245_v10 = vrot.slane %v1244_v7, 2 }
0x2e1c   :  { %v1246_v11 = vadd.f32 %v1245_v10, %v1244_v7 }
0x2e1e   :  { %v1247_v12 = vrot.slane %v1246_v11, 1 }
0x2e20   :  { %v1248_v13 = vadd.f32 %v1247_v12, %v1246_v11 }
0x2e22   :  { %v1249_v14 = vmul.f32 %v2288_v61, %v1248_v13 }
0x2e24   :  { %v1250_v15 = vsel %vm19_vm0, %v1249_v14, 0.0 }
0x2e25   :  { %1251 = vadd.xlane.f32.xlu1 %v1250_v15 }
0x2e98   :  { %v1252_v16 = vpop.xlane.xlu1 %1251 }
0x2e99   :  { %v1253_v17 = vadd.f32 %v2295_v39, %v1252_v16 }
0x2e9b   :  { %1719 = vtanh.f32 %v1253_v17 }
0x2ea1   :  { %v1720_v18 = vpop.eup %1719 }
0x2ea2   :  { %v1255_v19 = vsel %vm16_vm1, %v1720_v18, %v1253_v17 }
0x2ea3   :  { %v1256_v20 = vmul.f32 %v2303_v5, %v1255_v19 }
0x2ea5   :  { %v1257_v21 = vsel %vm19_vm0, %v1256_v20, 0.0 }
0x2ea6   :  { %v1258_v22 = vrot.slane %v1257_v21, 4 }
0x2ea8   :  { %v1259_v23 = vadd.f32 %v1258_v22, %v1257_v21 }
0x2eaa   :  { %v1260_v24 = vrot.slane %v1259_v23, 2 }
0x2eac   :  { %v1261_v25 = vadd.f32 %v1260_v24, %v1259_v23 }
0x2eae   :  { %v1262_v26 = vrot.slane %v1261_v25, 1 }
0x2eb0   :  { %v1263_v27 = vadd.f32 %v1262_v26, %v1261_v25 }
0x2eb2   :  { %v1264_v28 = vmul.f32 %v2288_v61, %v1263_v27 }
0x2eb4   :  { %v1265_v29 = vsel %vm19_vm0, %v1264_v28, 0.0 }
0x2eb5   :  { %1266 = vadd.xlane.f32.xlu2 %v1265_v29 }
0x2f28   :  { %v1267_v30 = vpop.xlane.xlu2 %1266 }
0x2f29   :  { %v1268_v31 = vadd.f32 %v2295_v39, %v1267_v30 }
0x2f2b   :  { %1721 = vtanh.f32 %v1268_v31 }
0x2f31   :  { %v1722_v0 = vpop.eup %1721 }
0x2f32   :  { %v1270_v32 = vsel %vm16_vm1, %v1722_v0, %v1268_v31 }
0x2f33   :  { %v1271_v4 = vmul.f32 %v2303_v5, %v1270_v32 }
0x2f35   :  { %v1272_v34 = vsel %vm19_vm0, %v1271_v4, 0.0 }
0x2f36   :  { %v1273_v35 = vrot.slane %v1272_v34, 4 }
0x2f38   :  { %v1274_v36 = vadd.f32 %v1273_v35, %v1272_v34 }
0x2f3a   :  { %v1275_v37 = vrot.slane %v1274_v36, 2 }
0x2f3c   :  { %v1276_v38 = vadd.f32 %v1275_v37, %v1274_v36 }
0x2f3e   :  { %v1277_v40 = vrot.slane %v1276_v38, 1 }
0x2f40   :  { %v1278_v41 = vadd.f32 %v1277_v40, %v1276_v38 }
0x2f42   :  { %v1279_v42 = vmul.f32 %v2288_v61, %v1278_v41 }
0x2f44   :  { %v1280_v43 = vsel %vm19_vm0, %v1279_v42, 0.0 }
0x2f45   :  { %1281 = vadd.xlane.f32.xlu0 %v1280_v43 }
0x2fb8   :  { %v1282_v44 = vpop.xlane.xlu0 %1281 }
0x2fb9   :  { %v1283_v45 = vadd.f32 %v2295_v39, %v1282_v44 }
0x2fbb   :  { %1723 = vtanh.f32 %v1283_v45 }
0x2fc1   :  { %v1724_v46 = vpop.eup %1723 }
0x2fc2   :  { %v1285_v47 = vsel %vm16_vm1, %v1724_v46, %v1283_v45 }
0x2fc3   :  { %v1286_v48 = vmul.f32 %v2303_v5, %v1285_v47 }
0x2fc5   :  { %v1287_v49 = vsel %vm19_vm0, %v1286_v48, 0.0 }
0x2fc6   :  { %v1288_v50 = vrot.slane %v1287_v49, 4 }
0x2fc8   :  { %v1289_v51 = vadd.f32 %v1288_v50, %v1287_v49 }
0x2fca   :  { %v1290_v52 = vrot.slane %v1289_v51, 2 }
0x2fcc   :  { %v1291_v53 = vadd.f32 %v1290_v52, %v1289_v51 }
0x2fce   :  { %v1292_v54 = vrot.slane %v1291_v53, 1 }
0x2fd0   :  { %v1293_v55 = vadd.f32 %v1292_v54, %v1291_v53 }
0x2fd2   :  { %v1294_v56 = vmul.f32 %v2288_v61, %v1293_v55 }
0x2fd4   :  { %v1295_v57 = vsel %vm19_vm0, %v1294_v56, 0.0 }
0x2fd5   :  { %1296 = vadd.xlane.f32.xlu1 %v1295_v57 }
0x3048   :  { %v1297_v58 = vpop.xlane.xlu1 %1296 }
0x3049   :  { %v1298_v59 = vadd.f32 %v2295_v39, %v1297_v58 }
0x304b   :  { %1725 = vtanh.f32 %v1298_v59 }
0x3051   :  { %v1726_v33 = vpop.eup %1725 }
0x3052   :  { %v1300_v60 = vsel %vm16_vm1, %v1726_v33, %v1298_v59 }
0x3053   :  { %v1301_v9 = vmul.f32 %v2303_v5, %v1300_v60 }
0x3055   :  { %v1302_v62 = vsel %vm19_vm0, %v1301_v9, 0.0 }
0x3056   :  { %v1303_v63 = vrot.slane %v1302_v62, 4 }
0x3058   :  { %v1304_v1 = vadd.f32 %v1303_v63, %v1302_v62 }
0x305a   :  { %v1305_v2 = vrot.slane %v1304_v1, 2 }
0x305c   :  { %v1306_v3 = vadd.f32 %v1305_v2, %v1304_v1 }
0x305e   :  { %v1307_v6 = vrot.slane %v1306_v3, 1 }
0x3060   :  { %v1308_v7 = vadd.f32 %v1307_v6, %v1306_v3 }
0x3062   :  { %v1309_v10 = vmul.f32 %v2288_v61, %v1308_v7 }
0x3064   :  { %v1310_v11 = vsel %vm19_vm0, %v1309_v10, 0.0 }
0x3065   :  { %1311 = vadd.xlane.f32.xlu2 %v1310_v11 }
0x30d8   :  { %v1312_v12 = vpop.xlane.xlu2 %1311 }
0x30d9   :  { %v1313_v13 = vadd.f32 %v2295_v39, %v1312_v12 }
0x30db   :  { %1727 = vtanh.f32 %v1313_v13 }
0x30e1   :  { %v1728_v14 = vpop.eup %1727 }
0x30e2   :  { %v1315_v15 = vsel %vm16_vm1, %v1728_v14, %v1313_v13 }
0x30e3   :  { %v1316_v16 = vmul.f32 %v2303_v5, %v1315_v15 }
0x30e5   :  { %v1317_v17 = vsel %vm19_vm0, %v1316_v16, 0.0 }
0x30e6   :  { %v1318_v18 = vrot.slane %v1317_v17, 4 }
0x30e8   :  { %v1319_v19 = vadd.f32 %v1318_v18, %v1317_v17 }
0x30ea   :  { %v1320_v20 = vrot.slane %v1319_v19, 2 }
0x30ec   :  { %v1321_v21 = vadd.f32 %v1320_v20, %v1319_v19 }
0x30ee   :  { %v1322_v22 = vrot.slane %v1321_v21, 1 }
0x30f0   :  { %v1323_v23 = vadd.f32 %v1322_v22, %v1321_v21 }
0x30f2   :  { %v1324_v24 = vmul.f32 %v2288_v61, %v1323_v23 }
0x30f4   :  { %v1325_v25 = vsel %vm19_vm0, %v1324_v24, 0.0 }
0x30f5   :  { %1326 = vadd.xlane.f32.xlu0 %v1325_v25 }
0x3168   :  { %v1327_v26 = vpop.xlane.xlu0 %1326 }
0x3169   :  { %v1328_v27 = vadd.f32 %v2295_v39, %v1327_v26 }
0x316b   :  { %1729 = vtanh.f32 %v1328_v27 }
0x3171   :  { %v1730_v28 = vpop.eup %1729 }
0x3172   :  { %v1330_v29 = vsel %vm16_vm1, %v1730_v28, %v1328_v27 }
0x3173   :  { %v1331_v30 = vmul.f32 %v2303_v5, %v1330_v29 }
0x3175   :  { %v1332_v31 = vsel %vm19_vm0, %v1331_v30, 0.0 }
0x3176   :  { %v1333_v0 = vrot.slane %v1332_v31, 4 }
0x3178   :  { %v1334_v32 = vadd.f32 %v1333_v0, %v1332_v31 }
0x317a   :  { %v1335_v4 = vrot.slane %v1334_v32, 2 }
0x317c   :  { %v1336_v34 = vadd.f32 %v1335_v4, %v1334_v32 }
0x317e   :  { %v1337_v35 = vrot.slane %v1336_v34, 1 }
0x3180   :  { %v1338_v36 = vadd.f32 %v1337_v35, %v1336_v34 }
0x3182   :  { %v1339_v37 = vmul.f32 %v2288_v61, %v1338_v36 }
0x3184   :  { %v1340_v38 = vsel %vm19_vm0, %v1339_v37, 0.0 }
0x3185   :  { %1341 = vadd.xlane.f32.xlu1 %v1340_v38 }
0x31f8   :  { %v1342_v40 = vpop.xlane.xlu1 %1341 }
0x31f9   :  { %v1343_v41 = vadd.f32 %v2295_v39, %v1342_v40 }
0x31fb   :  { %1731 = vtanh.f32 %v1343_v41 }
0x3201   :  { %v1732_v42 = vpop.eup %1731 }
0x3202   :  { %v1345_v43 = vsel %vm16_vm1, %v1732_v42, %v1343_v41 }
0x3203   :  { %v1346_v44 = vmul.f32 %v2303_v5, %v1345_v43 }
0x3205   :  { %v1347_v45 = vsel %vm19_vm0, %v1346_v44, 0.0 }
0x3206   :  { %v1348_v46 = vrot.slane %v1347_v45, 4 }
0x3208   :  { %v1349_v47 = vadd.f32 %v1348_v46, %v1347_v45 }
0x320a   :  { %v1350_v48 = vrot.slane %v1349_v47, 2 }
0x320c   :  { %v1351_v49 = vadd.f32 %v1350_v48, %v1349_v47 }
0x320e   :  { %v1352_v50 = vrot.slane %v1351_v49, 1 }
0x3210   :  { %v1353_v51 = vadd.f32 %v1352_v50, %v1351_v49 }
0x3212   :  { %v1354_v52 = vmul.f32 %v2288_v61, %v1353_v51 }
0x3214   :  { %v1355_v53 = vsel %vm19_vm0, %v1354_v52, 0.0 }
0x3215   :  { %1356 = vadd.xlane.f32.xlu2 %v1355_v53 }
0x3288   :  { %v1357_v54 = vpop.xlane.xlu2 %1356 }
0x3289   :  { %v1358_v55 = vadd.f32 %v2295_v39, %v1357_v54 }
0x328b   :  { %1733 = vtanh.f32 %v1358_v55 }
0x3291   :  { %v1734_v56 = vpop.eup %1733 }
0x3292   :  { %v1360_v57 = vsel %vm16_vm1, %v1734_v56, %v1358_v55 }
0x3293   :  { %v1361_v58 = vmul.f32 %v2303_v5, %v1360_v57 }
0x3295   :  { %v1362_v59 = vsel %vm19_vm0, %v1361_v58, 0.0 }
0x3296   :  { %v1363_v33 = vrot.slane %v1362_v59, 4 }
0x3298   :  { %v1364_v60 = vadd.f32 %v1363_v33, %v1362_v59 }
0x329a   :  { %v1365_v9 = vrot.slane %v1364_v60, 2 }
0x329c   :  { %v1366_v62 = vadd.f32 %v1365_v9, %v1364_v60 }
0x329e   :  { %v1367_v63 = vrot.slane %v1366_v62, 1 }
0x32a0   :  { %v1368_v1 = vadd.f32 %v1367_v63, %v1366_v62 }
0x32a2   :  { %v1369_v2 = vmul.f32 %v2288_v61, %v1368_v1 }
0x32a4   :  { %v1370_v3 = vsel %vm19_vm0, %v1369_v2, 0.0 }
0x32a5   :  { %1371 = vadd.xlane.f32.xlu0 %v1370_v3 }
0x3318   :  { %v1372_v6 = vpop.xlane.xlu0 %1371 }
0x3319   :  { %v1373_v7 = vadd.f32 %v2295_v39, %v1372_v6 }
0x331b   :  { %1735 = vtanh.f32 %v1373_v7 }
0x3321   :  { %v1736_v10 = vpop.eup %1735 }
0x3322   :  { %v1375_v11 = vsel %vm16_vm1, %v1736_v10, %v1373_v7 }
0x3323   :  { %v1376_v12 = vmul.f32 %v2303_v5, %v1375_v11 }
0x3325   :  { %v1377_v13 = vsel %vm19_vm0, %v1376_v12, 0.0 }
0x3326   :  { %v1378_v14 = vrot.slane %v1377_v13, 4 }
0x3328   :  { %v1379_v15 = vadd.f32 %v1378_v14, %v1377_v13 }
0x332a   :  { %v1380_v16 = vrot.slane %v1379_v15, 2 }
0x332c   :  { %v1381_v17 = vadd.f32 %v1380_v16, %v1379_v15 }
0x332e   :  { %v1382_v18 = vrot.slane %v1381_v17, 1 }
0x3330   :  { %v1383_v19 = vadd.f32 %v1382_v18, %v1381_v17 }
0x3332   :  { %v1384_v20 = vmul.f32 %v2288_v61, %v1383_v19 }
0x3334   :  { %v1385_v21 = vsel %vm19_vm0, %v1384_v20, 0.0 }
0x3335   :  { %1386 = vadd.xlane.f32.xlu1 %v1385_v21 }
0x33a8   :  { %v1387_v22 = vpop.xlane.xlu1 %1386 }
0x33a9   :  { %v1388_v23 = vadd.f32 %v2295_v39, %v1387_v22 }
0x33ab   :  { %1737 = vtanh.f32 %v1388_v23 }
0x33b1   :  { %v1738_v24 = vpop.eup %1737 }
0x33b2   :  { %v1390_v25 = vsel %vm16_vm1, %v1738_v24, %v1388_v23 }
0x33b3   :  { %v1391_v26 = vmul.f32 %v2303_v5, %v1390_v25 }
0x33b5   :  { %v1392_v27 = vsel %vm19_vm0, %v1391_v26, 0.0 }
0x33b6   :  { %v1393_v28 = vrot.slane %v1392_v27, 4 }
0x33b8   :  { %v1394_v29 = vadd.f32 %v1393_v28, %v1392_v27 }
0x33ba   :  { %v1395_v30 = vrot.slane %v1394_v29, 2 }
0x33bc   :  { %v1396_v31 = vadd.f32 %v1395_v30, %v1394_v29  ;;  %v1761_v29 = vld [vmem:[%s2555_s0] sm:$0xff] }
0x33be   :  { %v1397_v0 = vrot.slane %v1396_v31, 1 }
0x33c0   :  { %v1398_v32 = vadd.f32 %v1397_v0, %v1396_v31 }
0x33c2   :  { %v1399_v4 = vmul.f32 %v2288_v61, %v1398_v32 }
0x33c4   :  { %v1400_v34 = vsel %vm19_vm0, %v1399_v4, 0.0 }
0x33c5   :  { %1401 = vadd.xlane.f32.xlu2 %v1400_v34  ;;  %v1763_v34 = vld [vmem:[%s2555_s0 + $0x8] sm:$0xff] }
0x3438   :  { %v1402_v35 = vpop.xlane.xlu2 %1401 }
0x3439   :  { %v1403_v36 = vadd.f32 %v2295_v39, %v1402_v35 }
0x343b   :  { %1739 = vtanh.f32 %v1403_v36 }
0x3441   :  { %v1740_v37 = vpop.eup %1739 }
0x3442   :  { %v1405_v38 = vsel %vm16_vm1, %v1740_v37, %v1403_v36 }
0x3443   :  { %v1406_v40 = vmul.f32 %v2303_v5, %v1405_v38 }
0x3445   :  { %v1407_v41 = vsel %vm19_vm0, %v1406_v40, 0.0 }
0x3446   :  { %v1408_v42 = vrot.slane %v1407_v41, 4 }
0x3448   :  { %v1409_v43 = vadd.f32 %v1408_v42, %v1407_v41 }
0x344a   :  { %v1410_v44 = vrot.slane %v1409_v43, 2 }
0x344c   :  { %v1411_v45 = vadd.f32 %v1410_v44, %v1409_v43 }
0x344e   :  { %v1412_v46 = vrot.slane %v1411_v45, 1 }
0x3450   :  { %v1413_v47 = vadd.f32 %v1412_v46, %v1411_v45 }
0x3452   :  { %v1414_v48 = vmul.f32 %v2288_v61, %v1413_v47 }
0x3454   :  { %v1415_v49 = vsel %vm19_vm0, %v1414_v48, 0.0 }
0x3455   :  { %1416 = vadd.xlane.f32.xlu0 %v1415_v49 }
0x34c8   :  { %v1417_v50 = vpop.xlane.xlu0 %1416 }
0x34c9   :  { %v1418_v51 = vadd.f32 %v2295_v39, %v1417_v50 }
0x34cb   :  { %1741 = vtanh.f32 %v1418_v51 }
0x34d1   :  { %v1742_v52 = vpop.eup %1741 }
0x34d2   :  { %v1420_v53 = vsel %vm16_vm1, %v1742_v52, %v1418_v51 }
0x34d3   :  { %v1421_v54 = vmul.f32 %v2303_v5, %v1420_v53 }
0x34d5   :  { %v1422_v55 = vsel %vm19_vm0, %v1421_v54, 0.0 }
0x34d6   :  { %v1423_v56 = vrot.slane %v1422_v55, 4 }
0x34d8   :  { %v1424_v57 = vadd.f32 %v1423_v56, %v1422_v55 }
0x34da   :  { %v1425_v58 = vrot.slane %v1424_v57, 2 }
0x34dc   :  { %v1426_v59 = vadd.f32 %v1425_v58, %v1424_v57 }
0x34de   :  { %v1427_v33 = vrot.slane %v1426_v59, 1 }
0x34e0   :  { %v1428_v60 = vadd.f32 %v1427_v33, %v1426_v59 }
0x34e2   :  { %v1429_v9 = vmul.f32 %v2288_v61, %v1428_v60 }
0x34e4   :  { %v1430_v62 = vsel %vm19_vm0, %v1429_v9, 0.0 }
0x34e5   :  { %1431 = vadd.xlane.f32.xlu1 %v1430_v62 }
0x3558   :  { %v1432_v63 = vpop.xlane.xlu1 %1431 }
0x3559   :  { %v1433_v1 = vadd.f32 %v2295_v39, %v1432_v63 }
0x355b   :  { %1743 = vtanh.f32 %v1433_v1 }
0x3561   :  { %v1744_v2 = vpop.eup %1743 }
0x3562   :  { %v1435_v3 = vsel %vm16_vm1, %v1744_v2, %v1433_v1 }
0x3563   :  { %v1436_v6 = vmul.f32 %v2303_v5, %v1435_v3 }
0x3565   :  { %v1437_v7 = vsel %vm19_vm0, %v1436_v6, 0.0 }
0x3566   :  { %v1438_v10 = vrot.slane %v1437_v7, 4 }
0x3568   :  { %v1439_v11 = vadd.f32 %v1438_v10, %v1437_v7 }
0x356a   :  { %v1440_v12 = vrot.slane %v1439_v11, 2 }
0x356c   :  { %v1441_v13 = vadd.f32 %v1440_v12, %v1439_v11 }
0x356e   :  { %v1442_v14 = vrot.slane %v1441_v13, 1 }
0x3570   :  { %v1443_v15 = vadd.f32 %v1442_v14, %v1441_v13 }
0x3572   :  { %v1444_v16 = vmul.f32 %v2288_v61, %v1443_v15 }
0x3574   :  { %v1445_v17 = vsel %vm19_vm0, %v1444_v16, 0.0 }
0x3575   :  { %1446 = vadd.xlane.f32.xlu2 %v1445_v17 }
0x35e8   :  { %v1447_v18 = vpop.xlane.xlu2 %1446 }
0x35e9   :  { %v1448_v19 = vadd.f32 %v2295_v39, %v1447_v18 }
0x35eb   :  { %1745 = vtanh.f32 %v1448_v19 }
0x35f1   :  { %v1746_v20 = vpop.eup %1745 }
0x35f2   :  { %v1450_v21 = vsel %vm16_vm1, %v1746_v20, %v1448_v19 }
0x35f3   :  { %v1451_v22 = vmul.f32 %v2303_v5, %v1450_v21  ;;  %v1762_v5 = vld [vmem:[%s2555_s0 + $0x10] sm:$0xff] }
0x35f5   :  { %v1452_v23 = vsel %vm19_vm0, %v1451_v22, 0.0 }
0x35f6   :  { %v1453_v24 = vrot.slane %v1452_v23, 4 }
0x35f8   :  { %v1454_v25 = vadd.f32 %v1453_v24, %v1452_v23 }
0x35fa   :  { %v1455_v26 = vrot.slane %v1454_v25, 2 }
0x35fc   :  { %v1456_v27 = vadd.f32 %v1455_v26, %v1454_v25  ;;  %v12_v25 = vld [vmem:[%s2555_s0 + $0x18] sm:$0x1]  ;;  %s1542_s0 = sshll.u32 %s2556_s1, 4  ;;  %s1543_s0 = int_to_ptr.hbm [resolvable:$true] %s1542_s0 }
0x35fe   :  { %v1457_v61 = vrot.slane %v1456_v27, 1 }
0x3600   :  { %v1458_v28 = vadd.f32 %v1457_v61, %v1456_v27 }
0x3602   :  { %v1459_v39 = vmul.f32 %v1761_v29, %v1458_v28 }
0x3604   :  { %v1460_v30 = vsel %vm19_vm0, %v1459_v39, 0.0 }
0x3605   :  { %1461 = vadd.xlane.f32.xlu0 %v1460_v30 }
0x3678   :  { %v1462_v31 = vpop.xlane.xlu0 %1461 }
0x3679   :  { %v1463_v0 = vadd.f32 %v1762_v5, %v1462_v31 }
0x367b   :  { %1747 = vtanh.f32 %v1463_v0 }
0x3681   :  { %v1748_v32 = vpop.eup %1747 }
0x3682   :  { %v1465_v4 = vsel %vm16_vm1, %v1748_v32, %v1463_v0 }
0x3683   :  { %v1466_v35 = vmul.f32 %v1763_v34, %v1465_v4 }
0x3685   :  { %v1467_v36 = vsel %vm19_vm0, %v1466_v35, 0.0 }
0x3686   :  { %v1468_v37 = vrot.slane %v1467_v36, 4 }
0x3688   :  { %v1469_v38 = vadd.f32 %v1468_v37, %v1467_v36 }
0x368a   :  { %v1470_v40 = vrot.slane %v1469_v38, 2 }
0x368c   :  { %v1471_v41 = vadd.f32 %v1470_v40, %v1469_v38 }
0x368e   :  { %v1472_v42 = vrot.slane %v1471_v41, 1 }
0x3690   :  { %v1473_v43 = vadd.f32 %v1472_v42, %v1471_v41 }
0x3692   :  { %v1474_v44 = vmul.f32 %v1761_v29, %v1473_v43 }
0x3694   :  { %v1475_v45 = vsel %vm19_vm0, %v1474_v44, 0.0 }
0x3695   :  { %1476 = vadd.xlane.f32.xlu1 %v1475_v45 }
0x3708   :  { %v1477_v46 = vpop.xlane.xlu1 %1476 }
0x3709   :  { %v1478_v47 = vadd.f32 %v1762_v5, %v1477_v46 }
0x370b   :  { %1749 = vtanh.f32 %v1478_v47 }
0x3711   :  { %v1750_v48 = vpop.eup %1749 }
0x3712   :  { %v1480_v49 = vsel %vm16_vm1, %v1750_v48, %v1478_v47 }
0x3713   :  { %v1481_v50 = vmul.f32 %v1763_v34, %v1480_v49 }
0x3715   :  { %v1482_v51 = vsel %vm19_vm0, %v1481_v50, 0.0 }
0x3716   :  { %v1483_v52 = vrot.slane %v1482_v51, 4 }
0x3718   :  { %v1484_v53 = vadd.f32 %v1483_v52, %v1482_v51 }
0x371a   :  { %v1485_v54 = vrot.slane %v1484_v53, 2 }
0x371c   :  { %v1486_v55 = vadd.f32 %v1485_v54, %v1484_v53 }
0x371e   :  { %v1487_v56 = vrot.slane %v1486_v55, 1 }
0x3720   :  { %v1488_v57 = vadd.f32 %v1487_v56, %v1486_v55 }
0x3722   :  { %v1489_v58 = vmul.f32 %v1761_v29, %v1488_v57 }
0x3724   :  { %v1490_v59 = vsel %vm19_vm0, %v1489_v58, 0.0 }
0x3725   :  { %1491 = vadd.xlane.f32.xlu2 %v1490_v59 }
0x3798   :  { %v1492_v33 = vpop.xlane.xlu2 %1491 }
0x3799   :  { %v1493_v60 = vadd.f32 %v1762_v5, %v1492_v33 }
0x379b   :  { %1751 = vtanh.f32 %v1493_v60 }
0x37a1   :  { %v1752_v9 = vpop.eup %1751 }
0x37a2   :  { %v1495_v62 = vsel %vm16_vm1, %v1752_v9, %v1493_v60 }
0x37a3   :  { %v1496_v63 = vmul.f32 %v1763_v34, %v1495_v62 }
0x37a5   :  { %v1497_v1 = vsel %vm19_vm0, %v1496_v63, 0.0 }
0x37a6   :  { %v1498_v2 = vrot.slane %v1497_v1, 4 }
0x37a8   :  { %v1499_v3 = vadd.f32 %v1498_v2, %v1497_v1 }
0x37aa   :  { %v1500_v6 = vrot.slane %v1499_v3, 2 }
0x37ac   :  { %v1501_v7 = vadd.f32 %v1500_v6, %v1499_v3 }
0x37ae   :  { %v1502_v10 = vrot.slane %v1501_v7, 1 }
0x37b0   :  { %v1503_v11 = vadd.f32 %v1502_v10, %v1501_v7 }
0x37b2   :  { %v1504_v12 = vmul.f32 %v1761_v29, %v1503_v11 }
0x37b4   :  { %v1505_v13 = vsel %vm19_vm0, %v1504_v12, 0.0 }
0x37b5   :  { %1506 = vadd.xlane.f32.xlu0 %v1505_v13 }
0x3828   :  { %v1507_v14 = vpop.xlane.xlu0 %1506 }
0x3829   :  { %v1508_v15 = vadd.f32 %v1762_v5, %v1507_v14 }
0x382b   :  { %1753 = vtanh.f32 %v1508_v15 }
0x3831   :  { %v1754_v16 = vpop.eup %1753 }
0x3832   :  { %v1510_v17 = vsel %vm16_vm1, %v1754_v16, %v1508_v15 }
0x3833   :  { %v1511_v18 = vmul.f32 %v1763_v34, %v1510_v17 }
0x3835   :  { %v1512_v19 = vsel %vm19_vm0, %v1511_v18, 0.0 }
0x3836   :  { %v1513_v20 = vrot.slane %v1512_v19, 4 }
0x3838   :  { %v1514_v21 = vadd.f32 %v1513_v20, %v1512_v19 }
0x383a   :  { %v1515_v22 = vrot.slane %v1514_v21, 2 }
0x383c   :  { %v1516_v23 = vadd.f32 %v1515_v22, %v1514_v21 }
0x383e   :  { %v1517_v24 = vrot.slane %v1516_v23, 1 }
0x3840   :  { %v1518_v26 = vadd.f32 %v1517_v24, %v1516_v23 }
0x3842   :  { %v1519_v27 = vmul.f32 %v1518_v26, %v12_v25 }
0x3844   :  { %v1520_v61 = vmul.f32 %v1519_v27, %v1518_v26 }
0x3846   :  { %v1522_v28 = vsel %vm1521_vm2, %v1520_v61, 0.0 }
0x3847   :  { %1523 = vadd.xlane.f32.xlu1 %v1522_v28 }
0x38ba   :  { %v1524_v8 = vpop.xlane.xlu1 %1523 }
0x38bb   :  { %v1525_v29 = vrot.slane %v1524_v8, 4 }
0x38bd   :  { %v1526_v39 = vadd.f32 %v1525_v29, %v1524_v8 }
0x38bf   :  { %v1527_v30 = vrot.slane %v1526_v39, 2 }
0x38c1   :  { %v1528_v31 = vadd.f32 %v1527_v30, %v1526_v39 }
0x38c3   :  { %v1529_v5 = vrot.slane %v1528_v31, 1 }
0x38c5   :  { %v1530_v0 = vadd.f32 %v1529_v5, %v1528_v31 }
0x38c7   :  { %1551 = vpush %v1530_v0 }
0x38f8   :  { %s1552_s9 = spop %1551 }
0x38f9   :  { %v1532_v32 = vstv %s1552_s9 }
0x38fa   :  { %1534 = vst.msk [vmem:[#allocation2] sm:$0x1] %vm1533_vm3, %v1532_v32 }
0x38fb   :  { %1545 = dma.vmem_to_hbm [thread:$0]  %s1541_s6, 16, %s1543_s0, [#allocation3]  }
0x38fc   :  { %1788 = dma.done.wait [#allocation3], 16  }
0x38fd   :  { %1789 = vsyncadd [#allocation3], 4294967280 }
0x38fe   :  { %1550 = vsyncpa [#allocation3], 1 }

</bundles_post_ra>
